<compile_context>
chip_gen: v6e
topology: v6e:2x2x1
jax: 0.10.0
libtpu: 0.0.40
codegen_flags: <defaults>
</compile_context>

<pallas_src>
import functools

import numpy as np
import jax
import jax.numpy as jnp
from jax import lax
from jax.experimental import pallas as pl
from jax.experimental.pallas import tpu as pltpu

_NEG_SLOPE = 0.2
_MAX_NB = 8          # images per grid step (fattens MXU M past 128; tune per chip)


def _band_conv_weights(w, W):
    """(3,3,Cin,Cout) conv kernel -> (3, (W+1)*Cin, W*Cout) width-banded bf16 matrices.

    Padded activation rows are packed as (W+1) width groups of Cin channels:
    groups 0..W-1 hold the image, group W is a zero column group (right pad);
    the left zero-pad tap simply has no band entries.  With that layout the
    3x3 conv is:  out[r, :] = sum_dy  padded[r+dy, :] @ band[dy].
    """
    w_np = np.asarray(w, dtype=np.float32)
    cin, cout = w_np.shape[2], w_np.shape[3]
    band = np.zeros((3, (W + 1) * cin, W * cout), dtype=np.float32)
    for dy in range(3):
        for wo in range(W):
            for dx in range(3):
                wi = wo + dx - 1
                if wi < 0:
                    continue              # left zero-pad tap contributes nothing
                band[dy, wi * cin:(wi + 1) * cin,
                     wo * cout:(wo + 1) * cout] = w_np[dy, dx]
    # bf16 halves the dominant weight DMA and makes the MXU matmuls single-pass.
    return jnp.asarray(band, dtype=jnp.bfloat16)


def _meta_fused_kernel(*refs, NB, H, W, cins, couts, neg_slope):
    """One batch block (NB images): the full 6-layer stack, activations in VMEM.

    refs = [x] + [band]*L + [scale]*L + [shift]*L      (inputs)
         + [out]*L                                      (outputs)
         + [pad]*(L-1)                                  (VMEM scratch)

    x:        (R, (W+1)*Cin0)  f32  row-padded packed input (R = NB*(H+2))
    band[i]:  (3, (W+1)*Cin_i, W*Cout_i)  bf16 width-banded conv weights
    scale[i]: (1, W*Cout_i)   f32  BN scale, tiled over width
    shift[i]: (1, W*Cout_i)   f32  BN shift + folded conv bias, tiled
    out[i]:   (R, W*Cout_i)   f32  row-padded packed feature map
    pad[i]:   (R, (W+1)*Cout_i) f32  padded LHS of layer i+1
    """
    L = len(cins)
    x_ref = refs[0]
    band_refs = refs[1:1 + L]
    scale_refs = refs[1 + L:1 + 2 * L]
    shift_refs = refs[1 + 2 * L:1 + 3 * L]
    out_refs = refs[1 + 3 * L:1 + 4 * L]
    pad_refs = refs[1 + 4 * L:]

    Hp = H + 2                 # per-image rows incl. top/bottom zero pad
    R = NB * Hp                # padded rows in this batch block
    M = R - 2                  # fat matmul M (includes junk rows at image seams)

    lhs = x_ref                # layer-0 LHS comes pre-padded from the wrapper
    for i in range(L):
        cin, cout = cins[i], couts[i]
        band = band_refs[i]

        # 3x3 conv == 3 fat MXU matmuls (one per kernel row dy), bf16 x bf16 -> f32
        acc = jnp.dot(lhs[0:M, :].astype(jnp.bfloat16), band[0],
                      preferred_element_type=jnp.float32)
        acc = acc + jnp.dot(lhs[1:1 + M, :].astype(jnp.bfloat16), band[1],
                            preferred_element_type=jnp.float32)
        acc = acc + jnp.dot(lhs[2:2 + M, :].astype(jnp.bfloat16), band[2],
                            preferred_element_type=jnp.float32)

        # fused conv bias + inference BatchNorm (bias pre-folded into shift)
        y = acc * scale_refs[i][...] + shift_refs[i][...]
        if i < L - 1:                                    # LeakyReLU (not on conv6)
            y = jnp.maximum(y, neg_slope * y)

        # one fat lane-dense store; image-seam rows are junk, the wrapper drops them
        out_refs[i][0:M, :] = y

        if i < L - 1:
            p = pad_refs[i]                              # (R, (W+1)*cout) f32
            # interior rows of every image (seam rows get junk, re-zeroed below)
            p[1:1 + M, :W * cout] = y
            # re-zero vertical borders + right width-pad group every step
            # (NOT gated on program_id -> correct under megacore partitioning)
            zrow = jnp.zeros((1, (W + 1) * cout), dtype=p.dtype)
            for b in range(NB):
                p[b * Hp:b * Hp + 1, :] = zrow           # top border of image b
                p[b * Hp + H + 1:b * Hp + H + 2, :] = zrow   # bottom border
            p[:, W * cout:] = jnp.zeros((R, cout), dtype=p.dtype)
            lhs = p


def _choose_batching(N):
    if N <= _MAX_NB:
        return N, N                       # one grid step processes the whole batch
    NB = _MAX_NB                          # NB*(H+2) stays a multiple of 8
    n_pad = ((N + NB - 1) // NB) * NB
    return NB, n_pad


@functools.partial(jax.jit,
                   static_argnames=("H", "W", "cins", "couts", "NB", "NPAD"))
def _meta_forward_impl(x_nchw, bands, scales, shifts, *, H, W, cins, couts,
                       NB, NPAD):
    N = x_nchw.shape[0]
    Hp = H + 2
    R = NB * Hp
    G = NPAD // NB
    C0 = cins[0]

    # NCHW -> NHWC -> zero-pad (batch to NPAD, H by 1/1, W by 0/1)
    #       -> row-padded packed (NPAD*(H+2), (W+1)*C0)
    x = jnp.transpose(x_nchw, (0, 2, 3, 1))
    x = jnp.pad(x, ((0, NPAD - N), (1, 1), (0, 1), (0, 0)))
    x = x.reshape(NPAD * Hp, (W + 1) * C0)

    kernel = functools.partial(_meta_fused_kernel, NB=NB, H=H, W=W,
                               cins=cins, couts=couts, neg_slope=_NEG_SLOPE)

    in_specs = [pl.BlockSpec((R, (W + 1) * C0), lambda g: (g, 0))]
    # bands/scales/shifts are grid-invariant (constant index maps) -> fetched once.
    in_specs += [pl.BlockSpec(b.shape, lambda g: (0, 0, 0)) for b in bands]
    in_specs += [pl.BlockSpec(s.shape, lambda g: (0, 0)) for s in scales]
    in_specs += [pl.BlockSpec(s.shape, lambda g: (0, 0)) for s in shifts]

    out_shape = tuple(jax.ShapeDtypeStruct((NPAD * Hp, W * c), jnp.float32)
                      for c in couts)
    out_specs = [pl.BlockSpec((R, W * c), lambda g: (g, 0)) for c in couts]

    scratch = [pltpu.VMEM((R, (W + 1) * c), jnp.float32) for c in couts[:-1]]

    outs = pl.pallas_call(
        kernel,
        out_shape=out_shape,
        grid_spec=pltpu.PrefetchScalarGridSpec(
            num_scalar_prefetch=0,
            grid=(G,),
            in_specs=in_specs,
            out_specs=out_specs,
            scratch_shapes=scratch),
        compiler_params=pltpu.CompilerParams(
            dimension_semantics=("parallel",),
            vmem_limit_bytes=32 * 1024 * 1024),
    )(x, *bands, *scales, *shifts)

    # row-padded packed (NPAD*(H+2), W*C) -> NCHW once, dropping pad rows / pad images
    feats = tuple(
        jnp.transpose(o.reshape(NPAD, Hp, W, c)[:N, :H], (0, 3, 1, 2))
        for o, c in zip(outs, couts))
    return feats


def prepare_meta_kernel_params(params, W):
    """One-time host-side prep (cache the result across forward calls):
    bf16 banded weights, width-tiled BN scale, conv bias folded into shift."""
    bands, scales, shifts = [], [], []
    for p in params:
        cout = p["w"].shape[3]
        bands.append(_band_conv_weights(p["w"], W))
        shift = p["shift"] + p["b"] * p["scale"]         # fold conv bias into shift
        scales.append(jnp.tile(p["scale"], W).reshape(1, W * cout)
                      .astype(jnp.float32))
        shifts.append(jnp.tile(shift, W).reshape(1, W * cout)
                      .astype(jnp.float32))
    return tuple(bands), tuple(scales), tuple(shifts)


def meta_forward(x_nchw, params, prepared=None):
    """Forward pass of Meta. Returns the 6 feature maps in NCHW (f32)."""
    N, C0, H, W = x_nchw.shape
    cins = tuple(int(p["w"].shape[2]) for p in params)
    couts = tuple(int(p["w"].shape[3]) for p in params)
    assert cins[0] == C0
    if prepared is None:                                  # cache `prepared` yourself
        prepared = prepare_meta_kernel_params(params, W)  # to amortize host prep
    bands, scales, shifts = prepared
    NB, NPAD = _choose_batching(N)
    return _meta_forward_impl(x_nchw, bands, scales, shifts, H=H, W=W,
                              cins=cins, couts=couts, NB=NB, NPAD=NPAD)


def init_meta_params(key, base):
    """Deterministic parameter construction matching Meta(base).__init__ shapes."""
    chans = [(12, base * 2), (base * 2, base * 4), (base * 4, base * 8),
             (base * 8, base * 4), (base * 4, base * 2), (base * 2, 3)]
    has_bn = [False, True, True, True, True, False]
    eps = 1e-5
    params = []
    for i, (cin, cout) in enumerate(chans):
        key, kw, kb, kg, kbe, km, kv = jax.random.split(key, 7)
        w = 0.1 * jax.random.normal(kw, (3, 3, cin, cout), dtype=jnp.float32)
        b = 0.05 * jax.random.normal(kb, (cout,), dtype=jnp.float32)
        if has_bn[i]:
            gamma = 1.0 + 0.1 * jax.random.normal(kg, (cout,), dtype=jnp.float32)
            beta = 0.05 * jax.random.normal(kbe, (cout,), dtype=jnp.float32)
            mean = 0.1 * jax.random.normal(km, (cout,), dtype=jnp.float32)
            var = jax.nn.softplus(jax.random.normal(kv, (cout,),
                                                    dtype=jnp.float32)) + 0.5
            scale = gamma / jnp.sqrt(var + eps)
            shift = beta - mean * scale
        else:
            scale = jnp.ones((cout,), dtype=jnp.float32)
            shift = jnp.zeros((cout,), dtype=jnp.float32)
        params.append(dict(w=w, b=b, scale=scale, shift=shift))
    return params


def _reference_forward(x_nchw, params, *, bf16_operands=False):
    """Pure-JAX reference. bf16_operands=True mirrors the kernel's precision
    (bf16 matmul operands, f32 accumulation, f32 activations between layers)."""
    x = jnp.transpose(x_nchw, (0, 2, 3, 1))
    feats = []
    n = len(params)
    for i, p in enumerate(params):
        if bf16_operands:
            y = lax.conv_general_dilated(
                x.astype(jnp.bfloat16), p["w"].astype(jnp.bfloat16),
                window_strides=(1, 1), padding="SAME",
                dimension_numbers=("NHWC", "HWIO", "NHWC"),
                preferred_element_type=jnp.float32)
        else:
            y = lax.conv_general_dilated(
                x, p["w"], window_strides=(1, 1), padding="SAME",
                dimension_numbers=("NHWC", "HWIO", "NHWC"),
                precision=lax.Precision.HIGHEST)
        y = y + p["b"]
        y = y * p["scale"] + p["shift"]
        if i < n - 1:
            y = jnp.where(y >= 0.0, y, 0.2 * y)
        x = y
        feats.append(jnp.transpose(y, (0, 3, 1, 2)))
    return tuple(feats)


if __name__ == "__main__":
    base = 4
    N, C, H, W = 2, 12, 16, 16   # Meta.conv1 expects 12 input channels

    key = jax.random.PRNGKey(0)
    kx, kp = jax.random.split(key)
    x = jax.random.normal(kx, (N, C, H, W), dtype=jnp.float32)
    params = init_meta_params(kp, base)

    prepared = prepare_meta_kernel_params(params, W)      # one-time host prep
    outs = jax.block_until_ready(meta_forward(x, params, prepared))

    # Tight check against a reference with the SAME precision (bf16 operands,
    # f32 accumulation) -> verifies banding / padding / BN / layout exactly.
    refs_bf16 = _reference_forward(x, params, bf16_operands=True)
    # Loose plausibility check against the full-f32 reference (the only
    # difference is bf16 operand rounding compounded over six layers).
    refs_f32 = _reference_forward(x, params, bf16_operands=False)

    for li, (o, rb, rf) in enumerate(zip(outs, refs_bf16, refs_f32)):
        assert o.shape == rb.shape
        err_b = float(jnp.max(jnp.abs(o - rb)))
        err_f = float(jnp.max(jnp.abs(o - rf)))
        assert err_b < 1e-2, f"layer {li}: mismatch vs bf16-matched ref: {err_b}"
        assert err_f < 2e-1, f"layer {li}: mismatch vs f32 ref: {err_f}"

    print("KERNEL_OK")
</pallas_src>

<mosaic_0001>
module attributes {stable_mosaic.version = 11 : i64} {
  func.func @_meta_fused_kernel(%arg0: i32, %arg1: memref<36x204xf32, #tpu.memory_space<vmem>>, %arg2: memref<3x204x128xbf16, #tpu.memory_space<vmem>>, %arg3: memref<3x136x256xbf16, #tpu.memory_space<vmem>>, %arg4: memref<3x272x512xbf16, #tpu.memory_space<vmem>>, %arg5: memref<3x544x256xbf16, #tpu.memory_space<vmem>>, %arg6: memref<3x272x128xbf16, #tpu.memory_space<vmem>>, %arg7: memref<3x136x48xbf16, #tpu.memory_space<vmem>>, %arg8: memref<1x128xf32, #tpu.memory_space<vmem>>, %arg9: memref<1x256xf32, #tpu.memory_space<vmem>>, %arg10: memref<1x512xf32, #tpu.memory_space<vmem>>, %arg11: memref<1x256xf32, #tpu.memory_space<vmem>>, %arg12: memref<1x128xf32, #tpu.memory_space<vmem>>, %arg13: memref<1x48xf32, #tpu.memory_space<vmem>>, %arg14: memref<1x128xf32, #tpu.memory_space<vmem>>, %arg15: memref<1x256xf32, #tpu.memory_space<vmem>>, %arg16: memref<1x512xf32, #tpu.memory_space<vmem>>, %arg17: memref<1x256xf32, #tpu.memory_space<vmem>>, %arg18: memref<1x128xf32, #tpu.memory_space<vmem>>, %arg19: memref<1x48xf32, #tpu.memory_space<vmem>>, %arg20: memref<36x128xf32, #tpu.memory_space<vmem>>, %arg21: memref<36x256xf32, #tpu.memory_space<vmem>>, %arg22: memref<36x512xf32, #tpu.memory_space<vmem>>, %arg23: memref<36x256xf32, #tpu.memory_space<vmem>>, %arg24: memref<36x128xf32, #tpu.memory_space<vmem>>, %arg25: memref<36x48xf32, #tpu.memory_space<vmem>>, %arg26: memref<36x136xf32, #tpu.memory_space<vmem>>, %arg27: memref<36x272xf32, #tpu.memory_space<vmem>>, %arg28: memref<36x544xf32, #tpu.memory_space<vmem>>, %arg29: memref<36x272xf32, #tpu.memory_space<vmem>>, %arg30: memref<36x136xf32, #tpu.memory_space<vmem>>) attributes {dimension_semantics = [#tpu.dimension_semantics<parallel>], iteration_bounds = array<i64: 1>, scalar_prefetch = 0 : i64, scratch_operands = 5 : i64, tpu.core_type = #tpu.core_type<tc>, window_params = [{transform_indices = @transform_0, window_bounds = array<i64: 36, 204>}, {pipeline_mode = #tpu.pipeline_mode<synchronous>, transform_indices = @transform_1, window_bounds = array<i64: 3, 204, 128>}, {pipeline_mode = #tpu.pipeline_mode<synchronous>, transform_indices = @transform_2, window_bounds = array<i64: 3, 136, 256>}, {pipeline_mode = #tpu.pipeline_mode<synchronous>, transform_indices = @transform_3, window_bounds = array<i64: 3, 272, 512>}, {pipeline_mode = #tpu.pipeline_mode<synchronous>, transform_indices = @transform_4, window_bounds = array<i64: 3, 544, 256>}, {pipeline_mode = #tpu.pipeline_mode<synchronous>, transform_indices = @transform_5, window_bounds = array<i64: 3, 272, 128>}, {pipeline_mode = #tpu.pipeline_mode<synchronous>, transform_indices = @transform_6, window_bounds = array<i64: 3, 136, 48>}, {pipeline_mode = #tpu.pipeline_mode<synchronous>, transform_indices = @transform_7, window_bounds = array<i64: 1, 128>}, {pipeline_mode = #tpu.pipeline_mode<synchronous>, transform_indices = @transform_8, window_bounds = array<i64: 1, 256>}, {pipeline_mode = #tpu.pipeline_mode<synchronous>, transform_indices = @transform_9, window_bounds = array<i64: 1, 512>}, {pipeline_mode = #tpu.pipeline_mode<synchronous>, transform_indices = @transform_10, window_bounds = array<i64: 1, 256>}, {pipeline_mode = #tpu.pipeline_mode<synchronous>, transform_indices = @transform_11, window_bounds = array<i64: 1, 128>}, {pipeline_mode = #tpu.pipeline_mode<synchronous>, transform_indices = @transform_12, window_bounds = array<i64: 1, 48>}, {pipeline_mode = #tpu.pipeline_mode<synchronous>, transform_indices = @transform_13, window_bounds = array<i64: 1, 128>}, {pipeline_mode = #tpu.pipeline_mode<synchronous>, transform_indices = @transform_14, window_bounds = array<i64: 1, 256>}, {pipeline_mode = #tpu.pipeline_mode<synchronous>, transform_indices = @transform_15, window_bounds = array<i64: 1, 512>}, {pipeline_mode = #tpu.pipeline_mode<synchronous>, transform_indices = @transform_16, window_bounds = array<i64: 1, 256>}, {pipeline_mode = #tpu.pipeline_mode<synchronous>, transform_indices = @transform_17, window_bounds = array<i64: 1, 128>}, {pipeline_mode = #tpu.pipeline_mode<synchronous>, transform_indices = @transform_18, window_bounds = array<i64: 1, 48>}, {transform_indices = @transform_19, window_bounds = array<i64: 36, 128>}, {transform_indices = @transform_20, window_bounds = array<i64: 36, 256>}, {transform_indices = @transform_21, window_bounds = array<i64: 36, 512>}, {transform_indices = @transform_22, window_bounds = array<i64: 36, 256>}, {transform_indices = @transform_23, window_bounds = array<i64: 36, 128>}, {transform_indices = @transform_24, window_bounds = array<i64: 36, 48>}]} {
    %c0 = arith.constant 0 : index
    %c0_0 = arith.constant 0 : index
    %0 = vector.load %arg1[%c0, %c0_0] : memref<36x204xf32, #tpu.memory_space<vmem>>, vector<34x204xf32>
    %1 = arith.truncf %0 : vector<34x204xf32> to vector<34x204xbf16>
    %c0_1 = arith.constant 0 : index
    %c0_2 = arith.constant 0 : index
    %c0_3 = arith.constant 0 : index
    %2 = vector.load %arg2[%c0_1, %c0_2, %c0_3] : memref<3x204x128xbf16, #tpu.memory_space<vmem>>, vector<1x204x128xbf16>
    %3 = vector.shape_cast %2 : vector<1x204x128xbf16> to vector<204x128xbf16>
    %cst = arith.constant dense<0.000000e+00> : vector<34x128xf32>
    %4 = tpu.matmul %1, %3, %cst {dimension_numbers = #tpu.dot_dimension_numbers<[1], [0], [0], [1], [0, 0, 1, 1], [], []>} : vector<34x204xbf16>, vector<204x128xbf16>, vector<34x128xf32> -> vector<34x128xf32>
    %c1 = arith.constant 1 : index
    %c0_4 = arith.constant 0 : index
    %5 = vector.load %arg1[%c1, %c0_4] : memref<36x204xf32, #tpu.memory_space<vmem>>, vector<34x204xf32>
    %6 = arith.truncf %5 : vector<34x204xf32> to vector<34x204xbf16>
    %c1_5 = arith.constant 1 : index
    %c0_6 = arith.constant 0 : index
    %c0_7 = arith.constant 0 : index
    %7 = vector.load %arg2[%c1_5, %c0_6, %c0_7] : memref<3x204x128xbf16, #tpu.memory_space<vmem>>, vector<1x204x128xbf16>
    %8 = vector.shape_cast %7 : vector<1x204x128xbf16> to vector<204x128xbf16>
    %cst_8 = arith.constant dense<0.000000e+00> : vector<34x128xf32>
    %9 = tpu.matmul %6, %8, %cst_8 {dimension_numbers = #tpu.dot_dimension_numbers<[1], [0], [0], [1], [0, 0, 1, 1], [], []>} : vector<34x204xbf16>, vector<204x128xbf16>, vector<34x128xf32> -> vector<34x128xf32>
    %10 = arith.addf %4, %9 : vector<34x128xf32>
    %c2 = arith.constant 2 : index
    %c0_9 = arith.constant 0 : index
    %11 = vector.load %arg1[%c2, %c0_9] : memref<36x204xf32, #tpu.memory_space<vmem>>, vector<34x204xf32>
    %12 = arith.truncf %11 : vector<34x204xf32> to vector<34x204xbf16>
    %c2_10 = arith.constant 2 : index
    %c0_11 = arith.constant 0 : index
    %c0_12 = arith.constant 0 : index
    %13 = vector.load %arg2[%c2_10, %c0_11, %c0_12] : memref<3x204x128xbf16, #tpu.memory_space<vmem>>, vector<1x204x128xbf16>
    %14 = vector.shape_cast %13 : vector<1x204x128xbf16> to vector<204x128xbf16>
    %cst_13 = arith.constant dense<0.000000e+00> : vector<34x128xf32>
    %15 = tpu.matmul %12, %14, %cst_13 {dimension_numbers = #tpu.dot_dimension_numbers<[1], [0], [0], [1], [0, 0, 1, 1], [], []>} : vector<34x204xbf16>, vector<204x128xbf16>, vector<34x128xf32> -> vector<34x128xf32>
    %16 = arith.addf %10, %15 : vector<34x128xf32>
    %c0_14 = arith.constant 0 : index
    %c0_15 = arith.constant 0 : index
    %17 = vector.load %arg8[%c0_14, %c0_15] : memref<1x128xf32, #tpu.memory_space<vmem>>, vector<1x128xf32>
    %18 = vector.broadcast %17 : vector<1x128xf32> to vector<34x128xf32>
    %19 = arith.mulf %16, %18 : vector<34x128xf32>
    %c0_16 = arith.constant 0 : index
    %c0_17 = arith.constant 0 : index
    %20 = vector.load %arg14[%c0_16, %c0_17] : memref<1x128xf32, #tpu.memory_space<vmem>>, vector<1x128xf32>
    %21 = vector.broadcast %20 : vector<1x128xf32> to vector<34x128xf32>
    %22 = arith.addf %19, %21 : vector<34x128xf32>
    %cst_18 = arith.constant 2.000000e-01 : f32
    %23 = vector.broadcast %cst_18 : f32 to vector<34x128xf32>
    %24 = arith.mulf %23, %22 : vector<34x128xf32>
    %25 = arith.maximumf %22, %24 : vector<34x128xf32>
    %c0_19 = arith.constant 0 : index
    %c0_20 = arith.constant 0 : index
    %26 = vector.load %arg20[%c0_19, %c0_20] : memref<36x128xf32, #tpu.memory_space<vmem>>, vector<34x128xf32>
    tpu.vector_store %arg20[%c0_19, %c0_20], %25 {strides = array<i32>} : memref<36x128xf32, #tpu.memory_space<vmem>>, vector<34x128xf32>,
    %c1_21 = arith.constant 1 : index
    %c0_22 = arith.constant 0 : index
    %27 = vector.load %arg26[%c1_21, %c0_22] : memref<36x136xf32, #tpu.memory_space<vmem>>, vector<34x128xf32>
    tpu.vector_store %arg26[%c1_21, %c0_22], %25 {strides = array<i32>} : memref<36x136xf32, #tpu.memory_space<vmem>>, vector<34x128xf32>,
    %cst_23 = arith.constant 0.000000e+00 : f32
    %28 = vector.broadcast %cst_23 : f32 to vector<1x136xf32>
    %c0_24 = arith.constant 0 : index
    %c0_25 = arith.constant 0 : index
    %29 = vector.load %arg26[%c0_24, %c0_25] : memref<36x136xf32, #tpu.memory_space<vmem>>, vector<1x136xf32>
    tpu.vector_store %arg26[%c0_24, %c0_25], %28 {strides = array<i32>} : memref<36x136xf32, #tpu.memory_space<vmem>>, vector<1x136xf32>,
    %c17 = arith.constant 17 : index
    %c0_26 = arith.constant 0 : index
    %30 = vector.load %arg26[%c17, %c0_26] : memref<36x136xf32, #tpu.memory_space<vmem>>, vector<1x136xf32>
    tpu.vector_store %arg26[%c17, %c0_26], %28 {strides = array<i32>} : memref<36x136xf32, #tpu.memory_space<vmem>>, vector<1x136xf32>,
    %c18 = arith.constant 18 : index
    %c0_27 = arith.constant 0 : index
    %31 = vector.load %arg26[%c18, %c0_27] : memref<36x136xf32, #tpu.memory_space<vmem>>, vector<1x136xf32>
    tpu.vector_store %arg26[%c18, %c0_27], %28 {strides = array<i32>} : memref<36x136xf32, #tpu.memory_space<vmem>>, vector<1x136xf32>,
    %c35 = arith.constant 35 : index
    %c0_28 = arith.constant 0 : index
    %32 = vector.load %arg26[%c35, %c0_28] : memref<36x136xf32, #tpu.memory_space<vmem>>, vector<1x136xf32>
    tpu.vector_store %arg26[%c35, %c0_28], %28 {strides = array<i32>} : memref<36x136xf32, #tpu.memory_space<vmem>>, vector<1x136xf32>,
    %cst_29 = arith.constant 0.000000e+00 : f32
    %33 = vector.broadcast %cst_29 : f32 to vector<36x8xf32>
    %c0_30 = arith.constant 0 : index
    %c128 = arith.constant 128 : index
    %34 = vector.load %arg26[%c0_30, %c128] : memref<36x136xf32, #tpu.memory_space<vmem>>, vector<36x8xf32>
    tpu.vector_store %arg26[%c0_30, %c128], %33 {strides = array<i32>} : memref<36x136xf32, #tpu.memory_space<vmem>>, vector<36x8xf32>,
    %c0_31 = arith.constant 0 : index
    %c0_32 = arith.constant 0 : index
    %35 = vector.load %arg26[%c0_31, %c0_32] : memref<36x136xf32, #tpu.memory_space<vmem>>, vector<34x136xf32>
    %36 = arith.truncf %35 : vector<34x136xf32> to vector<34x136xbf16>
    %c0_33 = arith.constant 0 : index
    %c0_34 = arith.constant 0 : index
    %c0_35 = arith.constant 0 : index
    %37 = vector.load %arg3[%c0_33, %c0_34, %c0_35] : memref<3x136x256xbf16, #tpu.memory_space<vmem>>, vector<1x136x256xbf16>
    %38 = vector.shape_cast %37 : vector<1x136x256xbf16> to vector<136x256xbf16>
    %cst_36 = arith.constant dense<0.000000e+00> : vector<34x256xf32>
    %39 = tpu.matmul %36, %38, %cst_36 {dimension_numbers = #tpu.dot_dimension_numbers<[1], [0], [0], [1], [0, 0, 1, 1], [], []>} : vector<34x136xbf16>, vector<136x256xbf16>, vector<34x256xf32> -> vector<34x256xf32>
    %c1_37 = arith.constant 1 : index
    %c0_38 = arith.constant 0 : index
    %40 = vector.load %arg26[%c1_37, %c0_38] : memref<36x136xf32, #tpu.memory_space<vmem>>, vector<34x136xf32>
    %41 = arith.truncf %40 : vector<34x136xf32> to vector<34x136xbf16>
    %c1_39 = arith.constant 1 : index
    %c0_40 = arith.constant 0 : index
    %c0_41 = arith.constant 0 : index
    %42 = vector.load %arg3[%c1_39, %c0_40, %c0_41] : memref<3x136x256xbf16, #tpu.memory_space<vmem>>, vector<1x136x256xbf16>
    %43 = vector.shape_cast %42 : vector<1x136x256xbf16> to vector<136x256xbf16>
    %cst_42 = arith.constant dense<0.000000e+00> : vector<34x256xf32>
    %44 = tpu.matmul %41, %43, %cst_42 {dimension_numbers = #tpu.dot_dimension_numbers<[1], [0], [0], [1], [0, 0, 1, 1], [], []>} : vector<34x136xbf16>, vector<136x256xbf16>, vector<34x256xf32> -> vector<34x256xf32>
    %45 = arith.addf %39, %44 : vector<34x256xf32>
    %c2_43 = arith.constant 2 : index
    %c0_44 = arith.constant 0 : index
    %46 = vector.load %arg26[%c2_43, %c0_44] : memref<36x136xf32, #tpu.memory_space<vmem>>, vector<34x136xf32>
    %47 = arith.truncf %46 : vector<34x136xf32> to vector<34x136xbf16>
    %c2_45 = arith.constant 2 : index
    %c0_46 = arith.constant 0 : index
    %c0_47 = arith.constant 0 : index
    %48 = vector.load %arg3[%c2_45, %c0_46, %c0_47] : memref<3x136x256xbf16, #tpu.memory_space<vmem>>, vector<1x136x256xbf16>
    %49 = vector.shape_cast %48 : vector<1x136x256xbf16> to vector<136x256xbf16>
    %cst_48 = arith.constant dense<0.000000e+00> : vector<34x256xf32>
    %50 = tpu.matmul %47, %49, %cst_48 {dimension_numbers = #tpu.dot_dimension_numbers<[1], [0], [0], [1], [0, 0, 1, 1], [], []>} : vector<34x136xbf16>, vector<136x256xbf16>, vector<34x256xf32> -> vector<34x256xf32>
    %51 = arith.addf %45, %50 : vector<34x256xf32>
    %c0_49 = arith.constant 0 : index
    %c0_50 = arith.constant 0 : index
    %52 = vector.load %arg9[%c0_49, %c0_50] : memref<1x256xf32, #tpu.memory_space<vmem>>, vector<1x256xf32>
    %53 = vector.broadcast %52 : vector<1x256xf32> to vector<34x256xf32>
    %54 = arith.mulf %51, %53 : vector<34x256xf32>
    %c0_51 = arith.constant 0 : index
    %c0_52 = arith.constant 0 : index
    %55 = vector.load %arg15[%c0_51, %c0_52] : memref<1x256xf32, #tpu.memory_space<vmem>>, vector<1x256xf32>
    %56 = vector.broadcast %55 : vector<1x256xf32> to vector<34x256xf32>
    %57 = arith.addf %54, %56 : vector<34x256xf32>
    %cst_53 = arith.constant 2.000000e-01 : f32
    %58 = vector.broadcast %cst_53 : f32 to vector<34x256xf32>
    %59 = arith.mulf %58, %57 : vector<34x256xf32>
    %60 = arith.maximumf %57, %59 : vector<34x256xf32>
    %c0_54 = arith.constant 0 : index
    %c0_55 = arith.constant 0 : index
    %61 = vector.load %arg21[%c0_54, %c0_55] : memref<36x256xf32, #tpu.memory_space<vmem>>, vector<34x256xf32>
    tpu.vector_store %arg21[%c0_54, %c0_55], %60 {strides = array<i32>} : memref<36x256xf32, #tpu.memory_space<vmem>>, vector<34x256xf32>,
    %c1_56 = arith.constant 1 : index
    %c0_57 = arith.constant 0 : index
    %62 = vector.load %arg27[%c1_56, %c0_57] : memref<36x272xf32, #tpu.memory_space<vmem>>, vector<34x256xf32>
    tpu.vector_store %arg27[%c1_56, %c0_57], %60 {strides = array<i32>} : memref<36x272xf32, #tpu.memory_space<vmem>>, vector<34x256xf32>,
    %cst_58 = arith.constant 0.000000e+00 : f32
    %63 = vector.broadcast %cst_58 : f32 to vector<1x272xf32>
    %c0_59 = arith.constant 0 : index
    %c0_60 = arith.constant 0 : index
    %64 = vector.load %arg27[%c0_59, %c0_60] : memref<36x272xf32, #tpu.memory_space<vmem>>, vector<1x272xf32>
    tpu.vector_store %arg27[%c0_59, %c0_60], %63 {strides = array<i32>} : memref<36x272xf32, #tpu.memory_space<vmem>>, vector<1x272xf32>,
    %c17_61 = arith.constant 17 : index
    %c0_62 = arith.constant 0 : index
    %65 = vector.load %arg27[%c17_61, %c0_62] : memref<36x272xf32, #tpu.memory_space<vmem>>, vector<1x272xf32>
    tpu.vector_store %arg27[%c17_61, %c0_62], %63 {strides = array<i32>} : memref<36x272xf32, #tpu.memory_space<vmem>>, vector<1x272xf32>,
    %c18_63 = arith.constant 18 : index
    %c0_64 = arith.constant 0 : index
    %66 = vector.load %arg27[%c18_63, %c0_64] : memref<36x272xf32, #tpu.memory_space<vmem>>, vector<1x272xf32>
    tpu.vector_store %arg27[%c18_63, %c0_64], %63 {strides = array<i32>} : memref<36x272xf32, #tpu.memory_space<vmem>>, vector<1x272xf32>,
    %c35_65 = arith.constant 35 : index
    %c0_66 = arith.constant 0 : index
    %67 = vector.load %arg27[%c35_65, %c0_66] : memref<36x272xf32, #tpu.memory_space<vmem>>, vector<1x272xf32>
    tpu.vector_store %arg27[%c35_65, %c0_66], %63 {strides = array<i32>} : memref<36x272xf32, #tpu.memory_space<vmem>>, vector<1x272xf32>,
    %cst_67 = arith.constant 0.000000e+00 : f32
    %68 = vector.broadcast %cst_67 : f32 to vector<36x16xf32>
    %c0_68 = arith.constant 0 : index
    %c256 = arith.constant 256 : index
    %69 = vector.load %arg27[%c0_68, %c256] : memref<36x272xf32, #tpu.memory_space<vmem>>, vector<36x16xf32>
    tpu.vector_store %arg27[%c0_68, %c256], %68 {strides = array<i32>} : memref<36x272xf32, #tpu.memory_space<vmem>>, vector<36x16xf32>,
    %c0_69 = arith.constant 0 : index
    %c0_70 = arith.constant 0 : index
    %70 = vector.load %arg27[%c0_69, %c0_70] : memref<36x272xf32, #tpu.memory_space<vmem>>, vector<34x272xf32>
    %71 = arith.truncf %70 : vector<34x272xf32> to vector<34x272xbf16>
    %c0_71 = arith.constant 0 : index
    %c0_72 = arith.constant 0 : index
    %c0_73 = arith.constant 0 : index
    %72 = vector.load %arg4[%c0_71, %c0_72, %c0_73] : memref<3x272x512xbf16, #tpu.memory_space<vmem>>, vector<1x272x512xbf16>
    %73 = vector.shape_cast %72 : vector<1x272x512xbf16> to vector<272x512xbf16>
    %cst_74 = arith.constant dense<0.000000e+00> : vector<34x512xf32>
    %74 = tpu.matmul %71, %73, %cst_74 {dimension_numbers = #tpu.dot_dimension_numbers<[1], [0], [0], [1], [0, 0, 1, 1], [], []>} : vector<34x272xbf16>, vector<272x512xbf16>, vector<34x512xf32> -> vector<34x512xf32>
    %c1_75 = arith.constant 1 : index
    %c0_76 = arith.constant 0 : index
    %75 = vector.load %arg27[%c1_75, %c0_76] : memref<36x272xf32, #tpu.memory_space<vmem>>, vector<34x272xf32>
    %76 = arith.truncf %75 : vector<34x272xf32> to vector<34x272xbf16>
    %c1_77 = arith.constant 1 : index
    %c0_78 = arith.constant 0 : index
    %c0_79 = arith.constant 0 : index
    %77 = vector.load %arg4[%c1_77, %c0_78, %c0_79] : memref<3x272x512xbf16, #tpu.memory_space<vmem>>, vector<1x272x512xbf16>
    %78 = vector.shape_cast %77 : vector<1x272x512xbf16> to vector<272x512xbf16>
    %cst_80 = arith.constant dense<0.000000e+00> : vector<34x512xf32>
    %79 = tpu.matmul %76, %78, %cst_80 {dimension_numbers = #tpu.dot_dimension_numbers<[1], [0], [0], [1], [0, 0, 1, 1], [], []>} : vector<34x272xbf16>, vector<272x512xbf16>, vector<34x512xf32> -> vector<34x512xf32>
    %80 = arith.addf %74, %79 : vector<34x512xf32>
    %c2_81 = arith.constant 2 : index
    %c0_82 = arith.constant 0 : index
    %81 = vector.load %arg27[%c2_81, %c0_82] : memref<36x272xf32, #tpu.memory_space<vmem>>, vector<34x272xf32>
    %82 = arith.truncf %81 : vector<34x272xf32> to vector<34x272xbf16>
    %c2_83 = arith.constant 2 : index
    %c0_84 = arith.constant 0 : index
    %c0_85 = arith.constant 0 : index
    %83 = vector.load %arg4[%c2_83, %c0_84, %c0_85] : memref<3x272x512xbf16, #tpu.memory_space<vmem>>, vector<1x272x512xbf16>
    %84 = vector.shape_cast %83 : vector<1x272x512xbf16> to vector<272x512xbf16>
    %cst_86 = arith.constant dense<0.000000e+00> : vector<34x512xf32>
    %85 = tpu.matmul %82, %84, %cst_86 {dimension_numbers = #tpu.dot_dimension_numbers<[1], [0], [0], [1], [0, 0, 1, 1], [], []>} : vector<34x272xbf16>, vector<272x512xbf16>, vector<34x512xf32> -> vector<34x512xf32>
    %86 = arith.addf %80, %85 : vector<34x512xf32>
    %c0_87 = arith.constant 0 : index
    %c0_88 = arith.constant 0 : index
    %87 = vector.load %arg10[%c0_87, %c0_88] : memref<1x512xf32, #tpu.memory_space<vmem>>, vector<1x512xf32>
    %88 = vector.broadcast %87 : vector<1x512xf32> to vector<34x512xf32>
    %89 = arith.mulf %86, %88 : vector<34x512xf32>
    %c0_89 = arith.constant 0 : index
    %c0_90 = arith.constant 0 : index
    %90 = vector.load %arg16[%c0_89, %c0_90] : memref<1x512xf32, #tpu.memory_space<vmem>>, vector<1x512xf32>
    %91 = vector.broadcast %90 : vector<1x512xf32> to vector<34x512xf32>
    %92 = arith.addf %89, %91 : vector<34x512xf32>
    %cst_91 = arith.constant 2.000000e-01 : f32
    %93 = vector.broadcast %cst_91 : f32 to vector<34x512xf32>
    %94 = arith.mulf %93, %92 : vector<34x512xf32>
    %95 = arith.maximumf %92, %94 : vector<34x512xf32>
    %c0_92 = arith.constant 0 : index
    %c0_93 = arith.constant 0 : index
    %96 = vector.load %arg22[%c0_92, %c0_93] : memref<36x512xf32, #tpu.memory_space<vmem>>, vector<34x512xf32>
    tpu.vector_store %arg22[%c0_92, %c0_93], %95 {strides = array<i32>} : memref<36x512xf32, #tpu.memory_space<vmem>>, vector<34x512xf32>,
    %c1_94 = arith.constant 1 : index
    %c0_95 = arith.constant 0 : index
    %97 = vector.load %arg28[%c1_94, %c0_95] : memref<36x544xf32, #tpu.memory_space<vmem>>, vector<34x512xf32>
    tpu.vector_store %arg28[%c1_94, %c0_95], %95 {strides = array<i32>} : memref<36x544xf32, #tpu.memory_space<vmem>>, vector<34x512xf32>,
    %cst_96 = arith.constant 0.000000e+00 : f32
    %98 = vector.broadcast %cst_96 : f32 to vector<1x544xf32>
    %c0_97 = arith.constant 0 : index
    %c0_98 = arith.constant 0 : index
    %99 = vector.load %arg28[%c0_97, %c0_98] : memref<36x544xf32, #tpu.memory_space<vmem>>, vector<1x544xf32>
    tpu.vector_store %arg28[%c0_97, %c0_98], %98 {strides = array<i32>} : memref<36x544xf32, #tpu.memory_space<vmem>>, vector<1x544xf32>,
    %c17_99 = arith.constant 17 : index
    %c0_100 = arith.constant 0 : index
    %100 = vector.load %arg28[%c17_99, %c0_100] : memref<36x544xf32, #tpu.memory_space<vmem>>, vector<1x544xf32>
    tpu.vector_store %arg28[%c17_99, %c0_100], %98 {strides = array<i32>} : memref<36x544xf32, #tpu.memory_space<vmem>>, vector<1x544xf32>,
    %c18_101 = arith.constant 18 : index
    %c0_102 = arith.constant 0 : index
    %101 = vector.load %arg28[%c18_101, %c0_102] : memref<36x544xf32, #tpu.memory_space<vmem>>, vector<1x544xf32>
    tpu.vector_store %arg28[%c18_101, %c0_102], %98 {strides = array<i32>} : memref<36x544xf32, #tpu.memory_space<vmem>>, vector<1x544xf32>,
    %c35_103 = arith.constant 35 : index
    %c0_104 = arith.constant 0 : index
    %102 = vector.load %arg28[%c35_103, %c0_104] : memref<36x544xf32, #tpu.memory_space<vmem>>, vector<1x544xf32>
    tpu.vector_store %arg28[%c35_103, %c0_104], %98 {strides = array<i32>} : memref<36x544xf32, #tpu.memory_space<vmem>>, vector<1x544xf32>,
    %cst_105 = arith.constant 0.000000e+00 : f32
    %103 = vector.broadcast %cst_105 : f32 to vector<36x32xf32>
    %c0_106 = arith.constant 0 : index
    %c512 = arith.constant 512 : index
    %104 = vector.load %arg28[%c0_106, %c512] : memref<36x544xf32, #tpu.memory_space<vmem>>, vector<36x32xf32>
    tpu.vector_store %arg28[%c0_106, %c512], %103 {strides = array<i32>} : memref<36x544xf32, #tpu.memory_space<vmem>>, vector<36x32xf32>,
    %c0_107 = arith.constant 0 : index
    %c0_108 = arith.constant 0 : index
    %105 = vector.load %arg28[%c0_107, %c0_108] : memref<36x544xf32, #tpu.memory_space<vmem>>, vector<34x544xf32>
    %106 = arith.truncf %105 : vector<34x544xf32> to vector<34x544xbf16>
    %c0_109 = arith.constant 0 : index
    %c0_110 = arith.constant 0 : index
    %c0_111 = arith.constant 0 : index
    %107 = vector.load %arg5[%c0_109, %c0_110, %c0_111] : memref<3x544x256xbf16, #tpu.memory_space<vmem>>, vector<1x544x256xbf16>
    %108 = vector.shape_cast %107 : vector<1x544x256xbf16> to vector<544x256xbf16>
    %cst_112 = arith.constant dense<0.000000e+00> : vector<34x256xf32>
    %109 = tpu.matmul %106, %108, %cst_112 {dimension_numbers = #tpu.dot_dimension_numbers<[1], [0], [0], [1], [0, 0, 1, 1], [], []>} : vector<34x544xbf16>, vector<544x256xbf16>, vector<34x256xf32> -> vector<34x256xf32>
    %c1_113 = arith.constant 1 : index
    %c0_114 = arith.constant 0 : index
    %110 = vector.load %arg28[%c1_113, %c0_114] : memref<36x544xf32, #tpu.memory_space<vmem>>, vector<34x544xf32>
    %111 = arith.truncf %110 : vector<34x544xf32> to vector<34x544xbf16>
    %c1_115 = arith.constant 1 : index
    %c0_116 = arith.constant 0 : index
    %c0_117 = arith.constant 0 : index
    %112 = vector.load %arg5[%c1_115, %c0_116, %c0_117] : memref<3x544x256xbf16, #tpu.memory_space<vmem>>, vector<1x544x256xbf16>
    %113 = vector.shape_cast %112 : vector<1x544x256xbf16> to vector<544x256xbf16>
    %cst_118 = arith.constant dense<0.000000e+00> : vector<34x256xf32>
    %114 = tpu.matmul %111, %113, %cst_118 {dimension_numbers = #tpu.dot_dimension_numbers<[1], [0], [0], [1], [0, 0, 1, 1], [], []>} : vector<34x544xbf16>, vector<544x256xbf16>, vector<34x256xf32> -> vector<34x256xf32>
    %115 = arith.addf %109, %114 : vector<34x256xf32>
    %c2_119 = arith.constant 2 : index
    %c0_120 = arith.constant 0 : index
    %116 = vector.load %arg28[%c2_119, %c0_120] : memref<36x544xf32, #tpu.memory_space<vmem>>, vector<34x544xf32>
    %117 = arith.truncf %116 : vector<34x544xf32> to vector<34x544xbf16>
    %c2_121 = arith.constant 2 : index
    %c0_122 = arith.constant 0 : index
    %c0_123 = arith.constant 0 : index
    %118 = vector.load %arg5[%c2_121, %c0_122, %c0_123] : memref<3x544x256xbf16, #tpu.memory_space<vmem>>, vector<1x544x256xbf16>
    %119 = vector.shape_cast %118 : vector<1x544x256xbf16> to vector<544x256xbf16>
    %cst_124 = arith.constant dense<0.000000e+00> : vector<34x256xf32>
    %120 = tpu.matmul %117, %119, %cst_124 {dimension_numbers = #tpu.dot_dimension_numbers<[1], [0], [0], [1], [0, 0, 1, 1], [], []>} : vector<34x544xbf16>, vector<544x256xbf16>, vector<34x256xf32> -> vector<34x256xf32>
    %121 = arith.addf %115, %120 : vector<34x256xf32>
    %c0_125 = arith.constant 0 : index
    %c0_126 = arith.constant 0 : index
    %122 = vector.load %arg11[%c0_125, %c0_126] : memref<1x256xf32, #tpu.memory_space<vmem>>, vector<1x256xf32>
    %123 = vector.broadcast %122 : vector<1x256xf32> to vector<34x256xf32>
    %124 = arith.mulf %121, %123 : vector<34x256xf32>
    %c0_127 = arith.constant 0 : index
    %c0_128 = arith.constant 0 : index
    %125 = vector.load %arg17[%c0_127, %c0_128] : memref<1x256xf32, #tpu.memory_space<vmem>>, vector<1x256xf32>
    %126 = vector.broadcast %125 : vector<1x256xf32> to vector<34x256xf32>
    %127 = arith.addf %124, %126 : vector<34x256xf32>
    %cst_129 = arith.constant 2.000000e-01 : f32
    %128 = vector.broadcast %cst_129 : f32 to vector<34x256xf32>
    %129 = arith.mulf %128, %127 : vector<34x256xf32>
    %130 = arith.maximumf %127, %129 : vector<34x256xf32>
    %c0_130 = arith.constant 0 : index
    %c0_131 = arith.constant 0 : index
    %131 = vector.load %arg23[%c0_130, %c0_131] : memref<36x256xf32, #tpu.memory_space<vmem>>, vector<34x256xf32>
    tpu.vector_store %arg23[%c0_130, %c0_131], %130 {strides = array<i32>} : memref<36x256xf32, #tpu.memory_space<vmem>>, vector<34x256xf32>,
    %c1_132 = arith.constant 1 : index
    %c0_133 = arith.constant 0 : index
    %132 = vector.load %arg29[%c1_132, %c0_133] : memref<36x272xf32, #tpu.memory_space<vmem>>, vector<34x256xf32>
    tpu.vector_store %arg29[%c1_132, %c0_133], %130 {strides = array<i32>} : memref<36x272xf32, #tpu.memory_space<vmem>>, vector<34x256xf32>,
    %cst_134 = arith.constant 0.000000e+00 : f32
    %133 = vector.broadcast %cst_134 : f32 to vector<1x272xf32>
    %c0_135 = arith.constant 0 : index
    %c0_136 = arith.constant 0 : index
    %134 = vector.load %arg29[%c0_135, %c0_136] : memref<36x272xf32, #tpu.memory_space<vmem>>, vector<1x272xf32>
    tpu.vector_store %arg29[%c0_135, %c0_136], %133 {strides = array<i32>} : memref<36x272xf32, #tpu.memory_space<vmem>>, vector<1x272xf32>,
    %c17_137 = arith.constant 17 : index
    %c0_138 = arith.constant 0 : index
    %135 = vector.load %arg29[%c17_137, %c0_138] : memref<36x272xf32, #tpu.memory_space<vmem>>, vector<1x272xf32>
    tpu.vector_store %arg29[%c17_137, %c0_138], %133 {strides = array<i32>} : memref<36x272xf32, #tpu.memory_space<vmem>>, vector<1x272xf32>,
    %c18_139 = arith.constant 18 : index
    %c0_140 = arith.constant 0 : index
    %136 = vector.load %arg29[%c18_139, %c0_140] : memref<36x272xf32, #tpu.memory_space<vmem>>, vector<1x272xf32>
    tpu.vector_store %arg29[%c18_139, %c0_140], %133 {strides = array<i32>} : memref<36x272xf32, #tpu.memory_space<vmem>>, vector<1x272xf32>,
    %c35_141 = arith.constant 35 : index
    %c0_142 = arith.constant 0 : index
    %137 = vector.load %arg29[%c35_141, %c0_142] : memref<36x272xf32, #tpu.memory_space<vmem>>, vector<1x272xf32>
    tpu.vector_store %arg29[%c35_141, %c0_142], %133 {strides = array<i32>} : memref<36x272xf32, #tpu.memory_space<vmem>>, vector<1x272xf32>,
    %cst_143 = arith.constant 0.000000e+00 : f32
    %138 = vector.broadcast %cst_143 : f32 to vector<36x16xf32>
    %c0_144 = arith.constant 0 : index
    %c256_145 = arith.constant 256 : index
    %139 = vector.load %arg29[%c0_144, %c256_145] : memref<36x272xf32, #tpu.memory_space<vmem>>, vector<36x16xf32>
    tpu.vector_store %arg29[%c0_144, %c256_145], %138 {strides = array<i32>} : memref<36x272xf32, #tpu.memory_space<vmem>>, vector<36x16xf32>,
    %c0_146 = arith.constant 0 : index
    %c0_147 = arith.constant 0 : index
    %140 = vector.load %arg29[%c0_146, %c0_147] : memref<36x272xf32, #tpu.memory_space<vmem>>, vector<34x272xf32>
    %141 = arith.truncf %140 : vector<34x272xf32> to vector<34x272xbf16>
    %c0_148 = arith.constant 0 : index
    %c0_149 = arith.constant 0 : index
    %c0_150 = arith.constant 0 : index
    %142 = vector.load %arg6[%c0_148, %c0_149, %c0_150] : memref<3x272x128xbf16, #tpu.memory_space<vmem>>, vector<1x272x128xbf16>
    %143 = vector.shape_cast %142 : vector<1x272x128xbf16> to vector<272x128xbf16>
    %cst_151 = arith.constant dense<0.000000e+00> : vector<34x128xf32>
    %144 = tpu.matmul %141, %143, %cst_151 {dimension_numbers = #tpu.dot_dimension_numbers<[1], [0], [0], [1], [0, 0, 1, 1], [], []>} : vector<34x272xbf16>, vector<272x128xbf16>, vector<34x128xf32> -> vector<34x128xf32>
    %c1_152 = arith.constant 1 : index
    %c0_153 = arith.constant 0 : index
    %145 = vector.load %arg29[%c1_152, %c0_153] : memref<36x272xf32, #tpu.memory_space<vmem>>, vector<34x272xf32>
    %146 = arith.truncf %145 : vector<34x272xf32> to vector<34x272xbf16>
    %c1_154 = arith.constant 1 : index
    %c0_155 = arith.constant 0 : index
    %c0_156 = arith.constant 0 : index
    %147 = vector.load %arg6[%c1_154, %c0_155, %c0_156] : memref<3x272x128xbf16, #tpu.memory_space<vmem>>, vector<1x272x128xbf16>
    %148 = vector.shape_cast %147 : vector<1x272x128xbf16> to vector<272x128xbf16>
    %cst_157 = arith.constant dense<0.000000e+00> : vector<34x128xf32>
    %149 = tpu.matmul %146, %148, %cst_157 {dimension_numbers = #tpu.dot_dimension_numbers<[1], [0], [0], [1], [0, 0, 1, 1], [], []>} : vector<34x272xbf16>, vector<272x128xbf16>, vector<34x128xf32> -> vector<34x128xf32>
    %150 = arith.addf %144, %149 : vector<34x128xf32>
    %c2_158 = arith.constant 2 : index
    %c0_159 = arith.constant 0 : index
    %151 = vector.load %arg29[%c2_158, %c0_159] : memref<36x272xf32, #tpu.memory_space<vmem>>, vector<34x272xf32>
    %152 = arith.truncf %151 : vector<34x272xf32> to vector<34x272xbf16>
    %c2_160 = arith.constant 2 : index
    %c0_161 = arith.constant 0 : index
    %c0_162 = arith.constant 0 : index
    %153 = vector.load %arg6[%c2_160, %c0_161, %c0_162] : memref<3x272x128xbf16, #tpu.memory_space<vmem>>, vector<1x272x128xbf16>
    %154 = vector.shape_cast %153 : vector<1x272x128xbf16> to vector<272x128xbf16>
    %cst_163 = arith.constant dense<0.000000e+00> : vector<34x128xf32>
    %155 = tpu.matmul %152, %154, %cst_163 {dimension_numbers = #tpu.dot_dimension_numbers<[1], [0], [0], [1], [0, 0, 1, 1], [], []>} : vector<34x272xbf16>, vector<272x128xbf16>, vector<34x128xf32> -> vector<34x128xf32>
    %156 = arith.addf %150, %155 : vector<34x128xf32>
    %c0_164 = arith.constant 0 : index
    %c0_165 = arith.constant 0 : index
    %157 = vector.load %arg12[%c0_164, %c0_165] : memref<1x128xf32, #tpu.memory_space<vmem>>, vector<1x128xf32>
    %158 = vector.broadcast %157 : vector<1x128xf32> to vector<34x128xf32>
    %159 = arith.mulf %156, %158 : vector<34x128xf32>
    %c0_166 = arith.constant 0 : index
    %c0_167 = arith.constant 0 : index
    %160 = vector.load %arg18[%c0_166, %c0_167] : memref<1x128xf32, #tpu.memory_space<vmem>>, vector<1x128xf32>
    %161 = vector.broadcast %160 : vector<1x128xf32> to vector<34x128xf32>
    %162 = arith.addf %159, %161 : vector<34x128xf32>
    %cst_168 = arith.constant 2.000000e-01 : f32
    %163 = vector.broadcast %cst_168 : f32 to vector<34x128xf32>
    %164 = arith.mulf %163, %162 : vector<34x128xf32>
    %165 = arith.maximumf %162, %164 : vector<34x128xf32>
    %c0_169 = arith.constant 0 : index
    %c0_170 = arith.constant 0 : index
    %166 = vector.load %arg24[%c0_169, %c0_170] : memref<36x128xf32, #tpu.memory_space<vmem>>, vector<34x128xf32>
    tpu.vector_store %arg24[%c0_169, %c0_170], %165 {strides = array<i32>} : memref<36x128xf32, #tpu.memory_space<vmem>>, vector<34x128xf32>,
    %c1_171 = arith.constant 1 : index
    %c0_172 = arith.constant 0 : index
    %167 = vector.load %arg30[%c1_171, %c0_172] : memref<36x136xf32, #tpu.memory_space<vmem>>, vector<34x128xf32>
    tpu.vector_store %arg30[%c1_171, %c0_172], %165 {strides = array<i32>} : memref<36x136xf32, #tpu.memory_space<vmem>>, vector<34x128xf32>,
    %cst_173 = arith.constant 0.000000e+00 : f32
    %168 = vector.broadcast %cst_173 : f32 to vector<1x136xf32>
    %c0_174 = arith.constant 0 : index
    %c0_175 = arith.constant 0 : index
    %169 = vector.load %arg30[%c0_174, %c0_175] : memref<36x136xf32, #tpu.memory_space<vmem>>, vector<1x136xf32>
    tpu.vector_store %arg30[%c0_174, %c0_175], %168 {strides = array<i32>} : memref<36x136xf32, #tpu.memory_space<vmem>>, vector<1x136xf32>,
    %c17_176 = arith.constant 17 : index
    %c0_177 = arith.constant 0 : index
    %170 = vector.load %arg30[%c17_176, %c0_177] : memref<36x136xf32, #tpu.memory_space<vmem>>, vector<1x136xf32>
    tpu.vector_store %arg30[%c17_176, %c0_177], %168 {strides = array<i32>} : memref<36x136xf32, #tpu.memory_space<vmem>>, vector<1x136xf32>,
    %c18_178 = arith.constant 18 : index
    %c0_179 = arith.constant 0 : index
    %171 = vector.load %arg30[%c18_178, %c0_179] : memref<36x136xf32, #tpu.memory_space<vmem>>, vector<1x136xf32>
    tpu.vector_store %arg30[%c18_178, %c0_179], %168 {strides = array<i32>} : memref<36x136xf32, #tpu.memory_space<vmem>>, vector<1x136xf32>,
    %c35_180 = arith.constant 35 : index
    %c0_181 = arith.constant 0 : index
    %172 = vector.load %arg30[%c35_180, %c0_181] : memref<36x136xf32, #tpu.memory_space<vmem>>, vector<1x136xf32>
    tpu.vector_store %arg30[%c35_180, %c0_181], %168 {strides = array<i32>} : memref<36x136xf32, #tpu.memory_space<vmem>>, vector<1x136xf32>,
    %cst_182 = arith.constant 0.000000e+00 : f32
    %173 = vector.broadcast %cst_182 : f32 to vector<36x8xf32>
    %c0_183 = arith.constant 0 : index
    %c128_184 = arith.constant 128 : index
    %174 = vector.load %arg30[%c0_183, %c128_184] : memref<36x136xf32, #tpu.memory_space<vmem>>, vector<36x8xf32>
    tpu.vector_store %arg30[%c0_183, %c128_184], %173 {strides = array<i32>} : memref<36x136xf32, #tpu.memory_space<vmem>>, vector<36x8xf32>,
    %c0_185 = arith.constant 0 : index
    %c0_186 = arith.constant 0 : index
    %175 = vector.load %arg30[%c0_185, %c0_186] : memref<36x136xf32, #tpu.memory_space<vmem>>, vector<34x136xf32>
    %176 = arith.truncf %175 : vector<34x136xf32> to vector<34x136xbf16>
    %c0_187 = arith.constant 0 : index
    %c0_188 = arith.constant 0 : index
    %c0_189 = arith.constant 0 : index
    %177 = vector.load %arg7[%c0_187, %c0_188, %c0_189] : memref<3x136x48xbf16, #tpu.memory_space<vmem>>, vector<1x136x48xbf16>
    %178 = vector.shape_cast %177 : vector<1x136x48xbf16> to vector<136x48xbf16>
    %cst_190 = arith.constant dense<0.000000e+00> : vector<34x48xf32>
    %179 = tpu.matmul %176, %178, %cst_190 {dimension_numbers = #tpu.dot_dimension_numbers<[1], [0], [0], [1], [0, 0, 1, 1], [], []>} : vector<34x136xbf16>, vector<136x48xbf16>, vector<34x48xf32> -> vector<34x48xf32>
    %c1_191 = arith.constant 1 : index
    %c0_192 = arith.constant 0 : index
    %180 = vector.load %arg30[%c1_191, %c0_192] : memref<36x136xf32, #tpu.memory_space<vmem>>, vector<34x136xf32>
    %181 = arith.truncf %180 : vector<34x136xf32> to vector<34x136xbf16>
    %c1_193 = arith.constant 1 : index
    %c0_194 = arith.constant 0 : index
    %c0_195 = arith.constant 0 : index
    %182 = vector.load %arg7[%c1_193, %c0_194, %c0_195] : memref<3x136x48xbf16, #tpu.memory_space<vmem>>, vector<1x136x48xbf16>
    %183 = vector.shape_cast %182 : vector<1x136x48xbf16> to vector<136x48xbf16>
    %cst_196 = arith.constant dense<0.000000e+00> : vector<34x48xf32>
    %184 = tpu.matmul %181, %183, %cst_196 {dimension_numbers = #tpu.dot_dimension_numbers<[1], [0], [0], [1], [0, 0, 1, 1], [], []>} : vector<34x136xbf16>, vector<136x48xbf16>, vector<34x48xf32> -> vector<34x48xf32>
    %185 = arith.addf %179, %184 : vector<34x48xf32>
    %c2_197 = arith.constant 2 : index
    %c0_198 = arith.constant 0 : index
    %186 = vector.load %arg30[%c2_197, %c0_198] : memref<36x136xf32, #tpu.memory_space<vmem>>, vector<34x136xf32>
    %187 = arith.truncf %186 : vector<34x136xf32> to vector<34x136xbf16>
    %c2_199 = arith.constant 2 : index
    %c0_200 = arith.constant 0 : index
    %c0_201 = arith.constant 0 : index
    %188 = vector.load %arg7[%c2_199, %c0_200, %c0_201] : memref<3x136x48xbf16, #tpu.memory_space<vmem>>, vector<1x136x48xbf16>
    %189 = vector.shape_cast %188 : vector<1x136x48xbf16> to vector<136x48xbf16>
    %cst_202 = arith.constant dense<0.000000e+00> : vector<34x48xf32>
    %190 = tpu.matmul %187, %189, %cst_202 {dimension_numbers = #tpu.dot_dimension_numbers<[1], [0], [0], [1], [0, 0, 1, 1], [], []>} : vector<34x136xbf16>, vector<136x48xbf16>, vector<34x48xf32> -> vector<34x48xf32>
    %191 = arith.addf %185, %190 : vector<34x48xf32>
    %c0_203 = arith.constant 0 : index
    %c0_204 = arith.constant 0 : index
    %192 = vector.load %arg13[%c0_203, %c0_204] : memref<1x48xf32, #tpu.memory_space<vmem>>, vector<1x48xf32>
    %193 = vector.broadcast %192 : vector<1x48xf32> to vector<34x48xf32>
    %194 = arith.mulf %191, %193 : vector<34x48xf32>
    %c0_205 = arith.constant 0 : index
    %c0_206 = arith.constant 0 : index
    %195 = vector.load %arg19[%c0_205, %c0_206] : memref<1x48xf32, #tpu.memory_space<vmem>>, vector<1x48xf32>
    %196 = vector.broadcast %195 : vector<1x48xf32> to vector<34x48xf32>
    %197 = arith.addf %194, %196 : vector<34x48xf32>
    %c0_207 = arith.constant 0 : index
    %c0_208 = arith.constant 0 : index
    %198 = vector.load %arg25[%c0_207, %c0_208] : memref<36x48xf32, #tpu.memory_space<vmem>>, vector<34x48xf32>
    tpu.vector_store %arg25[%c0_207, %c0_208], %197 {strides = array<i32>} : memref<36x48xf32, #tpu.memory_space<vmem>>, vector<34x48xf32>,
    return
  }
  func.func @transform_0(%arg0: i32) -> (i32, i32) {
    %c0_i32 = arith.constant 0 : i32
    %c0_i32_0 = arith.constant 0 : i32
    return %arg0, %c0_i32 : i32, i32
  }
  func.func @transform_1(%arg0: i32) -> (i32, i32, i32) {
    %c0_i32 = arith.constant 0 : i32
    %c0_i32_0 = arith.constant 0 : i32
    %c0_i32_1 = arith.constant 0 : i32
    %c0_i32_2 = arith.constant 0 : i32
    return %c0_i32, %c0_i32_0, %c0_i32_1 : i32, i32, i32
  }
  func.func @transform_2(%arg0: i32) -> (i32, i32, i32) {
    %c0_i32 = arith.constant 0 : i32
    %c0_i32_0 = arith.constant 0 : i32
    %c0_i32_1 = arith.constant 0 : i32
    %c0_i32_2 = arith.constant 0 : i32
    return %c0_i32, %c0_i32_0, %c0_i32_1 : i32, i32, i32
  }
  func.func @transform_3(%arg0: i32) -> (i32, i32, i32) {
    %c0_i32 = arith.constant 0 : i32
    %c0_i32_0 = arith.constant 0 : i32
    %c0_i32_1 = arith.constant 0 : i32
    %c0_i32_2 = arith.constant 0 : i32
    return %c0_i32, %c0_i32_0, %c0_i32_1 : i32, i32, i32
  }
  func.func @transform_4(%arg0: i32) -> (i32, i32, i32) {
    %c0_i32 = arith.constant 0 : i32
    %c0_i32_0 = arith.constant 0 : i32
    %c0_i32_1 = arith.constant 0 : i32
    %c0_i32_2 = arith.constant 0 : i32
    return %c0_i32, %c0_i32_0, %c0_i32_1 : i32, i32, i32
  }
  func.func @transform_5(%arg0: i32) -> (i32, i32, i32) {
    %c0_i32 = arith.constant 0 : i32
    %c0_i32_0 = arith.constant 0 : i32
    %c0_i32_1 = arith.constant 0 : i32
    %c0_i32_2 = arith.constant 0 : i32
    return %c0_i32, %c0_i32_0, %c0_i32_1 : i32, i32, i32
  }
  func.func @transform_6(%arg0: i32) -> (i32, i32, i32) {
    %c0_i32 = arith.constant 0 : i32
    %c0_i32_0 = arith.constant 0 : i32
    %c0_i32_1 = arith.constant 0 : i32
    %c0_i32_2 = arith.constant 0 : i32
    return %c0_i32, %c0_i32_0, %c0_i32_1 : i32, i32, i32
  }
  func.func @transform_7(%arg0: i32) -> (i32, i32) {
    %c0_i32 = arith.constant 0 : i32
    %c0_i32_0 = arith.constant 0 : i32
    %c0_i32_1 = arith.constant 0 : i32
    return %c0_i32, %c0_i32_0 : i32, i32
  }
  func.func @transform_8(%arg0: i32) -> (i32, i32) {
    %c0_i32 = arith.constant 0 : i32
    %c0_i32_0 = arith.constant 0 : i32
    %c0_i32_1 = arith.constant 0 : i32
    return %c0_i32, %c0_i32_0 : i32, i32
  }
  func.func @transform_9(%arg0: i32) -> (i32, i32) {
    %c0_i32 = arith.constant 0 : i32
    %c0_i32_0 = arith.constant 0 : i32
    %c0_i32_1 = arith.constant 0 : i32
    return %c0_i32, %c0_i32_0 : i32, i32
  }
  func.func @transform_10(%arg0: i32) -> (i32, i32) {
    %c0_i32 = arith.constant 0 : i32
    %c0_i32_0 = arith.constant 0 : i32
    %c0_i32_1 = arith.constant 0 : i32
    return %c0_i32, %c0_i32_0 : i32, i32
  }
  func.func @transform_11(%arg0: i32) -> (i32, i32) {
    %c0_i32 = arith.constant 0 : i32
    %c0_i32_0 = arith.constant 0 : i32
    %c0_i32_1 = arith.constant 0 : i32
    return %c0_i32, %c0_i32_0 : i32, i32
  }
  func.func @transform_12(%arg0: i32) -> (i32, i32) {
    %c0_i32 = arith.constant 0 : i32
    %c0_i32_0 = arith.constant 0 : i32
    %c0_i32_1 = arith.constant 0 : i32
    return %c0_i32, %c0_i32_0 : i32, i32
  }
  func.func @transform_13(%arg0: i32) -> (i32, i32) {
    %c0_i32 = arith.constant 0 : i32
    %c0_i32_0 = arith.constant 0 : i32
    %c0_i32_1 = arith.constant 0 : i32
    return %c0_i32, %c0_i32_0 : i32, i32
  }
  func.func @transform_14(%arg0: i32) -> (i32, i32) {
    %c0_i32 = arith.constant 0 : i32
    %c0_i32_0 = arith.constant 0 : i32
    %c0_i32_1 = arith.constant 0 : i32
    return %c0_i32, %c0_i32_0 : i32, i32
  }
  func.func @transform_15(%arg0: i32) -> (i32, i32) {
    %c0_i32 = arith.constant 0 : i32
    %c0_i32_0 = arith.constant 0 : i32
    %c0_i32_1 = arith.constant 0 : i32
    return %c0_i32, %c0_i32_0 : i32, i32
  }
  func.func @transform_16(%arg0: i32) -> (i32, i32) {
    %c0_i32 = arith.constant 0 : i32
    %c0_i32_0 = arith.constant 0 : i32
    %c0_i32_1 = arith.constant 0 : i32
    return %c0_i32, %c0_i32_0 : i32, i32
  }
  func.func @transform_17(%arg0: i32) -> (i32, i32) {
    %c0_i32 = arith.constant 0 : i32
    %c0_i32_0 = arith.constant 0 : i32
    %c0_i32_1 = arith.constant 0 : i32
    return %c0_i32, %c0_i32_0 : i32, i32
  }
  func.func @transform_18(%arg0: i32) -> (i32, i32) {
    %c0_i32 = arith.constant 0 : i32
    %c0_i32_0 = arith.constant 0 : i32
    %c0_i32_1 = arith.constant 0 : i32
    return %c0_i32, %c0_i32_0 : i32, i32
  }
  func.func @transform_19(%arg0: i32) -> (i32, i32) {
    %c0_i32 = arith.constant 0 : i32
    %c0_i32_0 = arith.constant 0 : i32
    return %arg0, %c0_i32 : i32, i32
  }
  func.func @transform_20(%arg0: i32) -> (i32, i32) {
    %c0_i32 = arith.constant 0 : i32
    %c0_i32_0 = arith.constant 0 : i32
    return %arg0, %c0_i32 : i32, i32
  }
  func.func @transform_21(%arg0: i32) -> (i32, i32) {
    %c0_i32 = arith.constant 0 : i32
    %c0_i32_0 = arith.constant 0 : i32
    return %arg0, %c0_i32 : i32, i32
  }
  func.func @transform_22(%arg0: i32) -> (i32, i32) {
    %c0_i32 = arith.constant 0 : i32
    %c0_i32_0 = arith.constant 0 : i32
    return %arg0, %c0_i32 : i32, i32
  }
  func.func @transform_23(%arg0: i32) -> (i32, i32) {
    %c0_i32 = arith.constant 0 : i32
    %c0_i32_0 = arith.constant 0 : i32
    return %arg0, %c0_i32 : i32, i32
  }
  func.func @transform_24(%arg0: i32) -> (i32, i32) {
    %c0_i32 = arith.constant 0 : i32
    %c0_i32_0 = arith.constant 0 : i32
    return %arg0, %c0_i32 : i32, i32
  }
}

</mosaic_0001>

<bundles_post_ra>
// kernel: _meta_forward_impl.1
= control target key start
LH: loop header
LB: loop body
LE: loop exit
PB: predicated region body
PF: predicated region fallthrough
CT: control target
= control target key end

     0   :  { %s12461_s0 = inlined_call_operand.vmem [shape: f32[36,204], index: 0, kind: input, shape index: {}]   ;;  %s12462_s1 = inlined_call_operand.vmem [shape: bf16[3,204,128], index: 1, kind: input, shape index: {}]   ;;  %s12463_s2 = inlined_call_operand.vmem [shape: bf16[3,136,256], index: 2, kind: input, shape index: {}]   ;;  %s12464_s3 = inlined_call_operand.vmem [shape: bf16[3,272,512], index: 3, kind: input, shape index: {}]   ;;  %s12465_s4 = inlined_call_operand.hbm [shape: bf16[3,544,256], index: 4, kind: input, shape index: {}]   ;;  %s12466_s5 = inlined_call_operand.vmem [shape: bf16[3,272,128], index: 5, kind: input, shape index: {}]   ;;  %s12467_s6 = inlined_call_operand.vmem [shape: bf16[3,136,48], index: 6, kind: input, shape index: {}]   ;;  %s12468_s7 = inlined_call_operand.vmem [shape: f32[1,128], index: 7, kind: input, shape index: {}]   ;;  %s12469_s8 = inlined_call_operand.vmem [shape: f32[1,256], index: 8, kind: input, shape index: {}]   ;;  %s12470_s9 = inlined_call_operand.vmem [shape: f32[1,512], index: 9, kind: input, shape index: {}]   ;;  %s12471_s10 = inlined_call_operand.vmem [shape: f32[1,256], index: 10, kind: input, shape index: {}]   ;;  %s12472_s11 = inlined_call_operand.vmem [shape: f32[1,128], index: 11, kind: input, shape index: {}]   ;;  %s12473_s12 = inlined_call_operand.vmem [shape: f32[1,48], index: 12, kind: input, shape index: {}]   ;;  %s12474_s13 = inlined_call_operand.vmem [shape: f32[1,128], index: 13, kind: input, shape index: {}]   ;;  %s12475_s14 = inlined_call_operand.vmem [shape: f32[1,256], index: 14, kind: input, shape index: {}]   ;;  %s12476_s15 = inlined_call_operand.vmem [shape: f32[1,512], index: 15, kind: input, shape index: {}]   ;;  %s12477_s16 = inlined_call_operand.vmem [shape: f32[1,256], index: 16, kind: input, shape index: {}]   ;;  %s12478_s17 = inlined_call_operand.vmem [shape: f32[1,128], index: 17, kind: input, shape index: {}]   ;;  %s12479_s18 = inlined_call_operand.vmem [shape: f32[1,48], index: 18, kind: input, shape index: {}]   ;;  %s12480_s19 = inlined_call_operand.vmem [shape: f32[36,128], index: 19, kind: output, shape index: {0}]   ;;  %s12481_s20 = inlined_call_operand.vmem [shape: f32[36,256], index: 20, kind: output, shape index: {1}]   ;;  %s12482_s21 = inlined_call_operand.vmem [shape: f32[36,512], index: 21, kind: output, shape index: {2}]   ;;  %s12483_s22 = inlined_call_operand.vmem [shape: f32[36,256], index: 22, kind: output, shape index: {3}]   ;;  %s12484_s23 = inlined_call_operand.vmem [shape: f32[36,128], index: 23, kind: output, shape index: {4}]   ;;  %s12485_s24 = inlined_call_operand.vmem [shape: f32[36,48], index: 24, kind: output, shape index: {5}]  }
   0x1   :  { %12507 = sst [smem:[#allocation26_spill]] %s12461_s0 }
   0x2   :  { %12508 = sst [smem:[#allocation27_spill]] %s12462_s1 }
   0x3   :  { %12509 = sst [smem:[#allocation28_spill]] %s12463_s2 }
   0x4   :  { %12510 = sst [smem:[#allocation29_spill]] %s12464_s3 }
   0x5   :  { %12511 = sst [smem:[#allocation30_spill]] %s12465_s4 }
   0x6   :  { %12512 = sst [smem:[#allocation31_spill]] %s12466_s5 }
   0x7   :  { %12513 = sst [smem:[#allocation32_spill]] %s12467_s6 }
   0x8   :  { %12514 = sst [smem:[#allocation33_spill]] %s12468_s7 }
   0x9   :  { %12515 = sst [smem:[#allocation34_spill]] %s12469_s8 }
   0xa   :  { %30 = vsyncpa [#allocation8], 0  ;;  %s9751_s5 = smov [#allocation7]  }
   0xb   :  { %s44_s26 = sshll.u32 %s9751_s5, 4  ;;  %s45_s26 = int_to_ptr.vmem [resolvable:$true] %s44_s26 }
   0xc   :  { %s9737_s27 = scalar_lea.vmem %s45_s26, 26112  ;;  %p9742_p1 = scmp.lt.s32.totalorder %s45_s26, %s45_s26 }
   0xd   :  { %p9738_p0 = scmp.ne.s32.totalorder %s45_s26, %s9737_s27  ;;  %p9743_p2 = scmp.lt.s32.totalorder %s9737_s27, %s9737_s27 }
   0xf   :  { %p9744_p3 = por %p9743_p2, %p9742_p1 }
  0x11   :  { %p9745_p4 = pnand %p9744_p3, %p9738_p0 }
  0x13   :  { %9748 = shalt.err (!%p9745_p4)
}
  0x14   :  { %s9752_s28 = smov 128   ;;  %s9753_s6 = smov 8  }
  0x15   :  { %s12516_s0 = sld [smem:[#allocation30_spill]] }
  0x1b   :  { %50 = dma.hbm_to_vmem [thread:$0]  %s12516_s0, 26112, %s45_s26, [#allocation8], %s9752_s28, %s9752_s28, %s9753_s6  }
  0x1c   :  { %9749 = dma.done.wait [#allocation8], 26112  }
  0x1d   :  { %9750 = vsyncadd [#allocation8], 4294941184  ;;  %v12492_v0 = vmov 0   ;;  %s12517_s3 = sld [smem:[#allocation27_spill]]  ;;  %vm297_vm0 = vcmask 1045504   ;;  %vm287_vm1 = vcmask 621568  }
  0x1e   :  { %301 = vmatprep.subr.bf16.mxu0 %v12492_v0  ;;  %445 = vmatprep.subr.bf16.mxu1 %v12492_v0  ;;  %s12518_s27 = sld [smem:[#allocation26_spill]]  ;;  %vm160_vm2 = vsmask.f32 7424  ;;  %vm542_vm3 = vcmask 1046528   ;;  %vm785_vm5 = vcmask 64512   ;;  %vm994_vm6 = vcmask 1043456  }
  0x1f   :  { %s12519_s28 = sld [smem:[#allocation28_spill]]  ;;  %vm790_vm7 = vcmask 60416   ;;  %vm750_vm8 = vcmask 1040384   ;;  %vm1573_vm10 = vcmask 130048   ;;  %vm1578_vm11 = vcmask 125952  }
  0x20   :  { %s12523_s6 = sld [smem:[#allocation33_spill]]  ;;  %vm3990_vm13 = vcmask 261120   ;;  %vm3995_vm14 = vcmask 257024   ;;  %vm9756_vm15 = vmmov 0  }
  0x21   :  { %s12529_s0 = sld [smem:[#allocation34_spill]] }
  0x22   :  { %s12564_s30 = sld [smem:[#allocation32_spill]] }
  0x23   :  { %v8921_v1 = vld [vmem:[%s12517_s3 + $0xa0] sm:$0xff]   ;;  %v8922_v2 = vld [vmem:[%s12517_s3 + $0x38] sm:$0xff]   ;;  %v8924_v4 = vld [vmem:[%s12517_s3 + $0x30] sm:$0xff]  }
  0x24   :  { %302 = vmatpush1.bf16.msra.mxu0 %v8921_v1  ;;  %v8923_v3 = vld [vmem:[%s12517_s3 + $0x98] sm:$0xff]   ;;  %446 = vmatpush1.bf16.msra.mxu1 %v8922_v2  ;;  %v8925_v5 = vld [vmem:[%s12517_s3 + $0x90] sm:$0xff]   ;;  %v8926_v6 = vld [vmem:[%s12517_s3 + $0x28] sm:$0xff]  }
  0x25   :  { %303 = vmatprep.subr.bf16.mxu0 %v12492_v0  ;;  %447 = vmatprep.subr.bf16.mxu1 %v12492_v0  ;;  %v8927_v7 = vld [vmem:[%s12517_s3 + $0x88] sm:$0xff]   ;;  %v8928_v8 = vld [vmem:[%s12517_s3 + $0x20] sm:$0xff]   ;;  %v8930_v10 = vld [vmem:[%s12517_s3 + $0x18] sm:$0xff]  }
  0x26   :  { %v8929_v9 = vld [vmem:[%s12517_s3 + $0x80] sm:$0xff]   ;;  %v8931_v11 = vld [vmem:[%s12517_s3 + $0x78] sm:$0xff]   ;;  %v8932_v12 = vld [vmem:[%s12517_s3 + $0x10] sm:$0xff]  }
  0x27   :  { %v8933_v13 = vld [vmem:[%s12517_s3 + $0x70] sm:$0xff]   ;;  %v8934_v14 = vld [vmem:[%s12517_s3 + $0x8] sm:$0xff]   ;;  %v8936_v16 = vld [vmem:[%s12517_s3] sm:$0xff]  }
  0x28   :  { %304 = vmatpush1.bf16.msra.mxu0 %v8923_v3  ;;  %448 = vmatpush1.bf16.msra.mxu1 %v8924_v4  ;;  %v8935_v15 = vld [vmem:[%s12517_s3 + $0x68] sm:$0xff]   ;;  %v9953_v18 = vld [vmem:[%s12518_s27 + $0x18] sm:$0xff]  ;;  %v8938_v21 = vld [vmem:[%s12517_s3 + $0x60] sm:$0x3f]  }
  0x29   :  { %305 = vmatprep.subr.bf16.mxu0 %v12492_v0  ;;  %449 = vmatprep.subr.bf16.mxu1 %v12492_v0  ;;  %v8937_v17 = vld [vmem:[%s12517_s3 + $0xc8] sm:$0x3f]   ;;  %v90_v20 = vld [vmem:[%s12518_s27 + $0x38] sm:$0xff]  ;;  %v443_v31 = vsel %vm297_vm0, %v8938_v21, 0  ;;  %v9984_v32 = vld [vmem:[%s12518_s27 + $0x10] sm:$0xff] }
  0x2a   :  { %v88_v19 = vld [vmem:[%s12518_s27 + $0x28] sm:$0xff]  ;;  %v299_v27 = vsel %vm297_vm0, %v8937_v17, 0  ;;  %v125_v33 = vld [vmem:[%s12518_s27] sm:$0xfe]  ;;  %v8940_v37 = vld [vmem:[%s12517_s3 + $0x58] sm:$0xff]  }
  0x2b   :  { %v9965_v22 = vpack.c.bf16 %v90_v20, %v88_v19  ;;  %v126_v23 = vld [vmem:[%s12518_s27 + $0x8] sm:$0xfe]  ;;  %v8939_v34 = vld [vmem:[%s12517_s3 + $0xc0] sm:$0xff]   ;;  %v129_v40 = vpack.c.bf16 %v9984_v32, %v125_v33  ;;  %v89_v41 = vld [vmem:[%s12518_s27 + $0x30] sm:$0xff] }
  0x2c   :  { %306 = vmatpush1.bf16.msra.mxu0 %v8925_v5  ;;  %450 = vmatpush1.bf16.msra.mxu1 %v8926_v6  ;;  %v84_v24 = vld [vmem:[%s12518_s27 + $0x8] sm:$0xff]  ;;  %v130_v25 = vpack.c.bf16 %v9953_v18, %v126_v23  ;;  %v87_v38 = vld [vmem:[%s12518_s27 + $0x20] sm:$0xff]  ;;  %v8941_v44 = vld [vmem:[%s12517_s3 + $0xb8] sm:$0xff]  }
  0x2d   :  { %307 = vmatprep.subr.bf16.mxu0 %v12492_v0  ;;  %451 = vmatprep.subr.bf16.mxu1 %v12492_v0  ;;  %v94_v26 = vpack.c.bf16 %v9953_v18, %v84_v24  ;;  %v181_v28 = vshll.u32 %v9965_v22, 16  ;;  %v128_v43 = vld [vmem:[%s12518_s27 + $0x48] sm:$0x7]  ;;  %v10013_v45 = vpack.c.bf16 %v89_v41, %v87_v38  ;;  %v164_v46 = vshll.u32 %v129_v40, 16  ;;  %v8942_v47 = vld [vmem:[%s12517_s3 + $0x50] sm:$0xff]   ;;  %v8946_v58 = vld [vmem:[%s12517_s3 + $0x40] sm:$0xff]  }
  0x2e   :  { %v174_v29 = vshrl.u32 %v130_v25, 16  ;;  %v176_v30 = vshll.u32 %v130_v25, 16  ;;  %v132_v48 = vpack.c.bf16 %v128_v43, %v128_v43  ;;  %v8943_v49 = vld [vmem:[%s12517_s3 + $0xb0] sm:$0xff]   ;;  %v8944_v50 = vld [vmem:[%s12517_s3 + $0x48] sm:$0xff]   ;;  %v162_v51 = vshrl.u32 %v129_v40, 16  ;;  %v83_v61 = vld [vmem:[%s12518_s27] sm:$0xff] }
  0x2f   :  { %7839 = vmatprep.mubr.msk.bf16.mxu1 %vm287_vm1, %v94_v26  ;;  %v183_v36 = vrot.slane %v181_v28, 1  ;;  %v166_v52 = vrot.slane %v164_v46, 1  ;;  %v169_v53 = vshll.u32 %v10013_v45, 16  ;;  %v193_v54 = vshrl.u32 %v9965_v22, 16  ;;  %v127_v56 = vld [vmem:[%s12518_s27 + $0x40] sm:$0x7] }
  0x30   :  { %308 = vmatpush1.bf16.msra.mxu0 %v8927_v7  ;;  %452 = vmatpush1.bf16.msra.mxu1 %v8928_v8  ;;  %v178_v35 = vrot.slane %v176_v30, 1  ;;  %v197_v55 = vshll.u32 %v132_v48, 16  ;;  %v8945_v57 = vld [vmem:[%s12517_s3 + $0xa8] sm:$0xff]   ;;  %v131_v62 = vpack.c.bf16 %v127_v56, %v127_v56  ;;  %v93_v4 = vpack.c.bf16 %v9984_v32, %v83_v61  ;;  %v8948_v7 = vld [vmem:[%s12517_s3 + $0x100] sm:$0xff]   ;;  %v8950_v17 = vld [vmem:[%s12517_s3 + $0xf0] sm:$0xff]  }
  0x31   :  { %309 = vmatprep.subr.bf16.mxu0 %v12492_v0  ;;  %453 = vmatprep.subr.bf16.mxu1 %v12492_v0  ;;  %v167_v59 = vor.u32 %v166_v52, %v162_v51  ;;  %v171_v60 = vrot.slane %v169_v53, 1  ;;  %v195_v63 = vor.u32 %v193_v54, %v183_v36  ;;  %v8947_v1 = vld [vmem:[%s12517_s3 + $0x108] sm:$0xff]   ;;  %v185_v5 = vshrl.u32 %v10013_v45, 16  ;;  %v91_v23 = vld [vmem:[%s12518_s27 + $0x40] sm:$0x3]  ;;  %v8954_v30 = vld [vmem:[%s12517_s3 + $0xd0] sm:$0xff]  }
  0x32   :  { %v179_v39 = vor.u32 %v178_v35, %v174_v29  ;;  %v199_v2 = vrot.slane %v197_v55, 1  ;;  %v189_v6 = vshll.u32 %v131_v62, 16  ;;  %v201_v21 = vshrl.u32 %v131_v62, 16  ;;  %v8951_v24 = vld [vmem:[%s12517_s3 + $0xe8] sm:$0xff]   ;;  %v8952_v28 = vld [vmem:[%s12517_s3 + $0xe0] sm:$0xff]   ;;  %v8958_v38 = vld [vmem:[%s12517_s3 + $0x118] sm:$0xff]  }
  0x33   :  { %v172_v3 = vsel %vm160_vm2, %v167_v59, %v171_v60  ;;  %v547_v25 = vrot.slane %v9965_v22, 1  ;;  %v8957_v35 = vld [vmem:[%s12517_s3 + $0x120] sm:$0xff]   ;;  %v8959_v41 = vld [vmem:[%s12517_s3 + $0x110] sm:$0xff]   ;;  %v770_v61 = vlaneseq }
  0x34   :  { %310 = vmatpush1.bf16.msra.mxu0 %v8929_v9  ;;  %454 = vmatpush1.bf16.msra.mxu1 %v8930_v10  ;;  %v184_v42 = vsel %vm160_vm2, %v179_v39, %v183_v36  ;;  %v200_v8 = vsel %vm160_vm2, %v195_v63, %v199_v2  ;;  %v187_v9 = vor.u32 %v185_v5, %v171_v60  ;;  %v191_v10 = vrot.slane %v189_v6, 1  ;;  %v501_v36 = vld [vmem:[%s12518_s27] sm:$0xfc]  ;;  %v8968_v54 = vld [vmem:[%s12519_s28 + $0x174] ss:$8 sps:$4 sm:$0xff]  }
  0x35   :  { %311 = vmatprep.subr.bf16.mxu0 %v12492_v0  ;;  %455 = vmatprep.subr.bf16.mxu1 %v12492_v0  ;;  %v505_v39 = vpack.c.bf16 %v9984_v32, %v501_v36  ;;  %v8960_v51 = vld [vmem:[%s12519_s28 + $0x180] ss:$8 sps:$4 sm:$0xff]   ;;  %v8965_v52 = vld [vmem:[%s12519_s28 + $0xfc] ss:$8 sps:$4 sm:$0xff]   ;;  %v8966_v55 = vld [vmem:[%s12519_s28 + $0x170] ss:$8 sps:$4 sm:$0xff]  }
  0x36   :  { %7823 = vmatprep.mubr.msk.bf16.mxu0 %vm287_vm1, %v184_v42  ;;  %v203_v26 = vor.u32 %v201_v21, %v191_v10  ;;  %v503_v42 = vld [vmem:[%s12518_s27 + $0x40] sm:$0xf]  ;;  %v8971_v56 = vld [vmem:[%s12519_s28 + $0xec] ss:$8 sps:$4 sm:$0xff]   ;;  %v8977_v60 = vld [vmem:[%s12519_s28 + $0xdc] ss:$8 sps:$4 sm:$0xff]  }
  0x37   :  { %v543_v43 = vrot.slane %v505_v39, 1  ;;  %v8963_v53 = vld [vmem:[%s12519_s28 + $0xf8] ss:$8 sps:$4 sm:$0xff]   ;;  %vm10174_vm4 = vcmp.lt.s32.totalorder %v770_v61, 136  ;;  %v12520_v63 = vmov 0  ;;  %vm10514_vm9 = vcmp.lt.s32.totalorder %v770_v61, 272 }
  0x38   :  { %312 = vmatpush1.bf16.msra.mxu0 %v8931_v11  ;;  %456 = vmatpush1.bf16.msra.mxu1 %v8932_v12  ;;  %v204_v11 = vshrl.u32 %v132_v48, 16  ;;  %v92_v12 = vld [vmem:[%s12518_s27 + $0x48] sm:$0x3]  ;;  %v8975_v62 = vld [vmem:[%s12519_s28 + $0xd8] ss:$8 sps:$4 sm:$0xff]   ;;  %v12521_v63 = vsel %vm10174_vm4, 4294967295, %v12520_v63 }
  0x39   :  { %313 = vmatprep.subr.bf16.mxu0 %v12492_v0  ;;  %457 = vmatprep.subr.bf16.mxu1 %v12492_v0  ;;  %v98_v19 = vpack.c.bf16 %v92_v12, %v92_v12  ;;  %v8972_v59 = vld [vmem:[%s12519_s28 + $0x160] ss:$8 sps:$4 sm:$0xff]   ;;  %12522 = vst [vmem:[#allocation10_spill] sm:$0xff] %v12521_v63  ;;  %v8986_v6 = vld [vmem:[%s12519_s28 + $0x144] ss:$8 sps:$4 sm:$0xff]   ;;  %vm11347_vm12 = vcmp.lt.s32.totalorder %v770_v61, 544 }
  0x3a   :  { %v8981_v5 = vld [vmem:[%s12519_s28 + $0xc8] ss:$8 sps:$4 sm:$0xff]   ;;  %v8995_v12 = vld [vmem:[%s12519_s28 + $0xac] ss:$8 sps:$4 sm:$0xff]   ;;  %v9424_v63 = vld [vmem:[#allocation7 + $0x2c4] ss:$8 sps:$4 sm:$0xff]  }
  0x3b   :  { %v9005_v21 = vld [vmem:[%s12519_s28 + $0x88] ss:$8 sps:$4 sm:$0xff]  }
  0x3c   :  { %314 = vmatpush1.bf16.msra.mxu0 %v8933_v13  ;;  %458 = vmatpush1.bf16.msra.mxu1 %v8934_v14  ;;  %v502_v13 = vld [vmem:[%s12518_s27 + $0x8] sm:$0xfc]  ;;  %v8949_v14 = vld [vmem:[%s12517_s3 + $0xf8] sm:$0xff]  }
  0x3d   :  { %315 = vmatprep.subr.bf16.mxu0 %v12492_v0  ;;  %459 = vmatprep.subr.bf16.mxu1 %v12492_v0  ;;  %v506_v20 = vpack.c.bf16 %v9953_v18, %v502_v13  ;;  %v8993_v13 = vld [vmem:[%s12519_s28 + $0xa8] ss:$8 sps:$4 sm:$0xff]  }
  0x3f   :  { %v546_v18 = vrot.slane %v506_v20, 1  ;;  %v9002_v20 = vld [vmem:[%s12519_s28 + $0x110] ss:$8 sps:$4 sm:$0xff]  }
  0x40   :  { %316 = vmatpush1.bf16.msra.mxu0 %v8935_v15  ;;  %460 = vmatpush1.bf16.msra.mxu1 %v8936_v16  ;;  %v192_v15 = vsel %vm160_vm2, %v187_v9, %v191_v10  ;;  %v206_v16 = vor.u32 %v204_v11, %v199_v2  ;;  %v12494_v2 = vmov 0.0   ;;  %v8987_v9 = vld [vmem:[%s12519_s28 + $0xb8] ss:$8 sps:$4 sm:$0xff]   ;;  %v8992_v10 = vld [vmem:[%s12519_s28 + $0x134] ss:$8 sps:$4 sm:$0xff]  }
  0x41   :  { %323 = vmatprep.subr.bf16.mxu0 %v12492_v0  ;;  %467 = vmatprep.subr.bf16.mxu1 %v12492_v0  ;;  %v548_v29 = vsel %vm542_vm3, %v546_v18, %v547_v25  ;;  %774 = vst.msk [vmem:[#allocation2] ss:$8 sm:$0x3] %vm10174_vm4, %v12494_v2  ;;  %783 = vst.msk [vmem:[#allocation2 + $0x43] ss:$8 sm:$0x3] %vm10174_vm4, %v12494_v2 }
  0x42   :  { %7198 = vst.msk [vmem:[#allocation6] ss:$8 sm:$0x3] %vm10174_vm4, %v12494_v2  ;;  %7207 = vst.msk [vmem:[#allocation6 + $0x43] ss:$8 sm:$0x3] %vm10174_vm4, %v12494_v2 }
  0x43   :  { %v8990_v11 = vld [vmem:[%s12519_s28 + $0x130] ss:$8 sps:$4 sm:$0xff]   ;;  %787 = vst.msk [vmem:[#allocation2 + $0x18] sm:$0xff] %vm785_vm5, %v12494_v2  ;;  %789 = vst.msk [vmem:[#allocation2 + $0x38] sm:$0xff] %vm785_vm5, %v12494_v2  ;;  %v7902_v18 = vld [vmem:[%s12519_s28 + $0x108] sm:$0xff] }
  0x44   :  { %324 = vmatpush2.bf16.msra.mxu0 %v299_v27  ;;  %468 = vmatpush2.bf16.msra.mxu1 %v443_v31  ;;  %v97_v27 = vpack.c.bf16 %v91_v23, %v91_v23  ;;  %v8955_v31 = vld [vmem:[%s12517_s3 + $0x130] sm:$0x3f]   ;;  %7210 = vst.msk [vmem:[#allocation6 + $0x18] sm:$0xff] %vm785_vm5, %v12494_v2  ;;  %7212 = vst.msk [vmem:[#allocation6 + $0x38] sm:$0xff] %vm785_vm5, %v12494_v2 }
  0x45   :  { %325 = vmatprep.subr.bf16.mxu0 %v12492_v0  ;;  %469 = vmatprep.subr.bf16.mxu1 %v12492_v0  ;;  %v643_v33 = vsel %vm297_vm0, %v8955_v31, 0  ;;  %786 = vst.msk [vmem:[#allocation2 + $0x8] sm:$0xff] %vm785_vm5, %v12494_v2  ;;  %7209 = vst.msk [vmem:[#allocation6 + $0x8] sm:$0xff] %vm785_vm5, %v12494_v2  ;;  %v9007_v23 = vld [vmem:[%s12519_s28 + $0x8c] ss:$8 sps:$4 sm:$0xff]   ;;  %vm7752_vm0 = vcmask 392192  }
  0x46   :  { %791 = vst.msk [vmem:[#allocation2 + $0x48] sm:$0xf] %vm790_vm7, %v12494_v2  ;;  %7213 = vst.msk [vmem:[#allocation6 + $0x48] sm:$0xf] %vm790_vm7, %v12494_v2 }
  0x47   :  { %6189 = vst.msk [vmem:[#allocation5] ss:$8 sm:$0x7] %vm10514_vm9, %v12494_v2  ;;  %1562 = vst.msk [vmem:[#allocation3] ss:$8 sm:$0x7] %vm10514_vm9, %v12494_v2 }
  0x48   :  { %326 = vmatpush2.bf16.msra.mxu0 %v8939_v34  ;;  %470 = vmatpush2.bf16.msra.mxu1 %v8940_v37  ;;  %v8956_v34 = vld [vmem:[%s12517_s3 + $0x128] sm:$0xff]   ;;  %1571 = vst.msk [vmem:[#allocation3 + $0x63] ss:$8 sm:$0x7] %vm10514_vm9, %v12494_v2 }
  0x49   :  { %327 = vmatprep.subr.bf16.mxu0 %v12492_v0  ;;  %471 = vmatprep.subr.bf16.mxu1 %v12492_v0  ;;  %v504_v37 = vld [vmem:[%s12518_s27 + $0x48] sm:$0xf]  ;;  %6198 = vst.msk [vmem:[#allocation5 + $0x63] ss:$8 sm:$0x7] %vm10514_vm9, %v12494_v2  ;;  %s12560_s27 = sld [smem:[#allocation31_spill]] }
  0x4a   :  { %v508_v40 = vpack.c.bf16 %v504_v37, %v504_v37  ;;  %1575 = vst.msk [vmem:[#allocation3 + $0x28] sm:$0xff] %vm1573_vm10, %v12494_v2  ;;  %1577 = vst.msk [vmem:[#allocation3 + $0x58] sm:$0xff] %vm1573_vm10, %v12494_v2 }
  0x4b   :  { %6200 = vst.msk [vmem:[#allocation5 + $0x10] sm:$0xff] %vm1573_vm10, %v12494_v2  ;;  %6201 = vst.msk [vmem:[#allocation5 + $0x28] sm:$0xff] %vm1573_vm10, %v12494_v2 }
  0x4c   :  { %328 = vmatpush2.bf16.msra.mxu0 %v8941_v44  ;;  %472 = vmatpush2.bf16.msra.mxu1 %v8942_v47  ;;  %v544_v44 = vrot.slane %v10013_v45, 1  ;;  %v551_v46 = vrot.slane %v508_v40, 1  ;;  %v507_v47 = vpack.c.bf16 %v503_v42, %v503_v42  ;;  %6203 = vst.msk [vmem:[#allocation5 + $0x58] sm:$0xff] %vm1573_vm10, %v12494_v2  ;;  %1574 = vst.msk [vmem:[#allocation3 + $0x10] sm:$0xff] %vm1573_vm10, %v12494_v2 }
  0x4d   :  { %329 = vmatprep.subr.bf16.mxu0 %v12492_v0  ;;  %473 = vmatprep.subr.bf16.mxu1 %v12492_v0  ;;  %1579 = vst.msk [vmem:[#allocation3 + $0x70] sm:$0xf] %vm1578_vm11, %v12494_v2  ;;  %6204 = vst.msk [vmem:[#allocation5 + $0x70] sm:$0xf] %vm1578_vm11, %v12494_v2 }
  0x4e   :  { %v545_v32 = vsel %vm542_vm3, %v543_v43, %v544_v44  ;;  %v552_v48 = vsel %vm542_vm3, %v547_v25, %v551_v46  ;;  %3983 = vst.msk [vmem:[#allocation4 + $0x51] ss:$8 sm:$0x10] %vm11347_vm12, %v12494_v2  ;;  %3986 = vst.msk [vmem:[#allocation4 + $0x52] ss:$8 sm:$0x10] %vm11347_vm12, %v12494_v2 }
  0x4f   :  { %3979 = vst.msk [vmem:[#allocation4] ss:$8 sm:$0xf] %vm11347_vm12, %v12494_v2  ;;  %3980 = vst.msk [vmem:[#allocation4] ss:$8 sm:$0x10] %vm11347_vm12, %v12494_v2 }
  0x50   :  { %330 = vmatpush2.bf16.msra.mxu0 %v8943_v49  ;;  %474 = vmatpush2.bf16.msra.mxu1 %v8944_v50  ;;  %v549_v49 = vrot.slane %v507_v47, 1  ;;  %3988 = vst.msk [vmem:[#allocation4 + $0xa3] ss:$8 sm:$0xf] %vm11347_vm12, %v12494_v2 }
  0x51   :  { %331 = vmatprep.subr.bf16.mxu0 %v12492_v0  ;;  %475 = vmatprep.subr.bf16.mxu1 %v12492_v0  ;;  %3989 = vst.msk [vmem:[#allocation4 + $0xa3] ss:$8 sm:$0x10] %vm11347_vm12, %v12494_v2 }
  0x52   :  { %v550_v50 = vsel %vm542_vm3, %v544_v44, %v549_v49 }
  0x54   :  { %332 = vmatpush2.bf16.msra.mxu0 %v8945_v57  ;;  %476 = vmatpush2.bf16.msra.mxu1 %v8946_v58  ;;  %v8969_v57 = vld [vmem:[%s12519_s28 + $0xe8] ss:$8 sps:$4 sm:$0xff]   ;;  %v8974_v58 = vld [vmem:[%s12519_s28 + $0x164] ss:$8 sps:$4 sm:$0xff]  }
  0x55   :  { %645 = vmatprep.subr.bf16.mxu0 %v12492_v0  ;;  %1001 = vmatprep.subr.bf16.mxu1 %v8965_v52 }
  0x57   :  { %334 = vmatmul.mubr.bf16.vlgmr.msra.gmra.mxu0 %v172_v3  ;;  %478 = vmatmul.mubr.bf16.vlgmr.msra.gmra.mxu1 %v93_v4  ;;  %v8978_v3 = vld [vmem:[%s12519_s28 + $0x150] ss:$8 sps:$4 sm:$0xff]   ;;  %v8983_v4 = vld [vmem:[%s12519_s28 + $0xcc] ss:$8 sps:$4 sm:$0xff]  }
  0x58   :  { %646 = vmatpush1.bf16.msra.mxu0 %v8947_v1  ;;  %7824 = vmatprep.mubr.msk.bf16.mxu0 %vm287_vm1, %v200_v8  ;;  %v8980_v1 = vld [vmem:[%s12519_s28 + $0x154] ss:$8 sps:$4 sm:$0xff]  }
  0x59   :  { %647 = vmatprep.subr.bf16.mxu0 %v12492_v0  ;;  %7840 = vmatprep.mubr.msk.bf16.mxu1 %vm287_vm1, %v9965_v22  ;;  %v8953_v22 = vld [vmem:[%s12517_s3 + $0xd8] sm:$0xff]   ;;  %s12524_s3 = sld [smem:[#allocation29_spill]] }
  0x5a   :  { %1002 = vmatpush1.bf16.msra.mxu1 %v8963_v53  ;;  %v8989_v8 = vld [vmem:[%s12519_s28 + $0xbc] ss:$8 sps:$4 sm:$0xff]  }
  0x5b   :  { %1003 = vmatprep.subr.bf16.mxu1 %v8971_v56 }
  0x5c   :  { %648 = vmatpush1.bf16.msra.mxu0 %v8948_v7  ;;  %v8984_v7 = vld [vmem:[%s12519_s28 + $0x140] ss:$8 sps:$4 sm:$0xff]  }
  0x5d   :  { %649 = vmatprep.subr.bf16.mxu0 %v12492_v0 }
  0x5e   :  { %1004 = vmatpush1.bf16.msra.mxu1 %v8969_v57  ;;  %v7884_v57 = vld [vmem:[%s12523_s6] ss:$0 sm:$0xff] }
  0x5f   :  { %342 = vmatmul.mubr.bf16.gmra.mxu0 %v192_v15  ;;  %486 = vmatmul.mubr.bf16.gmra.mxu1 %v10013_v45  ;;  %v8962_v45 = vld [vmem:[%s12519_s28 + $0x184] ss:$8 sps:$4 sm:$0xff]   ;;  %v8996_v15 = vld [vmem:[%s12519_s28 + $0x120] ss:$8 sps:$4 sm:$0xff]  }
  0x60   :  { %650 = vmatpush1.bf16.msra.mxu0 %v8949_v14  ;;  %7825 = vmatprep.mubr.msk.bf16.mxu0 %vm287_vm1, %v206_v16  ;;  %v8998_v14 = vld [vmem:[%s12519_s28 + $0x124] ss:$8 sps:$4 sm:$0xff]  }
  0x61   :  { %651 = vmatprep.subr.bf16.mxu0 %v12492_v0  ;;  %7841 = vmatprep.mubr.msk.bf16.mxu1 %vm287_vm1, %v98_v19  ;;  %v9001_v16 = vld [vmem:[%s12519_s28 + $0x9c] ss:$8 sps:$4 sm:$0xff]  }
  0x62   :  { %1005 = vmatprep.subr.bf16.mxu1 %v8977_v60  ;;  %v9004_v19 = vld [vmem:[%s12519_s28 + $0x114] ss:$8 sps:$4 sm:$0xff]  }
  0x63   :  { %1006 = vmatpush1.bf16.msra.mxu1 %v8975_v62 }
  0x64   :  { %652 = vmatpush1.bf16.msra.mxu0 %v8950_v17  ;;  %1007 = vmatprep.subr.bf16.mxu1 %v8983_v4  ;;  %v8999_v17 = vld [vmem:[%s12519_s28 + $0x98] ss:$8 sps:$4 sm:$0xff]  }
  0x65   :  { %653 = vmatprep.subr.bf16.mxu0 %v12492_v0 }
  0x67   :  { %350 = vmatmul.mubr.bf16.gmra.mxu0 %v203_v26  ;;  %494 = vmatmul.mubr.bf16.gmra.mxu1 %v97_v27  ;;  %v7920_v26 = vcombine.high %v7902_v18, %v7902_v18 }
  0x68   :  { %654 = vmatpush1.bf16.msra.mxu0 %v8951_v24  ;;  %7881 = vmatprep.mubr.msk.bf16.mxu0 %vm287_vm1, %v548_v29  ;;  %v7963_v24 = vld [vmem:[%s12519_s28 + $0x190] sm:$0xff] }
  0x69   :  { %655 = vmatprep.subr.bf16.mxu0 %v12492_v0  ;;  %1008 = vmatpush1.bf16.msra.mxu1 %v8981_v5  ;;  %v7981_v25 = vcombine.high %v7963_v24, %v7963_v24  ;;  %v7980_v27 = vcombine.low %v7963_v24, %v7963_v24 }
  0x6a   :  { %1009 = vmatprep.subr.bf16.mxu1 %v8989_v8 }
  0x6b   :  { %v1362_v29 = vsel %vm994_vm6, %v7980_v27, 0 }
  0x6c   :  { %656 = vmatpush1.bf16.msra.mxu0 %v8952_v28  ;;  %v7919_v28 = vcombine.low %v7902_v18, %v7902_v18 }
  0x6d   :  { %657 = vmatprep.subr.bf16.mxu0 %v12492_v0  ;;  %1010 = vmatpush1.bf16.msra.mxu1 %v8987_v9 }
  0x6e   :  { %1011 = vmatprep.subr.bf16.mxu1 %v8995_v12 }
  0x70   :  { %658 = vmatpush1.bf16.msra.mxu0 %v8953_v22  ;;  %v996_v22 = vsel %vm994_vm6, %v7919_v28, 0 }
  0x71   :  { %659 = vmatprep.subr.bf16.mxu0 %v12492_v0  ;;  %1012 = vmatpush1.bf16.msra.mxu1 %v8993_v13 }
  0x72   :  { %1013 = vmatprep.subr.bf16.mxu1 %v9001_v16 }
  0x74   :  { %660 = vmatpush1.bf16.msra.mxu0 %v8954_v30  ;;  %v9014_v30 = vld [vmem:[%s12519_s28 + $0x74] ss:$8 sps:$4 sm:$0xff]  }
  0x75   :  { %667 = vmatprep.subr.bf16.mxu0 %v12492_v0  ;;  %1014 = vmatpush1.bf16.msra.mxu1 %v8999_v17 }
  0x76   :  { %1015 = vmatprep.subr.bf16.mxu1 %v9007_v23 }
  0x78   :  { %668 = vmatpush2.bf16.msra.mxu0 %v643_v33 }
  0x79   :  { %669 = vmatprep.subr.bf16.mxu0 %v12492_v0  ;;  %1016 = vmatpush1.bf16.msra.mxu1 %v9005_v21 }
  0x7a   :  { %7921 = vmatprep.subr.msk.bf16.mxu1 %vm994_vm6, %v7920_v26 }
  0x7c   :  { %670 = vmatpush2.bf16.msra.mxu0 %v8956_v34 }
  0x7d   :  { %671 = vmatprep.subr.bf16.mxu0 %v12492_v0  ;;  %1032 = vmatpush2.bf16.msra.mxu1 %v996_v22 }
  0x7e   :  { %1161 = vmatprep.subr.bf16.mxu1 %v9014_v30 }
  0x80   :  { %672 = vmatpush2.bf16.msra.mxu0 %v8957_v35 }
  0x81   :  { %673 = vmatprep.subr.bf16.mxu0 %v12492_v0 }
  0x84   :  { %674 = vmatpush2.bf16.msra.mxu0 %v8958_v38 }
  0x85   :  { %675 = vmatprep.subr.bf16.mxu0 %v12492_v0 }
  0x88   :  { %676 = vmatpush2.bf16.msra.mxu0 %v8959_v41 }
  0x89   :  { %1367 = vmatprep.subr.bf16.mxu0 %v8962_v45 }
  0x8b   :  { %678 = vmatmul.mubr.bf16.vlgmr.msra.gmra.mxu0 %v545_v32 }
  0x8c   :  { %7882 = vmatprep.mubr.msk.bf16.mxu0 %vm287_vm1, %v552_v48  ;;  %1368 = vmatpush1.bf16.msra.mxu0 %v8960_v51 }
  0x8d   :  { %1369 = vmatprep.subr.bf16.mxu0 %v8968_v54 }
  0x90   :  { %1370 = vmatpush1.bf16.msra.mxu0 %v8966_v55 }
  0x91   :  { %1371 = vmatprep.subr.bf16.mxu0 %v8974_v58 }
  0x93   :  { %686 = vmatmul.mubr.bf16.gmra.mxu0 %v550_v50 }
  0x94   :  { %7883 = vmatprep.mubr.msk.bf16.mxu0 %vm287_vm1, %v551_v46  ;;  %1372 = vmatpush1.bf16.msra.mxu0 %v8972_v59  ;;  %v7885_v59 = vld [vmem:[%s12474_s13] ss:$0 sm:$0xff]  ;;  %vm7757_vm1 = vcmask 386048  }
  0x95   :  { %1373 = vmatprep.subr.bf16.mxu0 %v8980_v1 }
  0x98   :  { %1374 = vmatpush1.bf16.msra.mxu0 %v8978_v3 }
  0x99   :  { %1375 = vmatprep.subr.bf16.mxu0 %v8986_v6 }
  0x9b   :  { %694 = vmatmul.mubr.bf16.gmra.mxu0 %v549_v49 }
  0x9c   :  { %1376 = vmatpush1.bf16.msra.mxu0 %v8984_v7 }
  0x9d   :  { %1377 = vmatprep.subr.bf16.mxu0 %v8992_v10 }
  0xa0   :  { %1378 = vmatpush1.bf16.msra.mxu0 %v8990_v11 }
  0xa1   :  { %1379 = vmatprep.subr.bf16.mxu0 %v8998_v14 }
  0xa4   :  { %1380 = vmatpush1.bf16.msra.mxu0 %v8996_v15 }
  0xa5   :  { %1381 = vmatprep.subr.bf16.mxu0 %v9004_v19 }
  0xa8   :  { %1382 = vmatpush1.bf16.msra.mxu0 %v9002_v20 }
  0xa9   :  { %7982 = vmatprep.subr.msk.bf16.mxu0 %vm994_vm6, %v7981_v25 }
  0xac   :  { %1398 = vmatpush2.bf16.msra.mxu0 %v1362_v29 }
 0x117   :  { %v335_v31 = vpop.f32.mrf.mxu0  ;;  %v479_v33 = vpop.f32.mrf.mxu1 }
 0x118   :  { %v480_v55 = vadd.f32 %v479_v33, %v335_v31 }
 0x119   :  { %v337_v34 = vpop.f32.mrf.mxu0  ;;  %v481_v35 = vpop.f32.mrf.mxu1 }
 0x11b   :  { %v338_v36 = vpop.f32.mrf.mxu0  ;;  %v482_v37 = vpop.f32.mrf.mxu1 }
 0x11c   :  { %v483_v62 = vadd.f32 %v482_v37, %v338_v36 }
 0x11d   :  { %v340_v38 = vpop.f32.mrf.mxu0  ;;  %v484_v39 = vpop.f32.mrf.mxu1 }
 0x11e   :  { %v10295_v38 = vld [vmem:[#allocation2 + $0x18] sm:$0xff]  ;;  %v826_v39 = vld [vmem:[#allocation2 + $0x8] sm:$0xfe] }
 0x11f   :  { %v343_v40 = vpop.f32.mrf.mxu0  ;;  %v487_v41 = vpop.f32.mrf.mxu1 }
 0x120   :  { %v488_v7 = vadd.f32 %v487_v41, %v343_v40 }
 0x121   :  { %v345_v42 = vpop.f32.mrf.mxu0  ;;  %v489_v43 = vpop.f32.mrf.mxu1 }
 0x123   :  { %v346_v44 = vpop.f32.mrf.mxu0  ;;  %v490_v46 = vpop.f32.mrf.mxu1 }
 0x124   :  { %v491_v15 = vadd.f32 %v490_v46, %v346_v44  ;;  %v830_v46 = vpack.c.bf16 %v10295_v38, %v826_v39 }
 0x125   :  { %v348_v32 = vpop.f32.mrf.mxu0  ;;  %v492_v47 = vpop.f32.mrf.mxu1 }
 0x127   :  { %v351_v48 = vpop.f32.mrf.mxu0  ;;  %v495_v49 = vpop.f32.mrf.mxu1 }
 0x128   :  { %v496_v25 = vadd.f32 %v495_v49, %v351_v48 }
 0x129   :  { %v353_v50 = vpop.f32.mrf.mxu0  ;;  %v497_v45 = vpop.f32.mrf.mxu1 }
 0x12a   :  { %v1223_v45 = vld [vmem:[#allocation2 + $0x8] sm:$0xfc] }
 0x12b   :  { %v354_v51 = vpop.f32.mrf.mxu0  ;;  %v498_v52 = vpop.f32.mrf.mxu1 }
 0x12c   :  { %v1225_v52 = vld [vmem:[#allocation2 + $0x48] sm:$0xf] }
 0x12d   :  { %v355_v53 = vpop.f32.mrf.mxu0  ;;  %v499_v54 = vpop.f32.mrf.mxu1 }
 0x12e   :  { %v828_v53 = vld [vmem:[#allocation2 + $0x48] sm:$0x7]  ;;  %v866_v54 = vshll.u32 %v830_v46, 16 }
 0x14b   :  { %v679_v56 = vpop.f32.mrf.mxu0 }
 0x14c   :  { %v701_v58 = vadd.f32 %v679_v56, %v480_v55  ;;  %v1227_v56 = vpack.c.bf16 %v10295_v38, %v1223_v45 }
 0x14d   :  { %v681_v60 = vpop.f32.mrf.mxu0 }
 0x14e   :  { %v713_v1 = vmul.f32 %v7884_v57, %v701_v58  ;;  %v1229_v58 = vpack.c.bf16 %v1225_v52, %v1225_v52  ;;  %v9023_v52 = vld [vmem:[%s12519_s28 + $0x44] ss:$8 sps:$4 sm:$0xff]  }
 0x14f   :  { %v682_v3 = vpop.f32.mrf.mxu0 }
 0x150   :  { %v725_v4 = vadd.f32 %v7885_v59, %v713_v1  ;;  %v702_v5 = vadd.f32 %v682_v3, %v483_v62  ;;  %v799_v62 = vld [vmem:[#allocation2 + $0x38] sm:$0xff] }
 0x151   :  { %v684_v6 = vpop.f32.mrf.mxu0 }
 0x152   :  { %v730_v8 = vmul.f32 0.2, %v725_v4  ;;  %v714_v9 = vmul.f32 %v7884_v57, %v702_v5  ;;  %v868_v5 = vrot.slane %v866_v54, 1  ;;  %v9021_v54 = vld [vmem:[%s12519_s28 + $0x40] ss:$8 sps:$4 sm:$0xff]  }
 0x153   :  { %v687_v10 = vpop.f32.mrf.mxu0 }
 0x154   :  { %v735_v11 = vmax.f32 %v725_v4, %v730_v8  ;;  %v726_v12 = vadd.f32 %v7885_v59, %v714_v9  ;;  %v703_v13 = vadd.f32 %v687_v10, %v488_v7  ;;  %v864_v4 = vshrl.u32 %v830_v46, 16 }
 0x155   :  { %v689_v14 = vpop.f32.mrf.mxu0  ;;  %v1257_v10 = vrot.slane %v1227_v56, 1  ;;  %v793_v56 = vld [vmem:[#allocation2 + $0x8] sm:$0xff] }
 0x156   :  { %740 = vst [vmem:[%s12480_s19] sm:$0xff] %v735_v11  ;;  %v751_v16 = vrot.slane %v735_v11, 7  ;;  %v731_v17 = vmul.f32 0.2, %v726_v12  ;;  %v715_v19 = vmul.f32 %v7884_v57, %v703_v13  ;;  %v1262_v11 = vrot.slane %v1229_v58, 1  ;;  %v9024_v58 = vld [vmem:[%s12519_s28 + $0x30] ss:$8 sps:$4 sm:$0xff]  }
 0x157   :  { %v690_v20 = vpop.f32.mrf.mxu0 }
 0x158   :  { %765 = vst [vmem:[#allocation2] sm:$0xfe] %v751_v16  ;;  %v736_v21 = vmax.f32 %v726_v12, %v731_v17  ;;  %v727_v23 = vadd.f32 %v7885_v59, %v715_v19  ;;  %v704_v24 = vadd.f32 %v690_v20, %v491_v15  ;;  %v869_v17 = vor.u32 %v868_v5, %v864_v4  ;;  %v9035_v4 = vld [vmem:[%s12519_s28 + $0x4] ss:$8 sps:$4 sm:$0xff]  }
 0x159   :  { %v692_v18 = vpop.f32.mrf.mxu0  ;;  %v824_v5 = vld [vmem:[%s12519_s28 + $0x80] sm:$0xff] }
 0x15a   :  { %741 = vst [vmem:[%s12480_s19 + $0x8] sm:$0xff] %v736_v21  ;;  %v752_v26 = vrot.slane %v736_v21, 7  ;;  %v732_v27 = vmul.f32 0.2, %v727_v23  ;;  %v716_v28 = vmul.f32 %v7884_v57, %v704_v24 }
 0x15b   :  { %v695_v29 = vpop.f32.mrf.mxu0 }
 0x15c   :  { %v10290_v22 = vsel %vm750_vm8, %v751_v16, %v752_v26  ;;  %v737_v30 = vmax.f32 %v727_v23, %v732_v27  ;;  %v728_v31 = vadd.f32 %v7885_v59, %v716_v28  ;;  %v705_v33 = vadd.f32 %v695_v29, %v496_v25  ;;  %v9012_v29 = vld [vmem:[%s12519_s28 + $0x70] ss:$8 sps:$4 sm:$0xff]  }
 0x15d   :  { %v697_v34 = vpop.f32.mrf.mxu0 }
 0x15e   :  { %742 = vst [vmem:[%s12480_s19 + $0x10] sm:$0xff] %v737_v30  ;;  %v754_v35 = vrot.slane %v737_v30, 7  ;;  %v733_v36 = vmul.f32 0.2, %v728_v31  ;;  %v717_v37 = vmul.f32 %v7884_v57, %v705_v33 }
 0x15f   :  { %v698_v40 = vpop.f32.mrf.mxu0  ;;  %v825_v32 = vld [vmem:[#allocation2] sm:$0xfe] }
 0x160   :  { %v755_v41 = vsel %vm750_vm8, %v752_v26, %v754_v35  ;;  %v738_v42 = vmax.f32 %v728_v31, %v733_v36  ;;  %v729_v43 = vadd.f32 %v7885_v59, %v717_v37  ;;  %v829_v51 = vpack.c.bf16 %v10290_v22, %v825_v32  ;;  %v1222_v57 = vld [vmem:[#allocation2] sm:$0xfc]  ;;  %v9020_v32 = vld [vmem:[%s12519_s28 + $0x54] ss:$8 sps:$4 sm:$0xff]  }
 0x161   :  { %767 = vst [vmem:[#allocation2 + $0x20] sm:$0xff] %v755_v41  ;;  %v699_v44 = vpop.f32.mrf.mxu0  ;;  %v832_v59 = vpack.c.bf16 %v828_v53, %v828_v53  ;;  %v1226_v8 = vpack.c.bf16 %v10290_v22, %v1222_v57 }
 0x162   :  { %777 = vst.msk [vmem:[#allocation2 + $0x21] ss:$8 sm:$0x3] %vm10174_vm4, %v12494_v2  ;;  %780 = vst.msk [vmem:[#allocation2 + $0x22] ss:$8 sm:$0x3] %vm10174_vm4, %v12494_v2 }
 0x163   :  { %743 = vst [vmem:[%s12480_s19 + $0x18] sm:$0xff] %v738_v42  ;;  %v756_v47 = vrot.slane %v738_v42, 7  ;;  %v734_v48 = vmul.f32 0.2, %v729_v43  ;;  %788 = vst.msk [vmem:[#allocation2 + $0x28] sm:$0xff] %vm785_vm5, %v12494_v2  ;;  %v854_v1 = vshll.u32 %v829_v51, 16 }
 0x164   :  { %v887_v12 = vshll.u32 %v832_v59, 16  ;;  %v1254_v21 = vrot.slane %v1226_v8, 1  ;;  %v852_v23 = vshrl.u32 %v829_v51, 16  ;;  %v894_v46 = vshrl.u32 %v832_v59, 16 }
 0x165   :  { %v757_v49 = vsel %vm750_vm8, %v754_v35, %v756_v47  ;;  %v739_v50 = vmax.f32 %v729_v43, %v734_v48  ;;  %v856_v14 = vrot.slane %v854_v1, 1  ;;  %v9017_v35 = vld [vmem:[%s12519_s28 + $0x64] ss:$8 sps:$4 sm:$0xff]   ;;  %v9015_v43 = vld [vmem:[%s12519_s28 + $0x60] ss:$8 sps:$4 sm:$0xff]   ;;  %v803_v59 = vpack.c.bf16 %v10295_v38, %v793_v56 }
 0x166   :  { %v889_v27 = vrot.slane %v887_v12, 1  ;;  %v9027_v1 = vld [vmem:[%s12519_s28 + $0x20] ss:$8 sps:$4 sm:$0xff]   ;;  %v9032_v38 = vld [vmem:[%s12519_s28 + $0x14] ss:$8 sps:$4 sm:$0xff]   ;;  %v7942_v8 = vcombine.high %v824_v5, %v824_v5 }
 0x167   :  { %744 = vst [vmem:[%s12480_s19 + $0x20] sm:$0x3] %v739_v50  ;;  %v758_v55 = vrot.slane %v739_v50, 7  ;;  %v857_v30 = vor.u32 %v856_v14, %v852_v23  ;;  %v9018_v50 = vld [vmem:[%s12519_s28 + $0x50] ss:$8 sps:$4 sm:$0xff]   ;;  %v792_v12 = vld [vmem:[#allocation2] sm:$0xff] }
 0x168   :  { %v896_v51 = vor.u32 %v894_v46, %v889_v27  ;;  %v801_v14 = vld [vmem:[#allocation2 + $0x48] sm:$0x3]  ;;  %v9044_v23 = vld [vmem:[%s12524_s3 + $0x2e0] ss:$16 sps:$4 sm:$0xff]  }
 0x169   :  { %v759_v60 = vsel %vm750_vm8, %v756_v47, %v758_v55  ;;  %v796_v3 = vld [vmem:[#allocation2 + $0x20] sm:$0xff]  ;;  %v9026_v55 = vld [vmem:[%s12519_s28 + $0x34] ss:$8 sps:$4 sm:$0xff]   ;;  %v9077_v46 = vld [vmem:[%s12524_s3 + $0x248] ss:$16 sps:$4 sm:$0xff]  }
 0x16a   :  { %769 = vst [vmem:[#allocation2 + $0x40] sm:$0x7] %v759_v60  ;;  %v797_v6 = vld [vmem:[#allocation2 + $0x28] sm:$0xff]  ;;  %v10317_v7 = vpack.c.bf16 %v757_v49, %v796_v3  ;;  %v9030_v3 = vld [vmem:[%s12519_s28 + $0x10] ss:$8 sps:$4 sm:$0xff]  }
 0x16b   :  { %v10320_v9 = vpack.c.bf16 %v799_v62, %v797_v6  ;;  %v9029_v62 = vld [vmem:[%s12519_s28 + $0x24] ss:$8 sps:$4 sm:$0xff]   ;;  %v9033_v6 = vld [vmem:[%s12519_s28] ss:$8 sps:$4 sm:$0xff]  }
 0x16c   :  { %v1255_v13 = vrot.slane %v10317_v7, 1  ;;  %v859_v15 = vshll.u32 %v10317_v7, 16  ;;  %v875_v47 = vshrl.u32 %v10317_v7, 16  ;;  %v9092_v56 = vld [vmem:[%s12524_s3 + $0x3e0] ss:$16 sps:$4 sm:$0xff]  }
 0x16d   :  { %v1258_v16 = vrot.slane %v10320_v9, 1  ;;  %v871_v19 = vshll.u32 %v10320_v9, 16  ;;  %v883_v20 = vshrl.u32 %v10320_v9, 16 }
 0x16e   :  { %v861_v24 = vrot.slane %v859_v15, 1  ;;  %v1256_v28 = vsel %vm542_vm3, %v1254_v21, %v1255_v13  ;;  %v807_v15 = vpack.c.bf16 %v801_v14, %v801_v14  ;;  %v9049_v21 = vld [vmem:[%s12524_s3 + $0x2ec] ss:$16 sps:$4 sm:$0xff]   ;;  %v9119_v14 = vld [vmem:[%s12524_s3 + $0x368] ss:$16 sps:$4 sm:$0xff]  }
 0x16f   :  { %v1259_v18 = vsel %vm542_vm3, %v1257_v10, %v1258_v16  ;;  %v873_v25 = vrot.slane %v871_v19, 1  ;;  %v1263_v26 = vsel %vm542_vm3, %v1258_v16, %v1262_v11  ;;  %v7941_v10 = vcombine.low %v824_v5, %v824_v5  ;;  %v9040_v19 = vld [vmem:[%s12524_s3 + $0x304] ss:$16 sps:$4 sm:$0xff]  }
 0x170   :  { %7983 = vmatprep.mubr.msk.bf16.mxu0 %vm785_vm5, %v1259_v18  ;;  %v862_v40 = vsel %vm160_vm2, %v857_v30, %v861_v24  ;;  %v877_v45 = vor.u32 %v875_v47, %v861_v24  ;;  %v9047_v24 = vld [vmem:[%s12524_s3 + $0x2e8] ss:$16 sps:$4 sm:$0xff]   ;;  %v9052_v18 = vld [vmem:[%s12524_s3 + $0x2c4] ss:$16 sps:$4 sm:$0xff]   ;;  %v9056_v30 = vld [vmem:[%s12524_s3 + $0x2a0] ss:$16 sps:$4 sm:$0xff]  }
 0x171   :  { %v1224_v31 = vld [vmem:[#allocation2 + $0x40] sm:$0xf]  ;;  %1400 = vmatmul.mubr.bf16.vlgmr.msra.gmra.mxu0 %v1256_v28  ;;  %v874_v34 = vsel %vm160_vm2, %v869_v17, %v873_v25  ;;  %v885_v37 = vor.u32 %v883_v20, %v873_v25  ;;  %v9046_v20 = vld [vmem:[%s12524_s3 + $0x2e4] ss:$16 sps:$4 sm:$0xff]   ;;  %v9055_v25 = vld [vmem:[%s12524_s3 + $0x2cc] ss:$16 sps:$4 sm:$0xff]  }
 0x172   :  { %v827_v33 = vld [vmem:[#allocation2 + $0x40] sm:$0x7]  ;;  %v1228_v36 = vpack.c.bf16 %v1224_v31, %v1224_v31  ;;  %7922 = vmatprep.mubr.msk.bf16.mxu1 %vm785_vm5, %v874_v34  ;;  %7984 = vmatprep.mubr.msk.bf16.mxu0 %vm785_vm5, %v1263_v26  ;;  %v9058_v28 = vld [vmem:[%s12524_s3 + $0x2a4] ss:$16 sps:$4 sm:$0xff]   ;;  %v9059_v31 = vld [vmem:[%s12524_s3 + $0x2a8] ss:$16 sps:$4 sm:$0xff]  }
 0x173   :  { %v831_v39 = vpack.c.bf16 %v827_v33, %v827_v33  ;;  %1034 = vmatmul.mubr.bf16.vlgmr.msra.gmra.mxu1 %v862_v40  ;;  %v890_v41 = vsel %vm160_vm2, %v885_v37, %v889_v27  ;;  %v800_v16 = vld [vmem:[#allocation2 + $0x40] sm:$0x3]  ;;  %v9053_v27 = vld [vmem:[%s12524_s3 + $0x2c8] ss:$16 sps:$4 sm:$0xff]   ;;  %v9064_v33 = vld [vmem:[%s12524_s3 + $0x284] ss:$16 sps:$4 sm:$0xff]  }
 0x174   :  { %1162 = vmatpush1.bf16.msra.mxu1 %v9012_v29  ;;  %v1260_v44 = vrot.slane %v1228_v36, 1  ;;  %7923 = vmatprep.mubr.msk.bf16.mxu1 %vm785_vm5, %v890_v41  ;;  %v806_v17 = vpack.c.bf16 %v800_v16, %v800_v16  ;;  %v9050_v26 = vld [vmem:[%s12524_s3 + $0x2c0] ss:$16 sps:$4 sm:$0xff]   ;;  %v9061_v29 = vld [vmem:[%s12524_s3 + $0x2ac] ss:$16 sps:$4 sm:$0xff]  }
 0x175   :  { %v879_v42 = vshll.u32 %v831_v39, 16  ;;  %1163 = vmatprep.subr.bf16.mxu1 %v9017_v35  ;;  %v891_v57 = vshrl.u32 %v831_v39, 16  ;;  %v9067_v34 = vld [vmem:[%s12524_s3 + $0x28c] ss:$16 sps:$4 sm:$0xff]   ;;  %v9062_v35 = vld [vmem:[%s12524_s3 + $0x280] ss:$16 sps:$4 sm:$0xff]  }
 0x176   :  { %v1261_v49 = vsel %vm542_vm3, %v1255_v13, %v1260_v44  ;;  %v802_v13 = vpack.c.bf16 %v10290_v22, %v792_v12  ;;  %v9043_v22 = vld [vmem:[%s12524_s3 + $0x30c] ss:$16 sps:$4 sm:$0xff]   ;;  %v9065_v36 = vld [vmem:[%s12524_s3 + $0x288] ss:$16 sps:$4 sm:$0xff]   ;;  %v9070_v37 = vld [vmem:[%s12524_s3 + $0x264] ss:$16 sps:$4 sm:$0xff]  }
 0x177   :  { %v881_v48 = vrot.slane %v879_v42, 1  ;;  %2299 = vmatprep.subr.bf16.mxu0 %v9043_v22  ;;  %v9073_v39 = vld [vmem:[%s12524_s3 + $0x26c] ss:$16 sps:$4 sm:$0xff]   ;;  %v9068_v40 = vld [vmem:[%s12524_s3 + $0x260] ss:$16 sps:$4 sm:$0xff]  }
 0x178   :  { %1164 = vmatpush1.bf16.msra.mxu1 %v9015_v43  ;;  %v9071_v41 = vld [vmem:[%s12524_s3 + $0x268] ss:$16 sps:$4 sm:$0xff]   ;;  %v9076_v42 = vld [vmem:[%s12524_s3 + $0x244] ss:$16 sps:$4 sm:$0xff]   ;;  %v9079_v43 = vld [vmem:[%s12524_s3 + $0x24c] ss:$16 sps:$4 sm:$0xff]  }
 0x179   :  { %1410 = vmatmul.mubr.bf16.gmra.mxu0 %v1261_v49  ;;  %1165 = vmatprep.subr.bf16.mxu1 %v9020_v32  ;;  %v882_v53 = vsel %vm160_vm2, %v877_v45, %v881_v48  ;;  %v893_v60 = vor.u32 %v891_v57, %v881_v48  ;;  %v9082_v32 = vld [vmem:[%s12524_s3 + $0x224] ss:$16 sps:$4 sm:$0xff]   ;;  %v9085_v47 = vld [vmem:[%s12524_s3 + $0x22c] ss:$16 sps:$4 sm:$0xff]   ;;  %v9080_v48 = vld [vmem:[%s12524_s3 + $0x220] ss:$16 sps:$4 sm:$0xff]  }
 0x17a   :  { %7985 = vmatprep.mubr.msk.bf16.mxu0 %vm785_vm5, %v1262_v11  ;;  %v1156_v11 = vsel %vm994_vm6, %v7941_v10, 0  ;;  %v9083_v49 = vld [vmem:[%s12524_s3 + $0x228] ss:$16 sps:$4 sm:$0xff]   ;;  %v9091_v45 = vld [vmem:[%s12524_s3 + $0x40c] ss:$16 sps:$4 sm:$0xff]  }
 0x17b   :  { %1044 = vmatmul.mubr.bf16.gmra.mxu1 %v882_v53  ;;  %v9094_v53 = vld [vmem:[%s12524_s3 + $0x3e4] ss:$16 sps:$4 sm:$0xff]   ;;  %v9095_v57 = vld [vmem:[%s12524_s3 + $0x3e8] ss:$16 sps:$4 sm:$0xff]   ;;  %v9121_v12 = vld [vmem:[%s12524_s3 + $0x36c] ss:$16 sps:$4 sm:$0xff]  }
 0x17c   :  { %1166 = vmatpush1.bf16.msra.mxu1 %v9018_v50  ;;  %7924 = vmatprep.mubr.msk.bf16.mxu1 %vm785_vm5, %v896_v51  ;;  %v9088_v50 = vld [vmem:[%s12524_s3 + $0x404] ss:$16 sps:$4 sm:$0xff]   ;;  %v9086_v51 = vld [vmem:[%s12524_s3 + $0x400] ss:$16 sps:$4 sm:$0xff]   ;;  %v9113_v10 = vld [vmem:[%s12524_s3 + $0x388] ss:$16 sps:$4 sm:$0xff]  }
 0x17d   :  { %1167 = vmatprep.subr.bf16.mxu1 %v9023_v52  ;;  %v9089_v52 = vld [vmem:[%s12524_s3 + $0x408] ss:$16 sps:$4 sm:$0xff]   ;;  %v9112_v5 = vld [vmem:[%s12524_s3 + $0x384] ss:$16 sps:$4 sm:$0xff]   ;;  %v9127_v16 = vld [vmem:[%s12524_s3 + $0x34c] ss:$16 sps:$4 sm:$0xff]  }
 0x17e   :  { %v9130_v22 = vld [vmem:[%s12524_s3 + $0x324] ss:$16 sps:$4 sm:$0xff]  }
 0x180   :  { %1168 = vmatpush1.bf16.msra.mxu1 %v9021_v54  ;;  %v9097_v54 = vld [vmem:[%s12524_s3 + $0x3ec] ss:$16 sps:$4 sm:$0xff]  }
 0x181   :  { %1420 = vmatmul.mubr.bf16.gmra.mxu0 %v1260_v44  ;;  %1169 = vmatprep.subr.bf16.mxu1 %v9026_v55  ;;  %v9074_v44 = vld [vmem:[%s12524_s3 + $0x240] ss:$16 sps:$4 sm:$0xff]   ;;  %v12525_v55 = vmov 0 }
 0x182   :  { %v12526_v55 = vsel %vm10514_vm9, 4294967295, %v12525_v55 }
 0x183   :  { %1054 = vmatmul.mubr.bf16.gmra.mxu1 %v893_v60  ;;  %12527 = vst [vmem:[#allocation11_spill] sm:$0xff] %v12526_v55  ;;  %v9098_v60 = vld [vmem:[%s12524_s3 + $0x3c0] ss:$16 sps:$4 sm:$0xff]  }
 0x184   :  { %1170 = vmatpush1.bf16.msra.mxu1 %v9024_v58  ;;  %7944 = vmatprep.mubr.msk.bf16.mxu1 %vm785_vm5, %v803_v59  ;;  %v9100_v58 = vld [vmem:[%s12524_s3 + $0x3c4] ss:$16 sps:$4 sm:$0xff]   ;;  %v9103_v59 = vld [vmem:[%s12524_s3 + $0x3cc] ss:$16 sps:$4 sm:$0xff]   ;;  %v9425_v55 = vld [vmem:[#allocation7 + $0x3c0] ss:$8 sps:$4 sm:$0xff]  }
 0x185   :  { %1171 = vmatprep.subr.bf16.mxu1 %v9029_v62  ;;  %v9101_v62 = vld [vmem:[%s12524_s3 + $0x3c8] ss:$16 sps:$4 sm:$0xff]  }
 0x188   :  { %1172 = vmatpush1.bf16.msra.mxu1 %v9027_v1  ;;  %v9106_v1 = vld [vmem:[%s12524_s3 + $0x3a4] ss:$16 sps:$4 sm:$0xff]  }
 0x189   :  { %1173 = vmatprep.subr.bf16.mxu1 %v9032_v38  ;;  %v9109_v38 = vld [vmem:[%s12524_s3 + $0x3ac] ss:$16 sps:$4 sm:$0xff]  }
 0x18c   :  { %1174 = vmatpush1.bf16.msra.mxu1 %v9030_v3  ;;  %v9104_v3 = vld [vmem:[%s12524_s3 + $0x3a0] ss:$16 sps:$4 sm:$0xff]  }
 0x18d   :  { %1175 = vmatprep.subr.bf16.mxu1 %v9035_v4  ;;  %v9107_v4 = vld [vmem:[%s12524_s3 + $0x3a8] ss:$16 sps:$4 sm:$0xff]  }
 0x190   :  { %1176 = vmatpush1.bf16.msra.mxu1 %v9033_v6  ;;  %v9115_v6 = vld [vmem:[%s12524_s3 + $0x38c] ss:$16 sps:$4 sm:$0xff]  }
 0x191   :  { %7943 = vmatprep.subr.msk.bf16.mxu1 %vm994_vm6, %v7942_v8  ;;  %v9110_v8 = vld [vmem:[%s12524_s3 + $0x380] ss:$16 sps:$4 sm:$0xff]  }
 0x194   :  { %1192 = vmatpush2.bf16.msra.mxu1 %v1156_v11  ;;  %v9118_v11 = vld [vmem:[%s12524_s3 + $0x364] ss:$16 sps:$4 sm:$0xff]  }
 0x195   :  { %2177 = vmatprep.subr.bf16.mxu1 %v9040_v19  ;;  %v9125_v19 = vld [vmem:[%s12524_s3 + $0x348] ss:$16 sps:$4 sm:$0xff]  }
 0x197   :  { %1194 = vmatmul.mubr.bf16.vlgmr.msra.gmra.mxu1 %v802_v13  ;;  %v9116_v13 = vld [vmem:[%s12524_s3 + $0x360] ss:$16 sps:$4 sm:$0xff]  }
 0x198   :  { %7945 = vmatprep.mubr.msk.bf16.mxu1 %vm785_vm5, %v10320_v9  ;;  %v9038_v9 = vld [vmem:[%s12524_s3 + $0x300] ss:$16 sps:$4 sm:$0xff]  }
 0x199   :  { %2178 = vmatpush1.bf16.msra.mxu1 %v9038_v9  ;;  %v9133_v9 = vld [vmem:[%s12524_s3 + $0x32c] ss:$16 sps:$4 sm:$0xff]  }
 0x19a   :  { %2179 = vmatprep.subr.bf16.mxu1 %v9046_v20  ;;  %v9131_v20 = vld [vmem:[%s12524_s3 + $0x328] ss:$16 sps:$4 sm:$0xff]  }
 0x19d   :  { %2180 = vmatpush1.bf16.msra.mxu1 %v9044_v23  ;;  %v9139_v23 = vld [vmem:[%s12524_s3 + $0x204] ss:$16 sps:$4 sm:$0xff]  }
 0x19e   :  { %2181 = vmatprep.subr.bf16.mxu1 %v9052_v18 }
 0x19f   :  { %1204 = vmatmul.mubr.bf16.gmra.mxu1 %v10317_v7  ;;  %v9041_v7 = vld [vmem:[%s12524_s3 + $0x308] ss:$16 sps:$4 sm:$0xff]  }
 0x1a0   :  { %7946 = vmatprep.mubr.msk.bf16.mxu1 %vm785_vm5, %v807_v15  ;;  %2300 = vmatpush1.bf16.msra.mxu0 %v9041_v7  ;;  %v9124_v15 = vld [vmem:[%s12524_s3 + $0x344] ss:$16 sps:$4 sm:$0xff]   ;;  %v9128_v7 = vld [vmem:[%s12524_s3 + $0x320] ss:$16 sps:$4 sm:$0xff]  }
 0x1a1   :  { %2301 = vmatprep.subr.bf16.mxu0 %v9049_v21  ;;  %2182 = vmatpush1.bf16.msra.mxu1 %v9050_v26  ;;  %v9136_v21 = vld [vmem:[%s12524_s3 + $0x424] ss:$16 sps:$4 sm:$0xff]  }
 0x1a2   :  { %2183 = vmatprep.subr.bf16.mxu1 %v9058_v28 }
 0x1a4   :  { %2302 = vmatpush1.bf16.msra.mxu0 %v9047_v24 }
 0x1a5   :  { %2303 = vmatprep.subr.bf16.mxu0 %v9055_v25  ;;  %2184 = vmatpush1.bf16.msra.mxu1 %v9056_v30 }
 0x1a6   :  { %2185 = vmatprep.subr.bf16.mxu1 %v9064_v33 }
 0x1a7   :  { %1214 = vmatmul.mubr.bf16.gmra.mxu1 %v806_v17  ;;  %v9122_v17 = vld [vmem:[%s12524_s3 + $0x340] ss:$16 sps:$4 sm:$0xff]  }
 0x1a8   :  { %2304 = vmatpush1.bf16.msra.mxu0 %v9053_v27 }
 0x1a9   :  { %2305 = vmatprep.subr.bf16.mxu0 %v9061_v29  ;;  %2186 = vmatpush1.bf16.msra.mxu1 %v9062_v35 }
 0x1aa   :  { %2187 = vmatprep.subr.bf16.mxu1 %v9070_v37 }
 0x1ac   :  { %2306 = vmatpush1.bf16.msra.mxu0 %v9059_v31 }
 0x1ad   :  { %2307 = vmatprep.subr.bf16.mxu0 %v9067_v34  ;;  %2188 = vmatpush1.bf16.msra.mxu1 %v9068_v40 }
 0x1ae   :  { %2189 = vmatprep.subr.bf16.mxu1 %v9076_v42 }
 0x1b0   :  { %2308 = vmatpush1.bf16.msra.mxu0 %v9065_v36 }
 0x1b1   :  { %2309 = vmatprep.subr.bf16.mxu0 %v9073_v39  ;;  %2190 = vmatpush1.bf16.msra.mxu1 %v9074_v44 }
 0x1b2   :  { %2191 = vmatprep.subr.bf16.mxu1 %v9082_v32 }
 0x1b4   :  { %2310 = vmatpush1.bf16.msra.mxu0 %v9071_v41 }
 0x1b5   :  { %2311 = vmatprep.subr.bf16.mxu0 %v9079_v43  ;;  %2192 = vmatpush1.bf16.msra.mxu1 %v9080_v48 }
 0x1b6   :  { %2193 = vmatprep.subr.bf16.mxu1 %v9088_v50 }
 0x1b8   :  { %2312 = vmatpush1.bf16.msra.mxu0 %v9077_v46 }
 0x1b9   :  { %2313 = vmatprep.subr.bf16.mxu0 %v9085_v47  ;;  %2194 = vmatpush2.bf16.msra.mxu1 %v9086_v51 }
 0x1ba   :  { %2195 = vmatprep.subr.bf16.mxu1 %v9094_v53  ;;  %v1460_v53 = vld [vmem:[%s12475_s14] sm:$0x3] }
 0x1bc   :  { %2314 = vmatpush1.bf16.msra.mxu0 %v9083_v49  ;;  %v10641_v49 = vshrl.u32 %v770_v61, 7 }
 0x1bd   :  { %2315 = vmatprep.subr.bf16.mxu0 %v9091_v45  ;;  %2196 = vmatpush2.bf16.msra.mxu1 %v9092_v56  ;;  %v1438_v45 = vld [vmem:[%s12529_s0] sm:$0x3] }
 0x1be   :  { %2197 = vmatprep.subr.bf16.mxu1 %v9100_v58  ;;  %v10644_v50 = vsub.s32 0, %v10641_v49  ;;  %v10650_v51 = vsub.s32 1, %v10641_v49 }
 0x1c0   :  { %2316 = vmatpush2.bf16.msra.mxu0 %v9089_v52  ;;  %12528 = vst [vmem:[#allocation12_spill] sm:$0xff] %v10644_v50  ;;  %12530 = vst [vmem:[#allocation13_spill] sm:$0xff] %v10650_v51  ;;  %v10656_v56 = vrot.slane %v1438_v45, %v10644_v50 }
 0x1c1   :  { %2317 = vmatprep.subr.bf16.mxu0 %v9097_v54  ;;  %2198 = vmatpush2.bf16.msra.mxu1 %v9098_v60 }
 0x1c2   :  { %2199 = vmatprep.subr.bf16.mxu1 %v9106_v1 }
 0x1c4   :  { %2318 = vmatpush2.bf16.msra.mxu0 %v9095_v57 }
 0x1c5   :  { %2319 = vmatprep.subr.bf16.mxu0 %v9103_v59  ;;  %2200 = vmatpush2.bf16.msra.mxu1 %v9104_v3  ;;  %v10659_v59 = vrot.slane %v1460_v53, %v10644_v50 }
 0x1c6   :  { %2201 = vmatprep.subr.bf16.mxu1 %v9112_v5 }
 0x1c8   :  { %2320 = vmatpush2.bf16.msra.mxu0 %v9101_v62  ;;  %v10662_v62 = vrot.slane %v1438_v45, %v10650_v51 }
 0x1c9   :  { %2321 = vmatprep.subr.bf16.mxu0 %v9109_v38  ;;  %2202 = vmatpush2.bf16.msra.mxu1 %v9110_v8 }
 0x1ca   :  { %2203 = vmatprep.subr.bf16.mxu1 %v9118_v11 }
 0x1cc   :  { %2322 = vmatpush2.bf16.msra.mxu0 %v9107_v4  ;;  %v10666_v4 = vrot.slane %v1460_v53, %v10650_v51 }
 0x1cd   :  { %2323 = vmatprep.subr.bf16.mxu0 %v9115_v6  ;;  %2204 = vmatpush2.bf16.msra.mxu1 %v9116_v13 }
 0x1ce   :  { %2205 = vmatprep.subr.bf16.mxu1 %v9124_v15 }
 0x1d0   :  { %2324 = vmatpush2.bf16.msra.mxu0 %v9113_v10 }
 0x1d1   :  { %2325 = vmatprep.subr.bf16.mxu0 %v9121_v12  ;;  %2206 = vmatpush2.bf16.msra.mxu1 %v9122_v17 }
 0x1d2   :  { %2207 = vmatprep.subr.bf16.mxu1 %v9130_v22 }
 0x1d4   :  { %2326 = vmatpush2.bf16.msra.mxu0 %v9119_v14 }
 0x1d5   :  { %2327 = vmatprep.subr.bf16.mxu0 %v9127_v16  ;;  %2208 = vmatpush2.bf16.msra.mxu1 %v9128_v7 }
 0x1d6   :  { %2252 = vmatprep.subr.bf16.mxu1 %v9136_v21 }
 0x1d8   :  { %2328 = vmatpush2.bf16.msra.mxu0 %v9125_v19 }
 0x1d9   :  { %2329 = vmatprep.subr.bf16.mxu0 %v9133_v9 }
 0x1dc   :  { %2330 = vmatpush2.bf16.msra.mxu0 %v9131_v20 }
 0x1dd   :  { %2844 = vmatprep.subr.bf16.mxu0 %v9139_v23 }
 0x231   :  { %v1401_v24 = vpop.f32.mrf.mxu0 }
 0x233   :  { %v1035_v18 = vpop.f32.mrf.mxu1  ;;  %v1403_v25 = vpop.f32.mrf.mxu0 }
 0x235   :  { %v1037_v26 = vpop.f32.mrf.mxu1  ;;  %v1405_v27 = vpop.f32.mrf.mxu0 }
 0x237   :  { %v1039_v28 = vpop.f32.mrf.mxu1  ;;  %v1407_v29 = vpop.f32.mrf.mxu0 }
 0x239   :  { %v1041_v30 = vpop.f32.mrf.mxu1  ;;  %v1411_v31 = vpop.f32.mrf.mxu0 }
 0x23b   :  { %v1045_v33 = vpop.f32.mrf.mxu1  ;;  %v1413_v34 = vpop.f32.mrf.mxu0 }
 0x23d   :  { %v1047_v35 = vpop.f32.mrf.mxu1  ;;  %v10628_v36 = vpop.f32.mrf.mxu0 }
 0x23f   :  { %v1049_v37 = vpop.f32.mrf.mxu1  ;;  %v10630_v39 = vpop.f32.mrf.mxu0 }
 0x241   :  { %v1051_v40 = vpop.f32.mrf.mxu1  ;;  %v10632_v41 = vpop.f32.mrf.mxu0 }
 0x243   :  { %v10634_v42 = vpop.f32.mrf.mxu1  ;;  %v10636_v43 = vpop.f32.mrf.mxu0 }
 0x245   :  { %v10638_v44 = vpop.f32.mrf.mxu1  ;;  %v1425_v46 = vpop.f32.mrf.mxu0 }
 0x247   :  { %v1059_v32 = vpop.f32.mrf.mxu1  ;;  %v1426_v47 = vpop.f32.mrf.mxu0 }
 0x249   :  { %v1060_v48 = vpop.f32.mrf.mxu1 }
 0x257   :  { %v1195_v52 = vpop.f32.mrf.mxu1 }
 0x258   :  { %v1196_v54 = vadd.f32 %v1195_v52, %v1035_v18 }
 0x259   :  { %v1197_v57 = vpop.f32.mrf.mxu1 }
 0x25a   :  { %v1428_v58 = vadd.f32 %v1401_v24, %v1196_v54  ;;  %v1198_v60 = vadd.f32 %v1197_v57, %v1037_v26 }
 0x25b   :  { %v1199_v1 = vpop.f32.mrf.mxu1 }
 0x25c   :  { %v1450_v38 = vmul.f32 %v10656_v56, %v1428_v58  ;;  %v1429_v3 = vadd.f32 %v1403_v25, %v1198_v60  ;;  %v1200_v5 = vadd.f32 %v1199_v1, %v1039_v28 }
 0x25d   :  { %v1201_v6 = vpop.f32.mrf.mxu1 }
 0x25e   :  { %v1472_v8 = vadd.f32 %v10659_v59, %v1450_v38  ;;  %v1451_v10 = vmul.f32 %v10662_v62, %v1429_v3  ;;  %v1430_v11 = vadd.f32 %v1405_v27, %v1200_v5  ;;  %v1202_v12 = vadd.f32 %v1201_v6, %v1041_v30 }
 0x25f   :  { %v1205_v13 = vpop.f32.mrf.mxu1 }
 0x260   :  { %v1482_v14 = vmul.f32 0.2, %v1472_v8  ;;  %v1473_v15 = vadd.f32 %v10666_v4, %v1451_v10  ;;  %v1452_v16 = vmul.f32 %v10656_v56, %v1430_v11  ;;  %v1431_v17 = vadd.f32 %v1407_v29, %v1202_v12 }
 0x261   :  { %v1206_v19 = vadd.f32 %v1205_v13, %v1045_v33  ;;  %v1207_v22 = vpop.f32.mrf.mxu1 }
 0x262   :  { %v1492_v9 = vmax.f32 %v1472_v8, %v1482_v14  ;;  %v1483_v7 = vmul.f32 0.2, %v1473_v15  ;;  %v1474_v20 = vadd.f32 %v10659_v59, %v1452_v16  ;;  %v1453_v21 = vmul.f32 %v10662_v62, %v1431_v17 }
 0x263   :  { %v1432_v23 = vadd.f32 %v1411_v31, %v1206_v19  ;;  %v1208_v24 = vadd.f32 %v1207_v22, %v1047_v35  ;;  %v1209_v18 = vpop.f32.mrf.mxu1 }
 0x264   :  { %1502 = vst [vmem:[%s12481_s20] sm:$0xff] %v1492_v9  ;;  %v1522_v25 = vrot.slane %v1492_v9, 7  ;;  %v1493_v26 = vmax.f32 %v1473_v15, %v1483_v7  ;;  %v1484_v27 = vmul.f32 0.2, %v1474_v20  ;;  %v1475_v28 = vadd.f32 %v10666_v4, %v1453_v21 }
 0x265   :  { %v1454_v29 = vmul.f32 %v10656_v56, %v1432_v23  ;;  %v1433_v30 = vadd.f32 %v1413_v34, %v1208_v24  ;;  %v1210_v33 = vadd.f32 %v1209_v18, %v1049_v37  ;;  %v1211_v46 = vpop.f32.mrf.mxu1 }
 0x266   :  { %1550 = vst [vmem:[#allocation3] sm:$0xfe] %v1522_v25  ;;  %1503 = vst [vmem:[%s12481_s20 + $0x8] sm:$0xff] %v1493_v26  ;;  %v1523_v31 = vrot.slane %v1493_v26, 7  ;;  %v1494_v35 = vmax.f32 %v1474_v20, %v1484_v27  ;;  %v1485_v32 = vmul.f32 0.2, %v1475_v28  ;;  %v1212_v47 = vadd.f32 %v1211_v46, %v1051_v40 }
 0x267   :  { %v1476_v48 = vadd.f32 %v10659_v59, %v1454_v29  ;;  %v1455_v45 = vmul.f32 %v10662_v62, %v1433_v30  ;;  %v1434_v52 = vadd.f32 %v10628_v36, %v1210_v33  ;;  %v1215_v53 = vpop.f32.mrf.mxu1 }
 0x268   :  { %1551 = vst [vmem:[#allocation3 + $0x8] sm:$0xfe] %v1523_v31  ;;  %1504 = vst [vmem:[%s12481_s20 + $0x10] sm:$0xff] %v1494_v35  ;;  %v1524_v34 = vrot.slane %v1494_v35, 7  ;;  %v1495_v37 = vmax.f32 %v1475_v28, %v1485_v32  ;;  %v1435_v54 = vadd.f32 %v10630_v39, %v1212_v47  ;;  %v1216_v57 = vadd.f32 %v1215_v53, %v10634_v42 }
 0x269   :  { %v1486_v58 = vmul.f32 0.2, %v1476_v48  ;;  %v1477_v40 = vadd.f32 %v10666_v4, %v1455_v45  ;;  %v1456_v60 = vmul.f32 %v10656_v56, %v1434_v52  ;;  %v1217_v1 = vpop.f32.mrf.mxu1 }
 0x26a   :  { %v10693_v36 = vsel %vm750_vm8, %v1522_v25, %v1524_v34  ;;  %1505 = vst [vmem:[%s12481_s20 + $0x18] sm:$0xff] %v1495_v37  ;;  %v1526_v38 = vrot.slane %v1495_v37, 7  ;;  %v1457_v3 = vmul.f32 %v10662_v62, %v1435_v54  ;;  %v1436_v39 = vadd.f32 %v10632_v41, %v1216_v57 }
 0x26b   :  { %v1496_v5 = vmax.f32 %v1476_v48, %v1486_v58  ;;  %v1487_v42 = vmul.f32 0.2, %v1477_v40  ;;  %v1478_v6 = vadd.f32 %v10659_v59, %v1456_v60  ;;  %v1218_v8 = vadd.f32 %v1217_v1, %v10638_v44  ;;  %v1219_v10 = vpop.f32.mrf.mxu1 }
 0x26c   :  { %v10703_v11 = vsel %vm750_vm8, %v1523_v31, %v1526_v38  ;;  %v1479_v12 = vadd.f32 %v10666_v4, %v1457_v3  ;;  %v1458_v13 = vmul.f32 %v10656_v56, %v1436_v39 }
 0x26d   :  { %1506 = vst [vmem:[%s12481_s20 + $0x20] sm:$0xff] %v1496_v5  ;;  %v1528_v14 = vrot.slane %v1496_v5, 7  ;;  %v1497_v41 = vmax.f32 %v1477_v40, %v1487_v42  ;;  %v1488_v15 = vmul.f32 0.2, %v1478_v6  ;;  %v1437_v16 = vadd.f32 %v10636_v43, %v1218_v8  ;;  %v1220_v17 = vpop.f32.mrf.mxu1  ;;  %v1672_v20 = vld [vmem:[#allocation3] sm:$0xfe] }
 0x26e   :  { %v1489_v19 = vmul.f32 0.2, %v1479_v12  ;;  %v1480_v44 = vadd.f32 %v10659_v59, %v1458_v13  ;;  %v1678_v26 = vpack.c.bf16 %v10693_v36, %v1672_v20  ;;  %v9134_v42 = vld [vmem:[%s12524_s3 + $0x420] ss:$16 sps:$4 sm:$0xff]   ;;  %v9142_v13 = vld [vmem:[%s12524_s3 + $0xec] ss:$16 sps:$4 sm:$0xff]  }
 0x26f   :  { %v1529_v22 = vsel %vm750_vm8, %v1524_v34, %v1528_v14  ;;  %1507 = vst [vmem:[%s12481_s20 + $0x28] sm:$0xff] %v1497_v41  ;;  %v1530_v56 = vrot.slane %v1497_v41, 7  ;;  %v1498_v9 = vmax.f32 %v1478_v6, %v1488_v15  ;;  %v1459_v7 = vmul.f32 %v10662_v62, %v1437_v16  ;;  %v1673_v24 = vld [vmem:[#allocation3 + $0x8] sm:$0xfe]  ;;  %v9137_v6 = vld [vmem:[%s12524_s3 + $0x200] ss:$16 sps:$4 sm:$0xff]  }
 0x270   :  { %1554 = vst [vmem:[#allocation3 + $0x30] sm:$0xff] %v1529_v22  ;;  %v1499_v21 = vmax.f32 %v1479_v12, %v1489_v19  ;;  %v1490_v23 = vmul.f32 0.2, %v1480_v44  ;;  %v1679_v28 = vpack.c.bf16 %v10703_v11, %v1673_v24  ;;  %v1756_v31 = vshll.u32 %v1678_v26, 16  ;;  %v10766_v19 = vld [vmem:[#allocation3 + $0x28] sm:$0xff] }
 0x271   :  { %v1531_v43 = vsel %vm750_vm8, %v1526_v38, %v1530_v56  ;;  %1508 = vst [vmem:[%s12481_s20 + $0x30] sm:$0xff] %v1498_v9  ;;  %v1532_v59 = vrot.slane %v1498_v9, 7  ;;  %v1481_v18 = vadd.f32 %v10666_v4, %v1459_v7  ;;  %v1754_v54 = vshrl.u32 %v1678_v26, 16 }
 0x272   :  { %1555 = vst [vmem:[#allocation3 + $0x38] sm:$0xff] %v1531_v43  ;;  %1509 = vst [vmem:[%s12481_s20 + $0x38] sm:$0xff] %v1499_v21  ;;  %v1534_v62 = vrot.slane %v1499_v21, 7  ;;  %v1500_v25 = vmax.f32 %v1480_v44, %v1490_v23  ;;  %v1768_v32 = vshll.u32 %v1679_v28, 16  ;;  %v1758_v52 = vrot.slane %v1756_v31, 1 }
 0x273   :  { %1565 = vst.msk [vmem:[#allocation3 + $0x31] ss:$8 sm:$0x7] %vm10514_vm9, %v12494_v2  ;;  %1568 = vst.msk [vmem:[#allocation3 + $0x32] ss:$8 sm:$0x7] %vm10514_vm9, %v12494_v2  ;;  %v1533_v27 = vsel %vm750_vm8, %v1528_v14, %v1532_v59 }
 0x274   :  { %v1491_v4 = vmul.f32 0.2, %v1481_v18  ;;  %1576 = vst.msk [vmem:[#allocation3 + $0x40] sm:$0xff] %vm1573_vm10, %v12494_v2  ;;  %v1535_v29 = vsel %vm750_vm8, %v1530_v56, %v1534_v62  ;;  %1510 = vst [vmem:[%s12481_s20 + $0x40] sm:$0x3] %v1500_v25  ;;  %v1536_v30 = vrot.slane %v1500_v25, 7  ;;  %v1759_v60 = vor.u32 %v1758_v52, %v1754_v54 }
 0x275   :  { %v1770_v34 = vrot.slane %v1768_v32, 1  ;;  %v1766_v57 = vshrl.u32 %v1679_v28, 16  ;;  %v9145_v14 = vld [vmem:[%s12524_s3 + $0x42c] ss:$16 sps:$4 sm:$0xff]   ;;  %v1674_v44 = vld [vmem:[#allocation3 + $0x10] sm:$0xfe] }
 0x276   :  { %v1501_v33 = vmax.f32 %v1481_v18, %v1491_v4  ;;  %v1537_v46 = vsel %vm750_vm8, %v1532_v59, %v1536_v30  ;;  %v1680_v24 = vpack.c.bf16 %v10766_v19, %v1674_v44  ;;  %v1591_v59 = vld [vmem:[#allocation3 + $0x58] sm:$0xff] }
 0x277   :  { %1558 = vst [vmem:[#allocation3 + $0x60] sm:$0x7] %v1537_v46  ;;  %v1771_v38 = vor.u32 %v1770_v34, %v1766_v57  ;;  %v9143_v52 = vld [vmem:[%s12524_s3 + $0x428] ss:$16 sps:$4 sm:$0xff]   ;;  %v9148_v57 = vld [vmem:[%s12524_s3 + $0xcc] ss:$16 sps:$4 sm:$0xff]  }
 0x278   :  { %1511 = vst [vmem:[%s12481_s20 + $0x48] sm:$0x3] %v1501_v33  ;;  %v1538_v35 = vrot.slane %v1501_v33, 7  ;;  %v1780_v26 = vshll.u32 %v1680_v24, 16  ;;  %v1778_v4 = vshrl.u32 %v1680_v24, 16 }
 0x279   :  { %v1677_v33 = vld [vmem:[#allocation3 + $0x70] sm:$0x7]  ;;  %v9166_v44 = vld [vmem:[%s12524_s3 + $0x2c] ss:$16 sps:$4 sm:$0xff]   ;;  %v9416_v2 = vld [vmem:[#allocation7 + $0x2d0] ss:$8 sps:$4 sm:$0xff]  }
 0x27a   :  { %v1539_v47 = vsel %vm750_vm8, %v1534_v62, %v1538_v35  ;;  %v1587_v48 = vld [vmem:[#allocation3 + $0x38] sm:$0xff]  ;;  %v1586_v45 = vld [vmem:[#allocation3 + $0x30] sm:$0xff]  ;;  %v1782_v28 = vrot.slane %v1780_v26, 1  ;;  %v1683_v32 = vpack.c.bf16 %v1677_v33, %v1677_v33 }
 0x27b   :  { %1559 = vst [vmem:[#allocation3 + $0x68] sm:$0x7] %v1539_v47  ;;  %v10745_v53 = vpack.c.bf16 %v1535_v29, %v1587_v48  ;;  %v10747_v37 = vpack.c.bf16 %v1533_v27, %v1586_v45  ;;  %v1588_v43 = vld [vmem:[#allocation3 + $0x40] sm:$0xff]  ;;  %v1582_v35 = vld [vmem:[#allocation3 + $0x10] sm:$0xff]  ;;  %v9140_v48 = vld [vmem:[%s12524_s3 + $0xe8] ss:$16 sps:$4 sm:$0xff]  }
 0x27c   :  { %v10772_v25 = vpack.c.bf16 %v1591_v59, %v1588_v43  ;;  %v1783_v46 = vor.u32 %v1782_v28, %v1778_v4  ;;  %v10778_v47 = vpack.c.bf16 %v10766_v19, %v1582_v35  ;;  %v1809_v54 = vshll.u32 %v1683_v32, 16  ;;  %v9178_v24 = vld [vmem:[%s12524_s3 + $0x1ec] ss:$16 sps:$4 sm:$0xff]   ;;  %v9173_v43 = vld [vmem:[%s12524_s3 + $0xa0] ss:$16 sps:$4 sm:$0xff]  }
 0x27d   :  { %v1773_v58 = vshll.u32 %v10745_v53, 16  ;;  %v1761_v40 = vshll.u32 %v10747_v37, 16  ;;  %v1797_v16 = vshrl.u32 %v10745_v53, 16  ;;  %v1789_v9 = vshrl.u32 %v10747_v37, 16  ;;  %v9176_v59 = vld [vmem:[%s12524_s3 + $0x1e8] ss:$16 sps:$4 sm:$0xff]  }
 0x27e   :  { %v1675_v1 = vld [vmem:[#allocation3 + $0x60] sm:$0x7]  ;;  %v1785_v29 = vshll.u32 %v10772_v25, 16  ;;  %v1805_v34 = vshrl.u32 %v10772_v25, 16  ;;  %v9187_v4 = vld [vmem:[%s12524_s3 + $0x64] ss:$16 sps:$4 sm:$0xff]  }
 0x27f   :  { %v1775_v3 = vrot.slane %v1773_v58, 1  ;;  %v1763_v39 = vrot.slane %v1761_v40, 1  ;;  %v1681_v5 = vpack.c.bf16 %v1675_v1, %v1675_v1  ;;  %v9163_v58 = vld [vmem:[%s12524_s3 + $0xe4] ss:$16 sps:$4 sm:$0xff]   ;;  %v9146_v40 = vld [vmem:[%s12524_s3 + $0xc8] ss:$16 sps:$4 sm:$0xff]  }
 0x280   :  { %v1787_v31 = vrot.slane %v1785_v29, 1  ;;  %v1811_v1 = vrot.slane %v1809_v54, 1  ;;  %v9179_v26 = vld [vmem:[%s12524_s3 + $0x80] ss:$16 sps:$4 sm:$0xff]   ;;  %v9190_v28 = vld [vmem:[%s12524_s3 + $0x1ac] ss:$16 sps:$4 sm:$0xff]  }
 0x281   :  { %v1776_v8 = vsel %vm160_vm2, %v1771_v38, %v1775_v3  ;;  %v1764_v10 = vsel %vm160_vm2, %v1759_v60, %v1763_v39  ;;  %v1793_v15 = vshll.u32 %v1681_v5, 16  ;;  %v1799_v22 = vor.u32 %v1797_v16, %v1775_v3  ;;  %v9151_v38 = vld [vmem:[%s12524_s3 + $0xac] ss:$16 sps:$4 sm:$0xff]   ;;  %v9149_v3 = vld [vmem:[%s12524_s3 + $0xa8] ss:$16 sps:$4 sm:$0xff]  }
 0x282   :  { %v1676_v12 = vld [vmem:[#allocation3 + $0x68] sm:$0x7]  ;;  %2209 = vmatprep.mubr.bf16.mxu1 %v1776_v8  ;;  %2331 = vmatprep.mubr.bf16.mxu0 %v1776_v8  ;;  %v1791_v21 = vor.u32 %v1789_v9, %v1763_v39  ;;  %v1813_v27 = vshrl.u32 %v1681_v5, 16  ;;  %v1788_v45 = vsel %vm160_vm2, %v1783_v46, %v1787_v31  ;;  %v1807_v60 = vor.u32 %v1805_v34, %v1787_v31  ;;  %v9154_v5 = vld [vmem:[%s12524_s3 + $0x8c] ss:$16 sps:$4 sm:$0xff]  }
 0x283   :  { %v1682_v41 = vpack.c.bf16 %v1676_v12, %v1676_v12  ;;  %2210 = vmatmul.mubr.bf16.vlgmr.msra.gmra.mxu1 %v1764_v10  ;;  %2332 = vmatmul.mubr.bf16.vlgmr.msra.gmra.mxu0 %v1764_v10  ;;  %v1795_v7 = vrot.slane %v1793_v15, 1  ;;  %v1594_v8 = vld [vmem:[#allocation3 + $0x70] sm:$0x3]  ;;  %v9157_v10 = vld [vmem:[%s12524_s3 + $0x6c] ss:$16 sps:$4 sm:$0xff]  }
 0x284   :  { %2253 = vmatpush1.bf16.msra.mxu1 %v9134_v42  ;;  %2845 = vmatpush1.bf16.msra.mxu0 %v9137_v6  ;;  %v1812_v39 = vsel %vm160_vm2, %v1807_v60, %v1811_v1  ;;  %v1819_v42 = vshrl.u32 %v1683_v32, 16  ;;  %v9152_v6 = vld [vmem:[%s12524_s3 + $0x88] ss:$16 sps:$4 sm:$0xff]   ;;  %v9160_v15 = vld [vmem:[%s12524_s3 + $0x4c] ss:$16 sps:$4 sm:$0xff]  }
 0x285   :  { %v1801_v17 = vshll.u32 %v1682_v41, 16  ;;  %2891 = vmatprep.subr.bf16.mxu0 %v9142_v13  ;;  %2374 = vmatprep.subr.bf16.mxu1 %v9145_v14  ;;  %v1816_v23 = vshrl.u32 %v1682_v41, 16  ;;  %v1796_v18 = vsel %vm160_vm2, %v1791_v21, %v1795_v7  ;;  %v1815_v30 = vor.u32 %v1813_v27, %v1795_v7  ;;  %v1581_v14 = vld [vmem:[#allocation3 + $0x8] sm:$0xff]  ;;  %v9169_v9 = vld [vmem:[%s12524_s3 + $0xc4] ss:$16 sps:$4 sm:$0xff]  }
 0x286   :  { %v1821_v12 = vor.u32 %v1819_v42, %v1811_v1  ;;  %v10823_v13 = vpack.c.bf16 %v1594_v8, %v1594_v8  ;;  %v9155_v41 = vld [vmem:[%s12524_s3 + $0x68] ss:$16 sps:$4 sm:$0xff]   ;;  %v1596_v16 = vpack.c.bf16 %v10703_v11, %v1581_v14  ;;  %v9172_v7 = vld [vmem:[%s12524_s3 + $0xc] ss:$16 sps:$4 sm:$0xff]   ;;  %v9185_v29 = vld [vmem:[%s12524_s3 + $0x60] ss:$16 sps:$4 sm:$0xff]  }
 0x287   :  { %v1803_v56 = vrot.slane %v1801_v17, 1  ;;  %v9158_v17 = vld [vmem:[%s12524_s3 + $0x48] ss:$16 sps:$4 sm:$0xff]   ;;  %v9193_v33 = vld [vmem:[%s12524_s3 + $0x44] ss:$16 sps:$4 sm:$0xff]  }
 0x288   :  { %v9170_v21 = vld [vmem:[%s12524_s3 + $0x8] ss:$16 sps:$4 sm:$0xff]   ;;  %v9196_v46 = vld [vmem:[%s12524_s3 + $0x18c] ss:$16 sps:$4 sm:$0xff]   ;;  %v9191_v31 = vld [vmem:[%s12524_s3 + $0x40] ss:$16 sps:$4 sm:$0xff]  }
 0x289   :  { %v1804_v20 = vsel %vm160_vm2, %v1799_v22, %v1803_v56  ;;  %v1818_v62 = vor.u32 %v1816_v23, %v1803_v56  ;;  %v9161_v22 = vld [vmem:[%s12524_s3 + $0xe0] ss:$16 sps:$4 sm:$0xff]   ;;  %v9164_v56 = vld [vmem:[%s12524_s3 + $0x28] ss:$16 sps:$4 sm:$0xff]   ;;  %v9175_v23 = vld [vmem:[%s12524_s3 + $0xa4] ss:$16 sps:$4 sm:$0xff]  }
 0x28a   :  { %2219 = vmatprep.mubr.bf16.mxu1 %v1804_v20  ;;  %2341 = vmatprep.mubr.bf16.mxu0 %v1804_v20  ;;  %v9167_v20 = vld [vmem:[%s12524_s3 + $0xc0] ss:$16 sps:$4 sm:$0xff]   ;;  %v9182_v27 = vld [vmem:[%s12524_s3 + $0x1c8] ss:$16 sps:$4 sm:$0xff]   ;;  %v9199_v32 = vld [vmem:[%s12524_s3 + $0x24] ss:$16 sps:$4 sm:$0xff]  }
 0x28b   :  { %2220 = vmatmul.mubr.bf16.gmra.mxu1 %v1796_v18  ;;  %2342 = vmatmul.mubr.bf16.gmra.mxu0 %v1796_v18  ;;  %v9181_v18 = vld [vmem:[%s12524_s3 + $0x84] ss:$16 sps:$4 sm:$0xff]   ;;  %v9194_v35 = vld [vmem:[%s12524_s3 + $0x188] ss:$16 sps:$4 sm:$0xff]   ;;  %v9208_v54 = vld [vmem:[%s12524_s3 + $0x14c] ss:$16 sps:$4 sm:$0xff]  }
 0x28c   :  { %2229 = vmatprep.mubr.bf16.mxu1 %v1818_v62  ;;  %2351 = vmatprep.mubr.bf16.mxu0 %v1818_v62  ;;  %v9184_v62 = vld [vmem:[%s12524_s3 + $0x1cc] ss:$16 sps:$4 sm:$0xff]   ;;  %v9205_v34 = vld [vmem:[%s12524_s3 + $0x4] ss:$16 sps:$4 sm:$0xff]   ;;  %v9209_v1 = vld [vmem:[%s12524_s3 + $0x1e0] ss:$16 sps:$4 sm:$0xff]  }
 0x28d   :  { %v9214_v60 = vld [vmem:[%s12524_s3 + $0x12c] ss:$16 sps:$4 sm:$0xff]   ;;  %v9218_v42 = vld [vmem:[%s12524_s3 + $0x108] ss:$16 sps:$4 sm:$0xff]   ;;  %v9238_v8 = vld [vmem:[%s12524_s3 + $0x644] ss:$16 sps:$4 sm:$0xff]  }
 0x293   :  { %2230 = vmatmul.mubr.bf16.gmra.mxu1 %v1815_v30  ;;  %2352 = vmatmul.mubr.bf16.gmra.mxu0 %v1815_v30  ;;  %v9188_v30 = vld [vmem:[%s12524_s3 + $0x1a8] ss:$16 sps:$4 sm:$0xff]  }
 0x294   :  { %2270 = vmatprep.mubr.bf16.mxu1 %v12492_v0  ;;  %2862 = vmatprep.mubr.bf16.mxu0 %v12492_v0 }
 0x29b   :  { %8122 = vmatmul.mubr.msk.bf16.vlgmr.msra.gmra.mxu1 %vm1573_vm10, %v1788_v45  ;;  %8196 = vmatmul.mubr.msk.bf16.vlgmr.msra.gmra.mxu0 %vm1573_vm10, %v10778_v47 }
 0x29c   :  { %2892 = vmatpush1.bf16.msra.mxu0 %v9140_v48  ;;  %2375 = vmatpush1.bf16.msra.mxu1 %v9143_v52  ;;  %v9202_v48 = vld [vmem:[%s12524_s3 + $0x16c] ss:$16 sps:$4 sm:$0xff]   ;;  %v9200_v52 = vld [vmem:[%s12524_s3 + $0x168] ss:$16 sps:$4 sm:$0xff]  }
 0x29d   :  { %2893 = vmatprep.subr.bf16.mxu0 %v9148_v57  ;;  %2280 = vmatprep.mubr.bf16.mxu1 %v12492_v0  ;;  %v9203_v57 = vld [vmem:[%s12524_s3] ss:$16 sps:$4 sm:$0xff]  }
 0x29e   :  { %2872 = vmatprep.mubr.bf16.mxu0 %v12492_v0  ;;  %2769 = vmatprep.subr.bf16.mxu1 %v9163_v58  ;;  %v9206_v58 = vld [vmem:[%s12524_s3 + $0x148] ss:$16 sps:$4 sm:$0xff]  }
 0x2a0   :  { %2894 = vmatpush1.bf16.msra.mxu0 %v9146_v40  ;;  %v9211_v40 = vld [vmem:[%s12524_s3 + $0x1e4] ss:$16 sps:$4 sm:$0xff]  }
 0x2a1   :  { %2895 = vmatprep.subr.bf16.mxu0 %v9151_v38  ;;  %v9212_v38 = vld [vmem:[%s12524_s3 + $0x128] ss:$16 sps:$4 sm:$0xff]  }
 0x2a3   :  { %8123 = vmatmul.mubr.msk.bf16.gmra.mxu1 %vm1573_vm10, %v1812_v39  ;;  %8197 = vmatmul.mubr.msk.bf16.gmra.mxu0 %vm1573_vm10, %v10772_v25 }
 0x2a4   :  { %2896 = vmatpush1.bf16.msra.mxu0 %v9149_v3  ;;  %2290 = vmatprep.mubr.bf16.mxu1 %v12492_v0  ;;  %v9217_v3 = vld [vmem:[%s12524_s3 + $0x1c4] ss:$16 sps:$4 sm:$0xff]  }
 0x2a5   :  { %2897 = vmatprep.subr.bf16.mxu0 %v9154_v5  ;;  %2882 = vmatprep.mubr.bf16.mxu0 %v12492_v0  ;;  %v9215_v5 = vld [vmem:[%s12524_s3 + $0x1c0] ss:$16 sps:$4 sm:$0xff]  }
 0x2a8   :  { %2898 = vmatpush1.bf16.msra.mxu0 %v9152_v6  ;;  %v9223_v6 = vld [vmem:[%s12524_s3 + $0x1a4] ss:$16 sps:$4 sm:$0xff]  }
 0x2a9   :  { %2899 = vmatprep.subr.bf16.mxu0 %v9157_v10  ;;  %v1580_v10 = vld [vmem:[#allocation3] sm:$0xff] }
 0x2aa   :  { %v1595_v14 = vpack.c.bf16 %v10693_v36, %v1580_v10  ;;  %v9271_v10 = vld [vmem:[%s12524_s3 + $0x504] ss:$16 sps:$4 sm:$0xff]  }
 0x2ab   :  { %8124 = vmatmul.mubr.msk.bf16.gmra.mxu1 %vm1573_vm10, %v1821_v12  ;;  %8198 = vmatmul.mubr.msk.bf16.gmra.mxu0 %vm1573_vm10, %v10823_v13 }
 0x2ac   :  { %2900 = vmatpush1.bf16.msra.mxu0 %v9155_v41  ;;  %2923 = vmatprep.mubr.bf16.mxu0 %v1596_v16  ;;  %v9226_v41 = vld [vmem:[%s12524_s3 + $0x184] ss:$16 sps:$4 sm:$0xff]  }
 0x2ad   :  { %2901 = vmatprep.subr.bf16.mxu0 %v9160_v15  ;;  %2392 = vmatprep.mubr.bf16.mxu1 %v12492_v0  ;;  %v9236_v15 = vld [vmem:[%s12524_s3 + $0x640] ss:$16 sps:$4 sm:$0xff]  }
 0x2b0   :  { %2902 = vmatpush1.bf16.msra.mxu0 %v9158_v17  ;;  %v9224_v17 = vld [vmem:[%s12524_s3 + $0x180] ss:$16 sps:$4 sm:$0xff]  }
 0x2b1   :  { %2903 = vmatprep.subr.bf16.mxu0 %v9166_v44  ;;  %v9229_v44 = vld [vmem:[%s12524_s3 + $0x164] ss:$16 sps:$4 sm:$0xff]  }
 0x2b3   :  { %8125 = vmatmul.mubr.msk.bf16.vlgmr.msra.gmra.mxu1 %vm1573_vm10, %v1788_v45  ;;  %v9197_v45 = vld [vmem:[%s12524_s3 + $0x20] ss:$16 sps:$4 sm:$0xff]  }
 0x2b4   :  { %2770 = vmatpush1.bf16.msra.mxu1 %v9161_v22  ;;  %2904 = vmatpush1.bf16.msra.mxu0 %v9164_v56  ;;  %v1593_v22 = vld [vmem:[#allocation3 + $0x68] sm:$0x3]  ;;  %v9227_v56 = vld [vmem:[%s12524_s3 + $0x160] ss:$16 sps:$4 sm:$0xff]  }
 0x2b5   :  { %2771 = vmatprep.subr.bf16.mxu1 %v9169_v9  ;;  %2905 = vmatprep.subr.bf16.mxu0 %v9172_v7  ;;  %v9232_v9 = vld [vmem:[%s12524_s3 + $0x144] ss:$16 sps:$4 sm:$0xff]   ;;  %v1602_v7 = vpack.c.bf16 %v1593_v22, %v1593_v22  ;;  %v9286_v22 = vld [vmem:[%s12524_s3 + $0x60c] ss:$16 sps:$4 sm:$0xff]  }
 0x2b6   :  { %2402 = vmatprep.mubr.bf16.mxu1 %v12492_v0 }
 0x2b8   :  { %2772 = vmatpush1.bf16.msra.mxu1 %v9167_v20  ;;  %2906 = vmatpush1.bf16.msra.mxu0 %v9170_v21  ;;  %v9230_v20 = vld [vmem:[%s12524_s3 + $0x140] ss:$16 sps:$4 sm:$0xff]   ;;  %v9235_v21 = vld [vmem:[%s12524_s3 + $0x124] ss:$16 sps:$4 sm:$0xff]  }
 0x2b9   :  { %2773 = vmatprep.subr.bf16.mxu1 %v9175_v23  ;;  %2907 = vmatprep.subr.bf16.mxu0 %v9178_v24  ;;  %v3015_v23 = vld [vmem:[#allocation3 + $0x10] sm:$0xfc]  ;;  %v1592_v24 = vld [vmem:[#allocation3 + $0x60] sm:$0x3] }
 0x2bb   :  { %8126 = vmatmul.mubr.msk.bf16.gmra.mxu1 %vm1573_vm10, %v1812_v39  ;;  %v9220_v39 = vld [vmem:[%s12524_s3 + $0x10c] ss:$16 sps:$4 sm:$0xff]  }
 0x2bc   :  { %2774 = vmatpush1.bf16.msra.mxu1 %v9173_v43  ;;  %2908 = vmatpush2.bf16.msra.mxu0 %v9176_v59  ;;  %v9233_v43 = vld [vmem:[%s12524_s3 + $0x120] ss:$16 sps:$4 sm:$0xff]   ;;  %v3021_v59 = vpack.c.bf16 %v10766_v19, %v3015_v23  ;;  %v9247_v19 = vld [vmem:[%s12524_s3 + $0x20c] ss:$16 sps:$4 sm:$0xff]   ;;  %v9295_v23 = vld [vmem:[%s12524_s3 + $0x484] ss:$16 sps:$4 sm:$0xff]  }
 0x2bd   :  { %2775 = vmatprep.subr.bf16.mxu1 %v9181_v18  ;;  %2909 = vmatprep.subr.bf16.mxu0 %v9184_v62  ;;  %v1601_v18 = vpack.c.bf16 %v1592_v24, %v1592_v24  ;;  %v9241_v62 = vld [vmem:[%s12524_s3 + $0x104] ss:$16 sps:$4 sm:$0xff]   ;;  %v9298_v24 = vld [vmem:[%s12524_s3 + $0x5cc] ss:$16 sps:$4 sm:$0xff]  }
 0x2be   :  { %2412 = vmatprep.mubr.bf16.mxu1 %v12492_v0 }
 0x2c0   :  { %2776 = vmatpush1.bf16.msra.mxu1 %v9179_v26  ;;  %2910 = vmatpush2.bf16.msra.mxu0 %v9182_v27  ;;  %v9239_v26 = vld [vmem:[%s12524_s3 + $0x100] ss:$16 sps:$4 sm:$0xff]   ;;  %v3109_v27 = vrot.slane %v3021_v59, 1  ;;  %v9296_v59 = vld [vmem:[%s12524_s3 + $0x5c8] ss:$16 sps:$4 sm:$0xff]  }
 0x2c1   :  { %2777 = vmatprep.subr.bf16.mxu1 %v9187_v4  ;;  %2911 = vmatprep.subr.bf16.mxu0 %v9190_v28  ;;  %v3110_v4 = vrot.slane %v10772_v25, 1  ;;  %v3018_v28 = vld [vmem:[#allocation3 + $0x70] sm:$0xf] }
 0x2c3   :  { %8127 = vmatmul.mubr.msk.bf16.gmra.mxu1 %vm1573_vm10, %v1821_v12  ;;  %v9221_v12 = vld [vmem:[%s12524_s3 + $0x1a0] ss:$16 sps:$4 sm:$0xff]  }
 0x2c4   :  { %2778 = vmatpush1.bf16.msra.mxu1 %v9185_v29  ;;  %2912 = vmatpush2.bf16.msra.mxu0 %v9188_v30  ;;  %v9242_v29 = vld [vmem:[%s12524_s3 + $0x528] ss:$16 sps:$4 sm:$0xff]   ;;  %v11019_v30 = vsel %vm542_vm3, %v3109_v27, %v3110_v4  ;;  %v9307_v27 = vld [vmem:[%s12524_s3 + $0x444] ss:$16 sps:$4 sm:$0xff]  }
 0x2c5   :  { %2801 = vmatprep.mubr.bf16.mxu1 %v1596_v16  ;;  %2779 = vmatprep.subr.bf16.mxu1 %v9193_v33  ;;  %v9244_v16 = vld [vmem:[%s12524_s3 + $0x52c] ss:$16 sps:$4 sm:$0xff]   ;;  %v3024_v33 = vpack.c.bf16 %v3018_v28, %v3018_v28  ;;  %v9308_v28 = vld [vmem:[%s12524_s3 + $0x588] ss:$16 sps:$4 sm:$0xff]  }
 0x2c6   :  { %2913 = vmatprep.subr.bf16.mxu0 %v9196_v46  ;;  %v9245_v46 = vld [vmem:[%s12524_s3 + $0x208] ss:$16 sps:$4 sm:$0xff]  }
 0x2c8   :  { %2780 = vmatpush1.bf16.msra.mxu1 %v9191_v31  ;;  %2914 = vmatpush2.bf16.msra.mxu0 %v9194_v35  ;;  %v9250_v31 = vld [vmem:[%s12524_s3 + $0x50c] ss:$16 sps:$4 sm:$0xff]   ;;  %v9265_v35 = vld [vmem:[%s12524_s3 + $0x524] ss:$16 sps:$4 sm:$0xff]  }
 0x2c9   :  { %2781 = vmatprep.subr.bf16.mxu1 %v9199_v32  ;;  %2915 = vmatprep.subr.bf16.mxu0 %v9202_v48  ;;  %v9248_v32 = vld [vmem:[%s12524_s3 + $0x508] ss:$16 sps:$4 sm:$0xff]   ;;  %v11036_v48 = vrot.slane %v3024_v33, 1  ;;  %v9316_v33 = vld [vmem:[%s12524_s3 + $0x56c] ss:$16 sps:$4 sm:$0xff]  }
 0x2cc   :  { %2782 = vmatpush1.bf16.msra.mxu1 %v9197_v45  ;;  %2916 = vmatpush2.bf16.msra.mxu0 %v9200_v52  ;;  %v9253_v45 = vld [vmem:[%s12524_s3 + $0x4ec] ss:$16 sps:$4 sm:$0xff]   ;;  %v9251_v52 = vld [vmem:[%s12524_s3 + $0x4e8] ss:$16 sps:$4 sm:$0xff]  }
 0x2cd   :  { %2783 = vmatprep.subr.bf16.mxu1 %v9205_v34  ;;  %2917 = vmatprep.subr.bf16.mxu0 %v9208_v54  ;;  %v11047_v34 = vsel %vm542_vm3, %v3110_v4, %v11036_v48  ;;  %v9256_v54 = vld [vmem:[%s12524_s3 + $0x4cc] ss:$16 sps:$4 sm:$0xff]  }
 0x2ce   :  { %v9310_v4 = vld [vmem:[%s12524_s3 + $0x58c] ss:$16 sps:$4 sm:$0xff]  }
 0x2d0   :  { %2784 = vmatpush1.bf16.msra.mxu1 %v9203_v57  ;;  %2918 = vmatpush2.bf16.msra.mxu0 %v9206_v58  ;;  %v3014_v57 = vld [vmem:[#allocation3 + $0x8] sm:$0xfc] }
 0x2d1   :  { %2785 = vmatprep.subr.bf16.mxu1 %v9211_v40  ;;  %2919 = vmatprep.subr.bf16.mxu0 %v9214_v60  ;;  %v9254_v58 = vld [vmem:[%s12524_s3 + $0x4c8] ss:$16 sps:$4 sm:$0xff]   ;;  %v9259_v40 = vld [vmem:[%s12524_s3 + $0x4ac] ss:$16 sps:$4 sm:$0xff]   ;;  %v3020_v60 = vpack.c.bf16 %v10703_v11, %v3014_v57  ;;  %v9317_v57 = vld [vmem:[%s12524_s3 + $0x600] ss:$16 sps:$4 sm:$0xff]  }
 0x2d4   :  { %2786 = vmatpush2.bf16.msra.mxu1 %v9209_v1  ;;  %2920 = vmatpush2.bf16.msra.mxu0 %v9212_v38  ;;  %v3107_v1 = vrot.slane %v10745_v53, 1  ;;  %v9257_v38 = vld [vmem:[%s12524_s3 + $0x4a8] ss:$16 sps:$4 sm:$0xff]  }
 0x2d5   :  { %2787 = vmatprep.subr.bf16.mxu1 %v9217_v3  ;;  %2921 = vmatprep.subr.bf16.mxu0 %v9220_v39  ;;  %v3106_v3 = vrot.slane %v3020_v60, 1  ;;  %v9262_v39 = vld [vmem:[%s12524_s3 + $0x48c] ss:$16 sps:$4 sm:$0xff]   ;;  %v9325_v60 = vld [vmem:[%s12524_s3 + $0x5e4] ss:$16 sps:$4 sm:$0xff]  }
 0x2d7   :  { %v3108_v11 = vsel %vm542_vm3, %v3106_v3, %v3107_v1 }
 0x2d8   :  { %2788 = vmatpush2.bf16.msra.mxu1 %v9215_v5  ;;  %2922 = vmatpush2.bf16.msra.mxu0 %v9218_v42  ;;  %v9260_v5 = vld [vmem:[%s12524_s3 + $0x488] ss:$16 sps:$4 sm:$0xff]   ;;  %v9268_v42 = vld [vmem:[%s12524_s3 + $0x46c] ss:$16 sps:$4 sm:$0xff]  }
 0x2d9   :  { %2789 = vmatprep.subr.bf16.mxu1 %v9223_v6  ;;  %3548 = vmatprep.subr.bf16.mxu0 %v9238_v8  ;;  %v9263_v6 = vld [vmem:[%s12524_s3 + $0x520] ss:$16 sps:$4 sm:$0xff]   ;;  %v9266_v8 = vld [vmem:[%s12524_s3 + $0x468] ss:$16 sps:$4 sm:$0xff]  }
 0x2db   :  { %2924 = vmatmul.mubr.bf16.vlgmr.msra.gmra.mxu0 %v1595_v14 }
 0x2dc   :  { %2790 = vmatpush2.bf16.msra.mxu1 %v9221_v12  ;;  %2933 = vmatprep.mubr.bf16.mxu0 %v10745_v53  ;;  %v9274_v12 = vld [vmem:[%s12524_s3 + $0x44c] ss:$16 sps:$4 sm:$0xff]  }
 0x2dd   :  { %2791 = vmatprep.subr.bf16.mxu1 %v9226_v41  ;;  %3549 = vmatpush1.bf16.msra.mxu0 %v9236_v15  ;;  %v9272_v41 = vld [vmem:[%s12524_s3 + $0x448] ss:$16 sps:$4 sm:$0xff]   ;;  %v9277_v15 = vld [vmem:[%s12524_s3 + $0x4e4] ss:$16 sps:$4 sm:$0xff]  }
 0x2de   :  { %3595 = vmatprep.subr.bf16.mxu0 %v9244_v16  ;;  %v9275_v16 = vld [vmem:[%s12524_s3 + $0x4e0] ss:$16 sps:$4 sm:$0xff]  }
 0x2e0   :  { %2792 = vmatpush2.bf16.msra.mxu1 %v9224_v17  ;;  %v9278_v17 = vld [vmem:[%s12524_s3 + $0x628] ss:$16 sps:$4 sm:$0xff]  }
 0x2e1   :  { %2793 = vmatprep.subr.bf16.mxu1 %v9229_v44  ;;  %v9283_v44 = vld [vmem:[%s12524_s3 + $0x4c4] ss:$16 sps:$4 sm:$0xff]  }
 0x2e3   :  { %2934 = vmatmul.mubr.bf16.gmra.mxu0 %v10747_v37 }
 0x2e4   :  { %2794 = vmatpush2.bf16.msra.mxu1 %v9227_v56  ;;  %2943 = vmatprep.mubr.bf16.mxu0 %v1602_v7  ;;  %v9281_v56 = vld [vmem:[%s12524_s3 + $0x4c0] ss:$16 sps:$4 sm:$0xff]  }
 0x2e5   :  { %2795 = vmatprep.subr.bf16.mxu1 %v9232_v9  ;;  %v9284_v9 = vld [vmem:[%s12524_s3 + $0x608] ss:$16 sps:$4 sm:$0xff]  }
 0x2e8   :  { %2796 = vmatpush2.bf16.msra.mxu1 %v9230_v20  ;;  %v9287_v20 = vld [vmem:[%s12524_s3 + $0x4a0] ss:$16 sps:$4 sm:$0xff]  }
 0x2e9   :  { %2797 = vmatprep.subr.bf16.mxu1 %v9235_v21  ;;  %v9290_v21 = vld [vmem:[%s12524_s3 + $0x5e8] ss:$16 sps:$4 sm:$0xff]  }
 0x2eb   :  { %2944 = vmatmul.mubr.bf16.gmra.mxu0 %v1601_v18 }
 0x2ec   :  { %2798 = vmatpush2.bf16.msra.mxu1 %v9233_v43  ;;  %3566 = vmatprep.mubr.bf16.mxu0 %v12492_v0  ;;  %v9293_v43 = vld [vmem:[%s12524_s3 + $0x480] ss:$16 sps:$4 sm:$0xff]  }
 0x2ed   :  { %2799 = vmatprep.subr.bf16.mxu1 %v9241_v62  ;;  %v9299_v62 = vld [vmem:[%s12524_s3 + $0x460] ss:$16 sps:$4 sm:$0xff]  }
 0x2f0   :  { %2800 = vmatpush2.bf16.msra.mxu1 %v9239_v26  ;;  %v9302_v26 = vld [vmem:[%s12524_s3 + $0x5a8] ss:$16 sps:$4 sm:$0xff]  }
 0x2f1   :  { %2966 = vmatprep.subr.bf16.mxu1 %v9247_v19  ;;  %v9305_v19 = vld [vmem:[%s12524_s3 + $0x440] ss:$16 sps:$4 sm:$0xff]  }
 0x2f3   :  { %2802 = vmatmul.mubr.bf16.vlgmr.msra.gmra.mxu1 %v1595_v14  ;;  %8338 = vmatmul.mubr.msk.bf16.vlgmr.msra.gmra.mxu0 %vm1573_vm10, %v11019_v30  ;;  %v9269_v14 = vld [vmem:[%s12524_s3 + $0x500] ss:$16 sps:$4 sm:$0xff]  }
 0x2f4   :  { %3596 = vmatpush1.bf16.msra.mxu0 %v9242_v29  ;;  %2811 = vmatprep.mubr.bf16.mxu1 %v10745_v53  ;;  %v9313_v29 = vld [vmem:[%s12524_s3 + $0x624] ss:$16 sps:$4 sm:$0xff]  }
 0x2f5   :  { %2967 = vmatpush1.bf16.msra.mxu1 %v9245_v46  ;;  %3597 = vmatprep.subr.bf16.mxu0 %v9250_v31  ;;  %v9311_v46 = vld [vmem:[%s12524_s3 + $0x620] ss:$16 sps:$4 sm:$0xff]   ;;  %v9314_v31 = vld [vmem:[%s12524_s3 + $0x568] ss:$16 sps:$4 sm:$0xff]   ;;  %v9334_v53 = vld [vmem:[%s12524_s3 + $0x584] ss:$16 sps:$4 sm:$0xff]  }
 0x2f6   :  { %3576 = vmatprep.mubr.bf16.mxu0 %v12492_v0  ;;  %3473 = vmatprep.subr.bf16.mxu1 %v9265_v35  ;;  %v3017_v35 = vld [vmem:[#allocation3 + $0x68] sm:$0xf] }
 0x2f8   :  { %3598 = vmatpush1.bf16.msra.mxu0 %v9248_v32  ;;  %v9319_v32 = vld [vmem:[%s12524_s3 + $0x604] ss:$16 sps:$4 sm:$0xff]  }
 0x2f9   :  { %3599 = vmatprep.subr.bf16.mxu0 %v9253_v45  ;;  %v9322_v45 = vld [vmem:[%s12524_s3 + $0x54c] ss:$16 sps:$4 sm:$0xff]  }
 0x2fb   :  { %2812 = vmatmul.mubr.bf16.gmra.mxu1 %v10747_v37  ;;  %8339 = vmatmul.mubr.msk.bf16.gmra.mxu0 %vm1573_vm10, %v11047_v34 }
 0x2fc   :  { %3600 = vmatpush1.bf16.msra.mxu0 %v9251_v52  ;;  %2821 = vmatprep.mubr.bf16.mxu1 %v1602_v7  ;;  %v9289_v7 = vld [vmem:[%s12524_s3 + $0x4a4] ss:$16 sps:$4 sm:$0xff]  }
 0x2fd   :  { %3601 = vmatprep.subr.bf16.mxu0 %v9256_v54  ;;  %3586 = vmatprep.mubr.bf16.mxu0 %v12492_v0  ;;  %v3013_v52 = vld [vmem:[#allocation3] sm:$0xfc]  ;;  %v3023_v54 = vpack.c.bf16 %v3017_v35, %v3017_v35 }
 0x2ff   :  { %v3114_v3 = vrot.slane %v3023_v54, 1 }
 0x300   :  { %3602 = vmatpush1.bf16.msra.mxu0 %v9254_v58  ;;  %v9320_v58 = vld [vmem:[%s12524_s3 + $0x548] ss:$16 sps:$4 sm:$0xff]  }
 0x301   :  { %3603 = vmatprep.subr.bf16.mxu0 %v9259_v40  ;;  %v3019_v40 = vpack.c.bf16 %v10693_v36, %v3013_v52  ;;  %v9328_v36 = vld [vmem:[%s12524_s3 + $0x5c4] ss:$16 sps:$4 sm:$0xff]  }
 0x303   :  { %2822 = vmatmul.mubr.bf16.gmra.mxu1 %v1601_v18  ;;  %8340 = vmatmul.mubr.msk.bf16.gmra.mxu0 %vm1573_vm10, %v11036_v48  ;;  %v9301_v18 = vld [vmem:[%s12524_s3 + $0x464] ss:$16 sps:$4 sm:$0xff]  }
 0x304   :  { %3604 = vmatpush1.bf16.msra.mxu0 %v9257_v38  ;;  %3627 = vmatprep.mubr.bf16.mxu0 %v3108_v11  ;;  %v3104_v38 = vrot.slane %v10747_v37, 1  ;;  %v3115_v37 = vsel %vm542_vm3, %v3107_v1, %v3114_v3 }
 0x305   :  { %3605 = vmatprep.subr.bf16.mxu0 %v9262_v39  ;;  %2984 = vmatprep.mubr.bf16.mxu1 %v12492_v0  ;;  %v3016_v39 = vld [vmem:[#allocation3 + $0x60] sm:$0xf] }
 0x308   :  { %3606 = vmatpush1.bf16.msra.mxu0 %v9260_v5  ;;  %v3103_v5 = vrot.slane %v3019_v40, 1 }
 0x309   :  { %3607 = vmatprep.subr.bf16.mxu0 %v9268_v42 }
 0x30a   :  { %v3105_v42 = vsel %vm542_vm3, %v3103_v5, %v3104_v38 }
 0x30b   :  { %8199 = vmatmul.mubr.msk.bf16.vlgmr.msra.gmra.mxu1 %vm1573_vm10, %v10778_v47  ;;  %v9280_v47 = vld [vmem:[%s12524_s3 + $0x62c] ss:$16 sps:$4 sm:$0xff]  }
 0x30c   :  { %3474 = vmatpush1.bf16.msra.mxu1 %v9263_v6  ;;  %3608 = vmatpush1.bf16.msra.mxu0 %v9266_v8  ;;  %v3022_v6 = vpack.c.bf16 %v3016_v39, %v3016_v39  ;;  %v9326_v8 = vld [vmem:[%s12524_s3 + $0x5c0] ss:$16 sps:$4 sm:$0xff]  }
 0x30d   :  { %3475 = vmatprep.subr.bf16.mxu1 %v9271_v10  ;;  %3609 = vmatprep.subr.bf16.mxu0 %v9274_v12  ;;  %v9331_v10 = vld [vmem:[%s12524_s3 + $0x5a4] ss:$16 sps:$4 sm:$0xff]  }
 0x30e   :  { %2994 = vmatprep.mubr.bf16.mxu1 %v12492_v0  ;;  %v3112_v12 = vrot.slane %v3022_v6, 1 }
 0x310   :  { %3476 = vmatpush1.bf16.msra.mxu1 %v9269_v14  ;;  %3610 = vmatpush1.bf16.msra.mxu0 %v9272_v41  ;;  %v9329_v14 = vld [vmem:[%s12524_s3 + $0x5a0] ss:$16 sps:$4 sm:$0xff]   ;;  %v3113_v1 = vsel %vm542_vm3, %v3104_v38, %v3112_v12 }
 0x311   :  { %3477 = vmatprep.subr.bf16.mxu1 %v9277_v15  ;;  %3611 = vmatprep.subr.bf16.mxu0 %v9280_v47  ;;  %v9332_v41 = vld [vmem:[%s12524_s3 + $0x580] ss:$16 sps:$4 sm:$0xff]   ;;  %v9337_v15 = vld [vmem:[%s12524_s3 + $0x564] ss:$16 sps:$4 sm:$0xff]  }
 0x312   :  { %v9335_v47 = vld [vmem:[%s12524_s3 + $0x560] ss:$16 sps:$4 sm:$0xff]  }
 0x313   :  { %8200 = vmatmul.mubr.msk.bf16.gmra.mxu1 %vm1573_vm10, %v10772_v25  ;;  %v9292_v25 = vld [vmem:[%s12524_s3 + $0x5ec] ss:$16 sps:$4 sm:$0xff]  }
 0x314   :  { %3478 = vmatpush1.bf16.msra.mxu1 %v9275_v16  ;;  %3612 = vmatpush2.bf16.msra.mxu0 %v9278_v17  ;;  %v9340_v16 = vld [vmem:[%s12524_s3 + $0x544] ss:$16 sps:$4 sm:$0xff]  }
 0x315   :  { %3479 = vmatprep.subr.bf16.mxu1 %v9283_v44  ;;  %3613 = vmatprep.subr.bf16.mxu0 %v9286_v22  ;;  %v9338_v22 = vld [vmem:[%s12524_s3 + $0x540] ss:$16 sps:$4 sm:$0xff]  }
 0x316   :  { %3004 = vmatprep.mubr.bf16.mxu1 %v12492_v0 }
 0x318   :  { %3480 = vmatpush1.bf16.msra.mxu1 %v9281_v56  ;;  %3614 = vmatpush2.bf16.msra.mxu0 %v9284_v9 }
 0x319   :  { %3481 = vmatprep.subr.bf16.mxu1 %v9289_v7  ;;  %3615 = vmatprep.subr.bf16.mxu0 %v9292_v25  ;;  %v9343_v7 = vld [vmem:[%s12524_s3 + $0x64c] ss:$16 sps:$4 sm:$0xff]  }
 0x31b   :  { %8201 = vmatmul.mubr.msk.bf16.gmra.mxu1 %vm1573_vm10, %v10823_v13  ;;  %v9304_v13 = vld [vmem:[%s12524_s3 + $0x5ac] ss:$16 sps:$4 sm:$0xff]  }
 0x31c   :  { %3482 = vmatpush1.bf16.msra.mxu1 %v9287_v20  ;;  %3616 = vmatpush2.bf16.msra.mxu0 %v9290_v21  ;;  %v9341_v21 = vld [vmem:[%s12524_s3 + $0x648] ss:$16 sps:$4 sm:$0xff]  }
 0x31d   :  { %3505 = vmatprep.mubr.bf16.mxu1 %v3108_v11  ;;  %3483 = vmatprep.subr.bf16.mxu1 %v9295_v23  ;;  %v9323_v11 = vld [vmem:[%s12524_s3 + $0x5e0] ss:$16 sps:$4 sm:$0xff]  }
 0x31e   :  { %3617 = vmatprep.subr.bf16.mxu0 %v9298_v24 }
 0x320   :  { %3484 = vmatpush1.bf16.msra.mxu1 %v9293_v43  ;;  %3618 = vmatpush2.bf16.msra.mxu0 %v9296_v59 }
 0x321   :  { %3485 = vmatprep.subr.bf16.mxu1 %v9301_v18  ;;  %3619 = vmatprep.subr.bf16.mxu0 %v9304_v13 }
 0x324   :  { %3486 = vmatpush1.bf16.msra.mxu1 %v9299_v62  ;;  %3620 = vmatpush2.bf16.msra.mxu0 %v9302_v26 }
 0x325   :  { %3487 = vmatprep.subr.bf16.mxu1 %v9307_v27  ;;  %3621 = vmatprep.subr.bf16.mxu0 %v9310_v4 }
 0x328   :  { %3488 = vmatpush1.bf16.msra.mxu1 %v9305_v19  ;;  %3622 = vmatpush2.bf16.msra.mxu0 %v9308_v28 }
 0x329   :  { %3489 = vmatprep.subr.bf16.mxu1 %v9313_v29  ;;  %3623 = vmatprep.subr.bf16.mxu0 %v9316_v33 }
 0x32c   :  { %3490 = vmatpush2.bf16.msra.mxu1 %v9311_v46  ;;  %3624 = vmatpush2.bf16.msra.mxu0 %v9314_v31 }
 0x32d   :  { %3491 = vmatprep.subr.bf16.mxu1 %v9319_v32  ;;  %3625 = vmatprep.subr.bf16.mxu0 %v9322_v45 }
 0x330   :  { %3492 = vmatpush2.bf16.msra.mxu1 %v9317_v57  ;;  %3626 = vmatpush2.bf16.msra.mxu0 %v9320_v58 }
 0x331   :  { %3493 = vmatprep.subr.bf16.mxu1 %v9325_v60 }
 0x333   :  { %3628 = vmatmul.mubr.bf16.vlgmr.msra.gmra.mxu0 %v3105_v42 }
 0x334   :  { %3494 = vmatpush2.bf16.msra.mxu1 %v9323_v11  ;;  %3637 = vmatprep.mubr.bf16.mxu0 %v3115_v37 }
 0x335   :  { %3495 = vmatprep.subr.bf16.mxu1 %v9328_v36 }
 0x338   :  { %3496 = vmatpush2.bf16.msra.mxu1 %v9326_v8 }
 0x339   :  { %3497 = vmatprep.subr.bf16.mxu1 %v9331_v10 }
 0x33b   :  { %3638 = vmatmul.mubr.bf16.gmra.mxu0 %v3113_v1 }
 0x33c   :  { %3498 = vmatpush2.bf16.msra.mxu1 %v9329_v14  ;;  %3647 = vmatprep.mubr.bf16.mxu0 %v3114_v3 }
 0x33d   :  { %3499 = vmatprep.subr.bf16.mxu1 %v9334_v53 }
 0x340   :  { %3500 = vmatpush2.bf16.msra.mxu1 %v9332_v41 }
 0x341   :  { %3501 = vmatprep.subr.bf16.mxu1 %v9337_v15 }
 0x343   :  { %3648 = vmatmul.mubr.bf16.gmra.mxu0 %v3112_v12  ;;  %v2211_v17 = vpop.f32.mrf.mxu1  ;;  %v11244_v44 = vpop.f32.mrf.mxu0 }
 0x344   :  { %3502 = vmatpush2.bf16.msra.mxu1 %v9335_v47 }
 0x345   :  { %v2213_v56 = vpop.f32.mrf.mxu1  ;;  %v11249_v9 = vpop.f32.mrf.mxu0  ;;  %3503 = vmatprep.subr.bf16.mxu1 %v9340_v16 }
 0x347   :  { %v2215_v25 = vpop.f32.mrf.mxu1  ;;  %v11254_v20 = vpop.f32.mrf.mxu0 }
 0x348   :  { %3504 = vmatpush2.bf16.msra.mxu1 %v9338_v22 }
 0x349   :  { %v11259_v23 = vpop.f32.mrf.mxu1  ;;  %v11261_v24 = vpop.f32.mrf.mxu0  ;;  %3670 = vmatprep.subr.bf16.mxu1 %v9343_v7 }
 0x34b   :  { %3506 = vmatmul.mubr.bf16.vlgmr.msra.gmra.mxu1 %v3105_v42  ;;  %v2221_v43 = vpop.f32.mrf.mxu1  ;;  %v11263_v59 = vpop.f32.mrf.mxu0 }
 0x34c   :  { %3515 = vmatprep.mubr.bf16.mxu1 %v3115_v37  ;;  %3671 = vmatpush1.bf16.msra.mxu1 %v9341_v21 }
 0x34d   :  { %v2223_v18 = vpop.f32.mrf.mxu1  ;;  %v11265_v13 = vpop.f32.mrf.mxu0 }
 0x34f   :  { %v2225_v62 = vpop.f32.mrf.mxu1  ;;  %v11267_v26 = vpop.f32.mrf.mxu0 }
 0x351   :  { %v11269_v27 = vpop.f32.mrf.mxu1  ;;  %v11271_v4 = vpop.f32.mrf.mxu0 }
 0x352   :  { %12531 = vst [vmem:[#allocation14_spill] sm:$0xff] %v11271_v4 }
 0x353   :  { %3516 = vmatmul.mubr.bf16.gmra.mxu1 %v3113_v1  ;;  %v2231_v19 = vpop.f32.mrf.mxu1  ;;  %v2353_v28 = vpop.f32.mrf.mxu0 }
 0x354   :  { %3525 = vmatprep.mubr.bf16.mxu1 %v3114_v3 }
 0x355   :  { %v2233_v29 = vpop.f32.mrf.mxu1  ;;  %v2355_v33 = vpop.f32.mrf.mxu0 }
 0x357   :  { %v2235_v46 = vpop.f32.mrf.mxu1  ;;  %v2357_v31 = vpop.f32.mrf.mxu0 }
 0x359   :  { %v2236_v35 = vpop.f32.mrf.mxu1  ;;  %v2358_v32 = vpop.f32.mrf.mxu0 }
 0x35b   :  { %3526 = vmatmul.mubr.bf16.gmra.mxu1 %v3112_v12  ;;  %v2272_v45 = vpop.f32.mrf.mxu1  ;;  %v11273_v52 = vpop.f32.mrf.mxu0 }
 0x35c   :  { %v11275_v54 = vadd.f32 %v2272_v45, %v2211_v17  ;;  %3688 = vmatprep.mubr.bf16.mxu1 %v12492_v0 }
 0x35d   :  { %v2274_v57 = vpop.f32.mrf.mxu1  ;;  %v11278_v58 = vpop.f32.mrf.mxu0 }
 0x35e   :  { %v11280_v40 = vadd.f32 %v2274_v57, %v2213_v56 }
 0x35f   :  { %v2276_v60 = vpop.f32.mrf.mxu1  ;;  %v11282_v38 = vpop.f32.mrf.mxu0 }
 0x360   :  { %v11284_v3 = vadd.f32 %v2276_v60, %v2215_v25 }
 0x361   :  { %v11286_v39 = vpop.f32.mrf.mxu1  ;;  %v11288_v11 = vpop.f32.mrf.mxu0 }
 0x363   :  { %8341 = vmatmul.mubr.msk.bf16.vlgmr.msra.gmra.mxu1 %vm1573_vm10, %v11019_v30  ;;  %v2282_v5 = vpop.f32.mrf.mxu1  ;;  %v11292_v36 = vpop.f32.mrf.mxu0 }
 0x364   :  { %v11294_v42 = vadd.f32 %v2282_v5, %v2221_v43  ;;  %3698 = vmatprep.mubr.bf16.mxu1 %v12492_v0 }
 0x365   :  { %v2284_v6 = vpop.f32.mrf.mxu1  ;;  %v11297_v37 = vpop.f32.mrf.mxu0 }
 0x366   :  { %v11299_v8 = vadd.f32 %v2284_v6, %v2223_v18 }
 0x367   :  { %v2286_v10 = vpop.f32.mrf.mxu1  ;;  %v11301_v12 = vpop.f32.mrf.mxu0 }
 0x368   :  { %v11303_v14 = vadd.f32 %v2286_v10, %v2225_v62  ;;  %v9346_v10 = vld [vmem:[#allocation7 + $0x294] ss:$8 sps:$4 sm:$0xff]  }
 0x369   :  { %v11305_v53 = vpop.f32.mrf.mxu1  ;;  %v11307_v30 = vpop.f32.mrf.mxu0  ;;  %4670 = vmatprep.subr.bf16.mxu1 %v9346_v10 }
 0x36b   :  { %8342 = vmatmul.mubr.msk.bf16.gmra.mxu1 %vm1573_vm10, %v11047_v34  ;;  %v2292_v1 = vpop.f32.mrf.mxu1  ;;  %v11311_v41 = vpop.f32.mrf.mxu0 }
 0x36c   :  { %v11313_v15 = vadd.f32 %v2292_v1, %v2231_v19  ;;  %3708 = vmatprep.mubr.bf16.mxu1 %v12492_v0  ;;  %v9347_v1 = vld [vmem:[#allocation7 + $0x390] ss:$8 sps:$4 sm:$0xff]   ;;  %v9410_v0 = vld [vmem:[#allocation7 + $0x2e0] ss:$8 sps:$4 sm:$0xff]  }
 0x36d   :  { %v2294_v47 = vpop.f32.mrf.mxu1  ;;  %v11316_v16 = vpop.f32.mrf.mxu0 }
 0x36e   :  { %v11318_v17 = vadd.f32 %v2294_v47, %v2233_v29  ;;  %v9344_v47 = vld [vmem:[#allocation7 + $0x290] ss:$8 sps:$4 sm:$0xff]  }
 0x36f   :  { %v2296_v22 = vpop.f32.mrf.mxu1  ;;  %v2888_v56 = vpop.f32.mrf.mxu0  ;;  %4671 = vmatpush1.bf16.msra.mxu1 %v9344_v47 }
 0x370   :  { %v9353_v22 = vld [vmem:[#allocation7 + $0x380] ss:$8 sps:$4 sm:$0xff]  }
 0x371   :  { %v2297_v7 = vpop.f32.mrf.mxu1  ;;  %v2889_v25 = vpop.f32.mrf.mxu0  ;;  %v9350_v56 = vld [vmem:[#allocation7 + $0x280] ss:$8 sps:$4 sm:$0xff]  }
 0x372   :  { %v9359_v7 = vld [vmem:[#allocation7 + $0x370] ss:$8 sps:$4 sm:$0xff]  }
 0x373   :  { %8343 = vmatmul.mubr.msk.bf16.gmra.mxu1 %vm1573_vm10, %v11036_v48  ;;  %v2394_v34 = vpop.f32.mrf.mxu1 }
 0x374   :  { %v2395_v21 = vadd.f32 %v2394_v34, %v11244_v44  ;;  %v9356_v34 = vld [vmem:[#allocation7 + $0x270] ss:$8 sps:$4 sm:$0xff]  }
 0x375   :  { %v2396_v43 = vpop.f32.mrf.mxu1 }
 0x376   :  { %v2397_v18 = vadd.f32 %v2396_v43, %v11249_v9 }
 0x377   :  { %v2398_v62 = vpop.f32.mrf.mxu1 }
 0x378   :  { %v2399_v19 = vadd.f32 %v2398_v62, %v11254_v20 }
 0x379   :  { %v11325_v46 = vpop.f32.mrf.mxu1 }
 0x37b   :  { %v2404_v29 = vpop.f32.mrf.mxu1 }
 0x37c   :  { %v11328_v31 = vadd.f32 %v2404_v29, %v11263_v59  ;;  %v9349_v59 = vld [vmem:[#allocation7 + $0x394] ss:$8 sps:$4 sm:$0xff]   ;;  %v9367_v29 = vld [vmem:[#allocation7 + $0x364] ss:$8 sps:$4 sm:$0xff]  }
 0x37d   :  { %v2406_v35 = vpop.f32.mrf.mxu1  ;;  %4731 = vmatprep.subr.bf16.mxu0 %v9349_v59 }
 0x37e   :  { %v11331_v32 = vadd.f32 %v2406_v35, %v11265_v13  ;;  %4732 = vmatpush1.bf16.msra.mxu0 %v9347_v1  ;;  %v9355_v13 = vld [vmem:[#allocation7 + $0x384] ss:$8 sps:$4 sm:$0xff]   ;;  %v9368_v1 = vld [vmem:[#allocation7 + $0x250] ss:$8 sps:$4 sm:$0xff]  }
 0x37f   :  { %v2408_v48 = vpop.f32.mrf.mxu1  ;;  %4733 = vmatprep.subr.bf16.mxu0 %v9355_v13 }
 0x380   :  { %v11334_v45 = vadd.f32 %v2408_v48, %v11267_v26  ;;  %v9352_v26 = vld [vmem:[#allocation7 + $0x284] ss:$8 sps:$4 sm:$0xff]  }
 0x381   :  { %v11336_v44 = vpop.f32.mrf.mxu1  ;;  %4672 = vmatprep.subr.bf16.mxu1 %v9352_v26  ;;  %v9364_v48 = vld [vmem:[#allocation7 + $0x264] ss:$8 sps:$4 sm:$0xff]  }
 0x382   :  { %12532 = vst [vmem:[#allocation15_spill] sm:$0xff] %v11336_v44  ;;  %4734 = vmatpush1.bf16.msra.mxu0 %v9353_v22  ;;  %4673 = vmatpush1.bf16.msra.mxu1 %v9350_v56  ;;  %v9379_v26 = vld [vmem:[#allocation7 + $0x344] ss:$8 sps:$4 sm:$0xff]   ;;  %v9428_v44 = vld [vmem:[#allocation7 + $0x2b0] ss:$8 sps:$4 sm:$0xff]  }
 0x383   :  { %v2414_v9 = vpop.f32.mrf.mxu1  ;;  %v9376_v56 = vld [vmem:[#allocation7 + $0x244] ss:$8 sps:$4 sm:$0xff]  }
 0x384   :  { %v11338_v57 = vadd.f32 %v2414_v9, %v2353_v28  ;;  %v9361_v28 = vld [vmem:[#allocation7 + $0x374] ss:$8 sps:$4 sm:$0xff]   ;;  %v9365_v9 = vld [vmem:[#allocation7 + $0x360] ss:$8 sps:$4 sm:$0xff]  }
 0x385   :  { %v2416_v20 = vpop.f32.mrf.mxu1  ;;  %4735 = vmatprep.subr.bf16.mxu0 %v9361_v28  ;;  %v9377_v28 = vld [vmem:[#allocation7 + $0x340] ss:$8 sps:$4 sm:$0xff]  }
 0x386   :  { %v11340_v60 = vadd.f32 %v2416_v20, %v2355_v33  ;;  %v9358_v33 = vld [vmem:[#allocation7 + $0x274] ss:$8 sps:$4 sm:$0xff]   ;;  %4736 = vmatpush1.bf16.msra.mxu0 %v9359_v7  ;;  %v9374_v7 = vld [vmem:[#allocation7 + $0x240] ss:$8 sps:$4 sm:$0xff]  }
 0x387   :  { %v2418_v5 = vpop.f32.mrf.mxu1  ;;  %4674 = vmatprep.subr.bf16.mxu1 %v9358_v33  ;;  %4737 = vmatprep.subr.bf16.mxu0 %v9367_v29  ;;  %v9383_v29 = vld [vmem:[#allocation7 + $0x330] ss:$8 sps:$4 sm:$0xff]  }
 0x388   :  { %4675 = vmatpush1.bf16.msra.mxu1 %v9356_v34  ;;  %v9362_v5 = vld [vmem:[#allocation7 + $0x260] ss:$8 sps:$4 sm:$0xff]   ;;  %v9385_v34 = vld [vmem:[#allocation7 + $0x334] ss:$8 sps:$4 sm:$0xff]  }
 0x389   :  { %v2419_v6 = vpop.f32.mrf.mxu1  ;;  %4676 = vmatprep.subr.bf16.mxu1 %v9364_v48 }
 0x38a   :  { %v12533_v6 = vmov 0  ;;  %4738 = vmatpush1.bf16.msra.mxu0 %v9365_v9  ;;  %v9380_v9 = vld [vmem:[#allocation7 + $0x230] ss:$8 sps:$4 sm:$0xff]  }
 0x38b   :  { %v12534_v6 = vsel %vm11347_vm12, 4294967295, %v12533_v6 }
 0x38c   :  { %12535 = vst [vmem:[#allocation16_spill] sm:$0xff] %v12534_v6  ;;  %4677 = vmatpush1.bf16.msra.mxu1 %v9362_v5 }
 0x39b   :  { %v2925_v25 = vpop.f32.mrf.mxu0 }
 0x39c   :  { %v11342_v43 = vadd.f32 %v2925_v25, %v2395_v21  ;;  %v9373_v21 = vld [vmem:[#allocation7 + $0x354] ss:$8 sps:$4 sm:$0xff]  }
 0x39d   :  { %v2927_v62 = vpop.f32.mrf.mxu0  ;;  %4739 = vmatprep.subr.bf16.mxu0 %v9373_v21  ;;  %v9388_v21 = vld [vmem:[#allocation7 + $0x224] ss:$8 sps:$4 sm:$0xff]  }
 0x39e   :  { %v11344_v35 = vadd.f32 %v2927_v62, %v2397_v18  ;;  %v9370_v18 = vld [vmem:[#allocation7 + $0x254] ss:$8 sps:$4 sm:$0xff]  }
 0x39f   :  { %v2929_v20 = vpop.f32.mrf.mxu0  ;;  %4678 = vmatprep.subr.bf16.mxu1 %v9370_v18  ;;  %v9382_v62 = vld [vmem:[#allocation7 + $0x234] ss:$8 sps:$4 sm:$0xff]   ;;  %v9389_v18 = vld [vmem:[#allocation7 + $0x320] ss:$8 sps:$4 sm:$0xff]  }
 0x3a0   :  { %v11351_v59 = vadd.f32 %v2929_v20, %v2399_v19  ;;  %v9371_v19 = vld [vmem:[#allocation7 + $0x350] ss:$8 sps:$4 sm:$0xff]   ;;  %4679 = vmatpush1.bf16.msra.mxu1 %v9368_v1 }
 0x3a1   :  { %v11371_v61 = vpop.f32.mrf.mxu0  ;;  %4740 = vmatpush1.bf16.msra.mxu0 %v9371_v19  ;;  %4680 = vmatprep.subr.bf16.mxu1 %v9376_v56 }
 0x3a2   :  { %4741 = vmatprep.subr.bf16.mxu0 %v9379_v26  ;;  %v9395_v26 = vld [vmem:[#allocation7 + $0x410] ss:$8 sps:$4 sm:$0xff]  }
 0x3a3   :  { %v2935_v10 = vpop.f32.mrf.mxu0 }
 0x3a4   :  { %v11374_v47 = vadd.f32 %v2935_v10, %v11328_v31  ;;  %4681 = vmatpush1.bf16.msra.mxu1 %v9374_v7  ;;  %v9386_v10 = vld [vmem:[#allocation7 + $0x220] ss:$8 sps:$4 sm:$0xff]  }
 0x3a5   :  { %v2937_v13 = vpop.f32.mrf.mxu0  ;;  %4742 = vmatpush1.bf16.msra.mxu0 %v9377_v28  ;;  %4682 = vmatprep.subr.bf16.mxu1 %v9382_v62  ;;  %v9403_v62 = vld [vmem:[#allocation7 + $0x404] ss:$8 sps:$4 sm:$0xff]  }
 0x3a6   :  { %v11377_v22 = vadd.f32 %v2937_v13, %v11331_v32  ;;  %4743 = vmatprep.subr.bf16.mxu0 %v9385_v34  ;;  %v9397_v13 = vld [vmem:[#allocation7 + $0x414] ss:$8 sps:$4 sm:$0xff]  }
 0x3a7   :  { %v2939_v33 = vpop.f32.mrf.mxu0 }
 0x3a8   :  { %v11380_v25 = vadd.f32 %v2939_v33, %v11334_v45  ;;  %4683 = vmatpush1.bf16.msra.mxu1 %v9380_v9  ;;  %v9391_v45 = vld [vmem:[#allocation7 + $0x324] ss:$8 sps:$4 sm:$0xff]   ;;  %v9392_v33 = vld [vmem:[#allocation7 + $0x310] ss:$8 sps:$4 sm:$0xff]   ;;  %v9401_v9 = vld [vmem:[#allocation7 + $0x400] ss:$8 sps:$4 sm:$0xff]  }
 0x3a9   :  { %v11382_v31 = vpop.f32.mrf.mxu0  ;;  %4744 = vmatpush1.bf16.msra.mxu0 %v9383_v29  ;;  %4684 = vmatprep.subr.bf16.mxu1 %v9388_v21  ;;  %v9398_v21 = vld [vmem:[#allocation7 + $0x300] ss:$8 sps:$4 sm:$0xff]  }
 0x3aa   :  { %12536 = vst [vmem:[#allocation17_spill] sm:$0xff] %v11382_v31  ;;  %4745 = vmatprep.subr.bf16.mxu0 %v9391_v45 }
 0x3ab   :  { %v2945_v48 = vpop.f32.mrf.mxu0 }
 0x3ac   :  { %v11385_v32 = vadd.f32 %v2945_v48, %v11338_v57  ;;  %4685 = vmatpush1.bf16.msra.mxu1 %v9386_v10  ;;  %v9394_v57 = vld [vmem:[#allocation7 + $0x314] ss:$8 sps:$4 sm:$0xff]   ;;  %v9400_v48 = vld [vmem:[#allocation7 + $0x304] ss:$8 sps:$4 sm:$0xff]  }
 0x3ad   :  { %v2947_v20 = vpop.f32.mrf.mxu0  ;;  %4746 = vmatpush1.bf16.msra.mxu0 %v9389_v18  ;;  %4686 = vmatprep.subr.bf16.mxu1 %v9394_v57  ;;  %v9409_v10 = vld [vmem:[#allocation7 + $0x3f4] ss:$8 sps:$4 sm:$0xff]  }
 0x3ae   :  { %v11388_v5 = vadd.f32 %v2947_v20, %v11340_v60  ;;  %4747 = vmatprep.subr.bf16.mxu0 %v9397_v13 }
 0x3af   :  { %v2949_v19 = vpop.f32.mrf.mxu0 }
 0x3b0   :  { %4687 = vmatpush2.bf16.msra.mxu1 %v9392_v33 }
 0x3b1   :  { %v2950_v1 = vpop.f32.mrf.mxu0  ;;  %4748 = vmatpush2.bf16.msra.mxu0 %v9395_v26  ;;  %4688 = vmatprep.subr.bf16.mxu1 %v9400_v48  ;;  %v9404_v26 = vld [vmem:[#allocation7 + $0x2f0] ss:$8 sps:$4 sm:$0xff]   ;;  %v9412_v48 = vld [vmem:[#allocation7 + $0x2e4] ss:$8 sps:$4 sm:$0xff]  }
 0x3b2   :  { %4749 = vmatprep.subr.bf16.mxu0 %v9403_v62  ;;  %v9407_v1 = vld [vmem:[#allocation7 + $0x3f0] ss:$8 sps:$4 sm:$0xff]  }
 0x3b3   :  { %v2803_v56 = vpop.f32.mrf.mxu1  ;;  %v11390_v28 = vpop.f32.mrf.mxu0 }
 0x3b4   :  { %v11393_v60 = vadd.f32 %v2803_v56, %v11275_v54  ;;  %4689 = vmatpush2.bf16.msra.mxu1 %v9398_v21 }
 0x3b5   :  { %v2805_v7 = vpop.f32.mrf.mxu1  ;;  %v11395_v34 = vpop.f32.mrf.mxu0  ;;  %4750 = vmatpush2.bf16.msra.mxu0 %v9401_v9  ;;  %v9413_v9 = vld [vmem:[#allocation7 + $0x3e0] ss:$8 sps:$4 sm:$0xff]  }
 0x3b6   :  { %v11398_v29 = vadd.f32 %v2805_v7, %v11280_v40  ;;  %v9406_v40 = vld [vmem:[#allocation7 + $0x2f4] ss:$8 sps:$4 sm:$0xff]   ;;  %4751 = vmatprep.subr.bf16.mxu0 %v9409_v10  ;;  %v9415_v7 = vld [vmem:[#allocation7 + $0x3e4] ss:$8 sps:$4 sm:$0xff]  }
 0x3b7   :  { %v2807_v20 = vpop.f32.mrf.mxu1  ;;  %v11400_v45 = vpop.f32.mrf.mxu0  ;;  %4690 = vmatprep.subr.bf16.mxu1 %v9406_v40 }
 0x3b8   :  { %v11403_v54 = vadd.f32 %v2807_v20, %v11284_v3  ;;  %4691 = vmatpush2.bf16.msra.mxu1 %v9404_v26 }
 0x3b9   :  { %v11405_v18 = vpop.f32.mrf.mxu1  ;;  %v11407_v19 = vpop.f32.mrf.mxu0  ;;  %4752 = vmatpush2.bf16.msra.mxu0 %v9407_v1  ;;  %4692 = vmatprep.subr.bf16.mxu1 %v9412_v48  ;;  %v9421_v1 = vld [vmem:[#allocation7 + $0x3d4] ss:$8 sps:$4 sm:$0xff]  }
 0x3ba   :  { %4753 = vmatprep.subr.bf16.mxu0 %v9415_v7 }
 0x3bb   :  { %v2813_v13 = vpop.f32.mrf.mxu1  ;;  %v11409_v57 = vpop.f32.mrf.mxu0 }
 0x3bc   :  { %v11412_v56 = vadd.f32 %v2813_v13, %v11294_v42  ;;  %4693 = vmatpush2.bf16.msra.mxu1 %v9410_v0  ;;  %v9419_v13 = vld [vmem:[#allocation7 + $0x3d0] ss:$8 sps:$4 sm:$0xff]  }
 0x3bd   :  { %v2815_v3 = vpop.f32.mrf.mxu1  ;;  %v11414_v33 = vpop.f32.mrf.mxu0  ;;  %4754 = vmatpush2.bf16.msra.mxu0 %v9413_v9  ;;  %v9427_v9 = vld [vmem:[#allocation7 + $0x3c4] ss:$8 sps:$4 sm:$0xff]  }
 0x3be   :  { %v11417_v62 = vadd.f32 %v2815_v3, %v11299_v8  ;;  %v9418_v8 = vld [vmem:[#allocation7 + $0x2d4] ss:$8 sps:$4 sm:$0xff]   ;;  %4755 = vmatprep.subr.bf16.mxu0 %v9421_v1 }
 0x3bf   :  { %v2817_v20 = vpop.f32.mrf.mxu1  ;;  %v11419_v21 = vpop.f32.mrf.mxu0  ;;  %4694 = vmatprep.subr.bf16.mxu1 %v9418_v8  ;;  %v9430_v1 = vld [vmem:[#allocation7 + $0x2b4] ss:$8 sps:$4 sm:$0xff]  }
 0x3c0   :  { %v11422_v42 = vadd.f32 %v2817_v20, %v11303_v14  ;;  %4695 = vmatpush2.bf16.msra.mxu1 %v9416_v2  ;;  %v9422_v20 = vld [vmem:[#allocation7 + $0x2c0] ss:$8 sps:$4 sm:$0xff]   ;;  %v9433_v8 = vld [vmem:[#allocation7 + $0x3b4] ss:$8 sps:$4 sm:$0xff]   ;;  %v9439_v2 = vld [vmem:[#allocation7 + $0x3a4] ss:$8 sps:$4 sm:$0xff]  }
 0x3c1   :  { %v11424_v10 = vpop.f32.mrf.mxu1  ;;  %v11426_v40 = vpop.f32.mrf.mxu0  ;;  %4756 = vmatpush2.bf16.msra.mxu0 %v9419_v13  ;;  %4696 = vmatprep.subr.bf16.mxu1 %v9424_v63  ;;  %v9434_v63 = vld [vmem:[#allocation7 + $0x2a0] ss:$8 sps:$4 sm:$0xff]  }
 0x3c2   :  { %4757 = vmatprep.subr.bf16.mxu0 %v9427_v9 }
 0x3c3   :  { %v2823_v26 = vpop.f32.mrf.mxu1  ;;  %v11428_v3 = vpop.f32.mrf.mxu0 }
 0x3c4   :  { %v11431_v7 = vadd.f32 %v2823_v26, %v11313_v15  ;;  %v9431_v15 = vld [vmem:[#allocation7 + $0x3b0] ss:$8 sps:$4 sm:$0xff]   ;;  %4697 = vmatpush2.bf16.msra.mxu1 %v9422_v20  ;;  %v9442_v20 = vld [vmem:[#allocation7 + $0x434] ss:$8 sps:$4 sm:$0xff]  }
 0x3c5   :  { %v2825_v14 = vpop.f32.mrf.mxu1  ;;  %v11433_v48 = vpop.f32.mrf.mxu0  ;;  %4758 = vmatpush2.bf16.msra.mxu0 %v9425_v55  ;;  %4698 = vmatprep.subr.bf16.mxu1 %v9430_v1 }
 0x3c6   :  { %v11436_v0 = vadd.f32 %v2825_v14, %v11318_v17  ;;  %4759 = vmatprep.subr.bf16.mxu0 %v9433_v8  ;;  %v9436_v17 = vld [vmem:[#allocation7 + $0x2a4] ss:$8 sps:$4 sm:$0xff]   ;;  %v9445_v8 = vld [vmem:[#allocation7 + $0x74] ss:$8 sps:$4 sm:$0xff]  }
 0x3c7   :  { %v2827_v6 = vpop.f32.mrf.mxu1  ;;  %v3592_v31 = vpop.f32.mrf.mxu0 }
 0x3c8   :  { %v9437_v6 = vld [vmem:[#allocation7 + $0x3a0] ss:$8 sps:$4 sm:$0xff]   ;;  %4699 = vmatpush2.bf16.msra.mxu1 %v9428_v44 }
 0x3c9   :  { %v2828_v13 = vpop.f32.mrf.mxu1  ;;  %v3593_v26 = vpop.f32.mrf.mxu0  ;;  %4760 = vmatpush2.bf16.msra.mxu0 %v9431_v15  ;;  %4700 = vmatprep.subr.bf16.mxu1 %v9436_v17 }
 0x3ca   :  { %4761 = vmatprep.subr.bf16.mxu0 %v9439_v2 }
 0x3cb   :  { %v2986_v14 = vpop.f32.mrf.mxu1 }
 0x3cc   :  { %v11439_v4 = vadd.f32 %v2986_v14, %v11342_v43  ;;  %4701 = vmatpush2.bf16.msra.mxu1 %v9434_v63 }
 0x3cd   :  { %v2988_v31 = vpop.f32.mrf.mxu1  ;;  %4762 = vmatpush2.bf16.msra.mxu0 %v9437_v6  ;;  %4804 = vmatprep.subr.bf16.mxu1 %v9442_v20 }
 0x3ce   :  { %v11442_v55 = vadd.f32 %v2988_v31, %v11344_v35  ;;  %5201 = vmatprep.subr.bf16.mxu0 %v9445_v8 }
 0x3cf   :  { %v2990_v9 = vpop.f32.mrf.mxu1 }
 0x3d0   :  { %v11445_v1 = vadd.f32 %v2990_v9, %v11351_v59  ;;  %v12541_v9 = vmov 0.0  }
 0x3d1   :  { %v11447_v13 = vpop.f32.mrf.mxu1  ;;  %3991 = vst.msk [vmem:[#allocation4 + $0x20] sm:$0xff] %vm3990_vm13, %v12541_v9  ;;  %3992 = vst.msk [vmem:[#allocation4 + $0x48] sm:$0xff] %vm3990_vm13, %v12541_v9 }
 0x3d2   :  { %3993 = vst.msk [vmem:[#allocation4 + $0x70] sm:$0xff] %vm3990_vm13, %v12541_v9  ;;  %3994 = vst.msk [vmem:[#allocation4 + $0x98] sm:$0xff] %vm3990_vm13, %v12541_v9 }
 0x3d3   :  { %v2996_v43 = vpop.f32.mrf.mxu1  ;;  %3996 = vst.msk [vmem:[#allocation4 + $0xc0] sm:$0xf] %vm3995_vm14, %v12541_v9  ;;  %v11503_v9 = vld [vmem:[%s12476_s15] sm:$0xf] }
 0x3d4   :  { %v11450_v44 = vadd.f32 %v2996_v43, %v11374_v47 }
 0x3d5   :  { %v2998_v15 = vpop.f32.mrf.mxu1 }
 0x3d6   :  { %v11453_v35 = vadd.f32 %v2998_v15, %v11377_v22 }
 0x3d7   :  { %v3000_v26 = vpop.f32.mrf.mxu1 }
 0x3d8   :  { %12537 = vst [vmem:[#allocation18_spill] sm:$0xff] %v11453_v35  ;;  %v11456_v2 = vadd.f32 %v3000_v26, %v11380_v25 }
 0x3d9   :  { %v11458_v59 = vpop.f32.mrf.mxu1 }
 0x3da   :  { %12538 = vst [vmem:[#allocation19_spill] sm:$0xff] %v11456_v2  ;;  %v11517_v2 = vrot.slane %v11503_v9, %v10644_v50 }
 0x3db   :  { %v3006_v17 = vpop.f32.mrf.mxu1 }
 0x3dc   :  { %v11461_v14 = vadd.f32 %v3006_v17, %v11385_v32 }
 0x3dd   :  { %v3008_v6 = vpop.f32.mrf.mxu1 }
 0x3de   :  { %12539 = vst [vmem:[#allocation20_spill] sm:$0xff] %v11461_v14  ;;  %v11464_v31 = vadd.f32 %v3008_v6, %v11388_v5 }
 0x3df   :  { %v3010_v47 = vpop.f32.mrf.mxu1 }
 0x3e0   :  { %12540 = vst [vmem:[#allocation21_spill] sm:$0xff] %v11464_v31  ;;  %v2279_v31 = vadd.f32 %v11286_v39, %v11259_v23  ;;  %v2867_v23 = vadd.f32 %v11278_v58, %v11398_v29 }
 0x3e1   :  { %v3011_v63 = vpop.f32.mrf.mxu1 }
 0x3e2   :  { %v11498_v63 = vld [vmem:[%s12470_s9] sm:$0xf] }
 0x3f3   :  { %v11475_v22 = vpop.f32.mrf.mxu0 }
 0x3f5   :  { %v11477_v25 = vpop.f32.mrf.mxu0 }
 0x3f7   :  { %v11479_v32 = vpop.f32.mrf.mxu0 }
 0x3f9   :  { %v11481_v5 = vpop.f32.mrf.mxu0 }
 0x3fb   :  { %v11483_v20 = vpop.f32.mrf.mxu0 }
 0x3fd   :  { %v11485_v8 = vpop.f32.mrf.mxu0 }
 0x3ff   :  { %v11487_v43 = vpop.f32.mrf.mxu0 }
 0x400   :  { %12542 = vst [vmem:[#allocation22_spill] sm:$0xff] %v11487_v43 }
 0x401   :  { %v11489_v15 = vpop.f32.mrf.mxu0 }
 0x402   :  { %12543 = vst [vmem:[#allocation23_spill] sm:$0xff] %v11489_v15 }
 0x403   :  { %v11491_v26 = vpop.f32.mrf.mxu0 }
 0x404   :  { %12544 = vst [vmem:[#allocation24_spill] sm:$0xff] %v11491_v26  ;;  %v2865_v26 = vadd.f32 %v11273_v52, %v11393_v60  ;;  %v11524_v52 = vrot.slane %v11498_v63, %v10650_v51 }
 0x405   :  { %v11493_v17 = vpop.f32.mrf.mxu0 }
 0x406   :  { %12545 = vst [vmem:[#allocation25_spill] sm:$0xff] %v11493_v17  ;;  %v2810_v17 = vadd.f32 %v11405_v18, %v2279_v31  ;;  %v2869_v18 = vadd.f32 %v11282_v38, %v11403_v54 }
 0x407   :  { %v3653_v6 = vpop.f32.mrf.mxu0 }
 0x408   :  { %v2871_v29 = vadd.f32 %v11288_v11, %v2810_v17  ;;  %v2875_v11 = vadd.f32 %v11292_v36, %v11412_v56 }
 0x409   :  { %v3654_v47 = vpop.f32.mrf.mxu0 }
 0x40a   :  { %v11512_v47 = vrot.slane %v11498_v63, %v10644_v50  ;;  %v2289_v50 = vadd.f32 %v11305_v53, %v11269_v27 }
 0x40b   :  { %v3507_v14 = vpop.f32.mrf.mxu1 }
 0x40c   :  { %v3569_v6 = vadd.f32 %v11390_v28, %v3507_v14  ;;  %v11528_v28 = vrot.slane %v11503_v9, %v10650_v51  ;;  %v2820_v17 = vadd.f32 %v11424_v10, %v2289_v50 }
 0x40d   :  { %v3509_v15 = vpop.f32.mrf.mxu1 }
 0x40e   :  { %v3717_v39 = vadd.f32 %v3569_v6, %v2865_v26  ;;  %v3571_v43 = vadd.f32 %v11395_v34, %v3509_v15 }
 0x40f   :  { %v3511_v60 = vpop.f32.mrf.mxu1 }
 0x410   :  { %v3759_v14 = vmul.f32 %v11512_v47, %v3717_v39  ;;  %v3718_v31 = vadd.f32 %v3571_v43, %v2867_v23  ;;  %v3573_v58 = vadd.f32 %v11400_v45, %v3511_v60 }
 0x411   :  { %v3513_v34 = vpop.f32.mrf.mxu1 }
 0x412   :  { %v3801_v15 = vadd.f32 %v11517_v2, %v3759_v14  ;;  %v3760_v26 = vmul.f32 %v11524_v52, %v3718_v31  ;;  %v3721_v6 = vadd.f32 %v3573_v58, %v2869_v18  ;;  %v3575_v51 = vadd.f32 %v11407_v19, %v3513_v34 }
 0x413   :  { %v3517_v35 = vpop.f32.mrf.mxu1  ;;  %v3749_v19 = vsub.s32 2, %v10641_v49  ;;  %v2877_v14 = vadd.f32 %v11297_v37, %v11417_v62  ;;  %v2881_v58 = vadd.f32 %v11307_v30, %v2820_v17 }
 0x414   :  { %v3821_v38 = vmul.f32 0.2, %v3801_v15  ;;  %v3802_v54 = vadd.f32 %v11528_v28, %v3760_v26  ;;  %v3763_v43 = vmul.f32 %v11512_v47, %v3721_v6  ;;  %v3722_v45 = vadd.f32 %v3575_v51, %v2871_v29 }
 0x415   :  { %v3579_v23 = vadd.f32 %v11409_v57, %v3517_v35  ;;  %v3519_v39 = vpop.f32.mrf.mxu1  ;;  %v2879_v51 = vadd.f32 %v11301_v12, %v11422_v42  ;;  %v2885_v26 = vadd.f32 %v11311_v41, %v11431_v7 }
 0x416   :  { %v3841_v60 = vmax.f32 %v3801_v15, %v3821_v38  ;;  %v3822_v18 = vmul.f32 0.2, %v3802_v54  ;;  %v3805_v27 = vadd.f32 %v11517_v2, %v3763_v43  ;;  %v3764_v53 = vmul.f32 %v11524_v52, %v3722_v45 }
 0x417   :  { %v3725_v36 = vadd.f32 %v3579_v23, %v2875_v11  ;;  %v3581_v50 = vadd.f32 %v11414_v33, %v3519_v39  ;;  %v3521_v56 = vpop.f32.mrf.mxu1 }
 0x418   :  { %3861 = vst [vmem:[%s12482_s21] sm:$0xff] %v3841_v60  ;;  %v3901_v57 = vrot.slane %v3841_v60, 7  ;;  %v3842_v10 = vmax.f32 %v3802_v54, %v3822_v18  ;;  %v3825_v35 = vmul.f32 0.2, %v3805_v27  ;;  %v3806_v31 = vadd.f32 %v11528_v28, %v3764_v53 }
 0x419   :  { %v3767_v37 = vmul.f32 %v11512_v47, %v3725_v36  ;;  %v3726_v62 = vadd.f32 %v3581_v50, %v2877_v14  ;;  %v3583_v12 = vadd.f32 %v11419_v21, %v3521_v56  ;;  %v3523_v42 = vpop.f32.mrf.mxu1  ;;  %v3753_v56 = vsub.s32 3, %v10641_v49 }
 0x41a   :  { %3957 = vst [vmem:[#allocation4] sm:$0xfe] %v3901_v57  ;;  %3862 = vst [vmem:[%s12482_s21 + $0x8] sm:$0xff] %v3842_v10  ;;  %v3902_v33 = vrot.slane %v3842_v10, 7  ;;  %v3845_v29 = vmax.f32 %v3805_v27, %v3825_v35  ;;  %v3826_v34 = vmul.f32 0.2, %v3806_v31  ;;  %v3585_v15 = vadd.f32 %v11426_v40, %v3523_v42 }
 0x41b   :  { %v3809_v30 = vadd.f32 %v11517_v2, %v3767_v37  ;;  %v3768_v6 = vmul.f32 %v11524_v52, %v3726_v62  ;;  %v3729_v38 = vadd.f32 %v3583_v12, %v2879_v51  ;;  %v3527_v21 = vpop.f32.mrf.mxu1  ;;  %v2887_v40 = vadd.f32 %v11316_v16, %v11436_v0 }
 0x41c   :  { %3958 = vst [vmem:[#allocation4 + $0x8] sm:$0xfe] %v3902_v33  ;;  %3865 = vst [vmem:[%s12482_s21 + $0x20] sm:$0xff] %v3845_v29  ;;  %v3905_v54 = vrot.slane %v3845_v29, 7  ;;  %v3846_v43 = vmax.f32 %v3806_v31, %v3826_v34  ;;  %v3730_v45 = vadd.f32 %v3585_v15, %v2881_v58  ;;  %v3589_v11 = vadd.f32 %v11428_v3, %v3527_v21 }
 0x41d   :  { %v3829_v41 = vmul.f32 0.2, %v3809_v30  ;;  %v3810_v7 = vadd.f32 %v11528_v28, %v3768_v6  ;;  %v3771_v17 = vmul.f32 %v11512_v47, %v3729_v38  ;;  %v3529_v23 = vpop.f32.mrf.mxu1  ;;  %v11613_v15 = vrot.slane %v11503_v9, %v3749_v19 }
 0x41e   :  { %v11578_v39 = vsel %vm750_vm8, %v3901_v57, %v3905_v54  ;;  %3866 = vst [vmem:[%s12482_s21 + $0x28] sm:$0xff] %v3846_v43  ;;  %v3907_v60 = vrot.slane %v3846_v43, 7  ;;  %v3772_v18 = vmul.f32 %v11524_v52, %v3730_v45  ;;  %v3733_v3 = vadd.f32 %v3589_v11, %v2885_v26 }
 0x41f   :  { %3961 = vst [vmem:[#allocation4 + $0x28] sm:$0xff] %v11578_v39  ;;  %v3849_v16 = vmax.f32 %v3809_v30, %v3829_v41  ;;  %v3830_v0 = vmul.f32 0.2, %v3810_v7  ;;  %v3813_v27 = vadd.f32 %v11517_v2, %v3771_v17  ;;  %v3591_v53 = vadd.f32 %v11433_v48, %v3529_v23  ;;  %v3531_v14 = vpop.f32.mrf.mxu1 }
 0x420   :  { %v11588_v51 = vsel %vm750_vm8, %v3902_v33, %v3907_v60  ;;  %v3814_v36 = vadd.f32 %v11528_v28, %v3772_v18  ;;  %v3775_v50 = vmul.f32 %v11512_v47, %v3733_v3  ;;  %v2401_v48 = vadd.f32 %v11325_v46, %v11261_v24  ;;  %v12547_v14 = vld [vmem:[#allocation15_spill] sm:$0xff] }
 0x421   :  { %3869 = vst [vmem:[%s12482_s21 + $0x40] sm:$0xff] %v3849_v16  ;;  %v3913_v57 = vrot.slane %v3849_v16, 7  ;;  %v3850_v10 = vmax.f32 %v3810_v7, %v3830_v0  ;;  %v3833_v35 = vmul.f32 0.2, %v3813_v27  ;;  %v3734_v31 = vadd.f32 %v3591_v53, %v2887_v40  ;;  %v3532_v58 = vpop.f32.mrf.mxu1  ;;  %v12546_v53 = vld [vmem:[#allocation14_spill] sm:$0xff] }
 0x422   :  { %v3834_v37 = vmul.f32 0.2, %v3814_v36  ;;  %v3817_v62 = vadd.f32 %v11517_v2, %v3775_v50  ;;  %v11602_v47 = vrot.slane %v11498_v63, %v3749_v19  ;;  %v11621_v38 = vrot.slane %v11498_v63, %v3753_v56 }
 0x423   :  { %v3914_v12 = vsel %vm750_vm8, %v3905_v54, %v3913_v57  ;;  %3870 = vst [vmem:[%s12482_s21 + $0x48] sm:$0xff] %v3850_v10  ;;  %v3915_v42 = vrot.slane %v3850_v10, 7  ;;  %v3853_v33 = vmax.f32 %v3813_v27, %v3833_v35  ;;  %v3776_v29 = vmul.f32 %v11524_v52, %v3734_v31  ;;  %v3690_v34 = vpop.f32.mrf.mxu1  ;;  %v12548_v31 = vld [vmem:[#allocation17_spill] sm:$0xff] }
 0x424   :  { %3965 = vst [vmem:[#allocation4 + $0x50] sm:$0xff] %v3914_v12  ;;  %v3854_v24 = vmax.f32 %v3814_v36, %v3834_v37  ;;  %v3837_v46 = vmul.f32 0.2, %v3817_v62  ;;  %v3691_v2 = vadd.f32 %v3690_v34, %v11475_v22  ;;  %v2932_v54 = vadd.f32 %v11371_v61, %v2401_v48  ;;  %v12549_v34 = vld [vmem:[#allocation18_spill] sm:$0xff] }
 0x425   :  { %v3916_v26 = vsel %vm750_vm8, %v3907_v60, %v3915_v42  ;;  %3873 = vst [vmem:[%s12482_s21 + $0x60] sm:$0xff] %v3853_v33  ;;  %v3921_v30 = vrot.slane %v3853_v33, 7  ;;  %v3818_v52 = vadd.f32 %v11528_v28, %v3776_v29  ;;  %v3692_v6 = vpop.f32.mrf.mxu1  ;;  %v11633_v63 = vrot.slane %v11503_v9, %v3753_v56 }
 0x426   :  { %3966 = vst [vmem:[#allocation4 + $0x58] sm:$0xff] %v3916_v26  ;;  %3874 = vst [vmem:[%s12482_s21 + $0x68] sm:$0xff] %v3854_v24  ;;  %v3923_v49 = vrot.slane %v3854_v24, 7  ;;  %v3857_v22 = vmax.f32 %v3817_v62, %v3837_v46  ;;  %v3719_v19 = vadd.f32 %v3691_v2, %v11439_v4  ;;  %v3693_v21 = vadd.f32 %v3692_v6, %v11477_v25  ;;  %v12550_v46 = vld [vmem:[#allocation22_spill] sm:$0xff]  ;;  %v12551_v6 = vld [vmem:[#allocation23_spill] sm:$0xff] }
 0x427   :  { %v11630_v43 = vsel %vm750_vm8, %v3913_v57, %v3921_v30  ;;  %v3838_v28 = vmul.f32 0.2, %v3818_v52  ;;  %v3694_v45 = vpop.f32.mrf.mxu1  ;;  %v2993_v40 = vadd.f32 %v11447_v13, %v2932_v54  ;;  %v2411_v36 = vadd.f32 %v12547_v14, %v12546_v53 }
 0x428   :  { %v11636_v11 = vsel %vm750_vm8, %v3915_v42, %v3923_v49  ;;  %3877 = vst [vmem:[%s12482_s21 + $0x80] sm:$0x3] %v3857_v22  ;;  %v3929_v4 = vrot.slane %v3857_v22, 7  ;;  %v3761_v25 = vmul.f32 %v11602_v47, %v3719_v19  ;;  %v3720_v61 = vadd.f32 %v3693_v21, %v11442_v55  ;;  %v12552_v19 = vld [vmem:[#allocation19_spill] sm:$0xff] }
 0x429   :  { %v3858_v41 = vmax.f32 %v3818_v52, %v3838_v28  ;;  %v3695_v7 = vadd.f32 %v3694_v45, %v11479_v32  ;;  %v3696_v9 = vpop.f32.mrf.mxu1  ;;  %v2942_v58 = vadd.f32 %v12548_v31, %v2411_v36 }
 0x42a   :  { %v3930_v17 = vsel %vm750_vm8, %v3921_v30, %v3929_v4  ;;  %v3803_v23 = vadd.f32 %v11613_v15, %v3761_v25  ;;  %v3762_v60 = vmul.f32 %v11621_v38, %v3720_v61  ;;  %v3697_v18 = vadd.f32 %v3696_v9, %v11481_v5  ;;  %v12553_v25 = vld [vmem:[#allocation24_spill] sm:$0xff] }
 0x42b   :  { %3973 = vst [vmem:[#allocation4 + $0xa0] sm:$0x7] %v3930_v17  ;;  %3878 = vst [vmem:[%s12482_s21 + $0x88] sm:$0x3] %v3858_v41  ;;  %v3931_v55 = vrot.slane %v3858_v41, 7  ;;  %v3723_v13 = vadd.f32 %v3695_v7, %v11445_v1  ;;  %v3700_v3 = vpop.f32.mrf.mxu1  ;;  %v3003_v29 = vadd.f32 %v11458_v59, %v2942_v58 }
 0x42c   :  { %v3823_v16 = vmul.f32 0.2, %v3803_v23  ;;  %v3804_v32 = vadd.f32 %v11633_v63, %v3762_v60  ;;  %v3724_v0 = vadd.f32 %v3697_v18, %v2993_v40  ;;  %v3701_v27 = vadd.f32 %v3700_v3, %v11483_v20  ;;  %v12554_v18 = vld [vmem:[#allocation20_spill] sm:$0xff] }
 0x42d   :  { %v3932_v5 = vsel %vm750_vm8, %v3923_v49, %v3931_v55  ;;  %v3765_v50 = vmul.f32 %v11602_v47, %v3723_v13  ;;  %v3702_v56 = vpop.f32.mrf.mxu1 }
 0x42e   :  { %3974 = vst [vmem:[#allocation4 + $0xa8] sm:$0x7] %v3932_v5  ;;  %v3843_v57 = vmax.f32 %v3803_v23, %v3823_v16  ;;  %v3824_v10 = vmul.f32 0.2, %v3804_v32  ;;  %v3766_v1 = vmul.f32 %v11621_v38, %v3724_v0  ;;  %v3727_v35 = vadd.f32 %v3701_v27, %v11450_v44 }
 0x42f   :  { %v3807_v48 = vadd.f32 %v11613_v15, %v3765_v50  ;;  %v3703_v20 = vadd.f32 %v3702_v56, %v11485_v8  ;;  %v3704_v37 = vpop.f32.mrf.mxu1  ;;  %v4106_v50 = vld [vmem:[#allocation4 + $0x8] sm:$0xfe] }
 0x430   :  { %3863 = vst [vmem:[%s12482_s21 + $0x10] sm:$0xff] %v3843_v57  ;;  %v3903_v62 = vrot.slane %v3843_v57, 7  ;;  %v3844_v12 = vmax.f32 %v3804_v32, %v3824_v10  ;;  %v3808_v42 = vadd.f32 %v11633_v63, %v3766_v1  ;;  %v3769_v33 = vmul.f32 %v11602_v47, %v3727_v35  ;;  %v12555_v32 = vld [vmem:[#allocation25_spill] sm:$0xff] }
 0x431   :  { %v3827_v44 = vmul.f32 0.2, %v3807_v48  ;;  %v3728_v24 = vadd.f32 %v3703_v20, %v12549_v34  ;;  %v3705_v2 = vadd.f32 %v3704_v37, %v12550_v46  ;;  %v3706_v26 = vpop.f32.mrf.mxu1  ;;  %v12556_v10 = vld [vmem:[#allocation21_spill] sm:$0xff]  ;;  %v4105_v20 = vld [vmem:[#allocation4] sm:$0xfe] }
 0x432   :  { %3959 = vst [vmem:[#allocation4 + $0x10] sm:$0xfe] %v3903_v62  ;;  %3864 = vst [vmem:[%s12482_s21 + $0x18] sm:$0xff] %v3844_v12  ;;  %v3904_v8 = vrot.slane %v3844_v12, 7  ;;  %v3828_v30 = vmul.f32 0.2, %v3808_v42  ;;  %v3811_v52 = vadd.f32 %v11613_v15, %v3769_v33  ;;  %v3707_v49 = vadd.f32 %v3706_v26, %v12551_v6 }
 0x433   :  { %v3847_v22 = vmax.f32 %v3807_v48, %v3827_v44  ;;  %v3770_v59 = vmul.f32 %v11621_v38, %v3728_v24  ;;  %v3731_v21 = vadd.f32 %v3705_v2, %v12552_v19  ;;  %v3710_v54 = vpop.f32.mrf.mxu1  ;;  %v4116_v12 = vpack.c.bf16 %v11588_v51, %v4106_v50 }
 0x434   :  { %3960 = vst [vmem:[#allocation4 + $0x18] sm:$0xfe] %v3904_v8  ;;  %v3848_v28 = vmax.f32 %v3808_v42, %v3828_v30  ;;  %v3831_v45 = vmul.f32 0.2, %v3811_v52  ;;  %v3732_v4 = vadd.f32 %v3707_v49, %v3003_v29  ;;  %v3711_v61 = vadd.f32 %v3710_v54, %v12553_v25 }
 0x435   :  { %3867 = vst [vmem:[%s12482_s21 + $0x30] sm:$0xff] %v3847_v22  ;;  %v3909_v40 = vrot.slane %v3847_v22, 7  ;;  %v3812_v41 = vadd.f32 %v11633_v63, %v3770_v59  ;;  %v3773_v7 = vmul.f32 %v11602_v47, %v3731_v21  ;;  %v3712_v9 = vpop.f32.mrf.mxu1  ;;  %v4115_v24 = vpack.c.bf16 %v11578_v39, %v4105_v20  ;;  %v4111_v54 = vld [vmem:[#allocation4 + $0xa8] sm:$0x7] }
 0x436   :  { %3868 = vst [vmem:[%s12482_s21 + $0x38] sm:$0xff] %v3848_v28  ;;  %v3911_v17 = vrot.slane %v3848_v28, 7  ;;  %v3851_v23 = vmax.f32 %v3811_v52, %v3831_v45  ;;  %v3774_v60 = vmul.f32 %v11621_v38, %v3732_v4  ;;  %v3735_v55 = vadd.f32 %v3711_v61, %v12554_v18 }
 0x437   :  { %v11691_v13 = vsel %vm750_vm8, %v3903_v62, %v3909_v40  ;;  %v3832_v3 = vmul.f32 0.2, %v3812_v41  ;;  %v3815_v16 = vadd.f32 %v11613_v15, %v3773_v7  ;;  %v3713_v0 = vadd.f32 %v3712_v9, %v12555_v32  ;;  %v3714_v27 = vpop.f32.mrf.mxu1 }
 0x438   :  { %v11696_v53 = vsel %vm750_vm8, %v3904_v8, %v3911_v17  ;;  %3871 = vst [vmem:[%s12482_s21 + $0x50] sm:$0xff] %v3851_v23  ;;  %v3917_v14 = vrot.slane %v3851_v23, 7  ;;  %v3816_v36 = vadd.f32 %v11633_v63, %v3774_v60  ;;  %v3777_v5 = vmul.f32 %v11602_v47, %v3735_v55 }
 0x439   :  { %v3852_v56 = vmax.f32 %v3812_v41, %v3832_v3  ;;  %v3835_v57 = vmul.f32 0.2, %v3815_v16  ;;  %v3736_v1 = vadd.f32 %v3713_v0, %v12556_v10  ;;  %v3715_v35 = vpop.f32.mrf.mxu1  ;;  %v4107_v46 = vld [vmem:[#allocation4 + $0x10] sm:$0xfe]  ;;  %v12557_v8 = vmov 0.0  }
 0x43a   :  { %v3918_v31 = vsel %vm750_vm8, %v3909_v40, %v3917_v14  ;;  %v3836_v58 = vmul.f32 0.2, %v3816_v36  ;;  %v3819_v48 = vadd.f32 %v11613_v15, %v3777_v5  ;;  %v4209_v6 = vshll.u32 %v4116_v12, 16 }
 0x43b   :  { %3967 = vst [vmem:[#allocation4 + $0x60] sm:$0xff] %v3918_v31  ;;  %3872 = vst [vmem:[%s12482_s21 + $0x58] sm:$0xff] %v3852_v56  ;;  %v3919_v37 = vrot.slane %v3852_v56, 7  ;;  %v3855_v62 = vmax.f32 %v3815_v16, %v3835_v57  ;;  %v3778_v47 = vmul.f32 %v11621_v38, %v3736_v1  ;;  %v4108_v42 = vld [vmem:[#allocation4 + $0x18] sm:$0xfe]  ;;  %v4117_v59 = vpack.c.bf16 %v11691_v13, %v4107_v46 }
 0x43c   :  { %v3856_v33 = vmax.f32 %v3816_v36, %v3836_v58  ;;  %v3839_v29 = vmul.f32 0.2, %v3819_v48  ;;  %v4118_v26 = vpack.c.bf16 %v11696_v53, %v4108_v42  ;;  %v4197_v21 = vshll.u32 %v4115_v24, 16  ;;  %v4110_v1 = vld [vmem:[#allocation4 + $0xa0] sm:$0x7] }
 0x43d   :  { %v3920_v44 = vsel %vm750_vm8, %v3911_v17, %v3919_v37  ;;  %3875 = vst [vmem:[%s12482_s21 + $0x70] sm:$0xff] %v3855_v62  ;;  %v3925_v15 = vrot.slane %v3855_v62, 7  ;;  %v3820_v34 = vadd.f32 %v11633_v63, %v3778_v47  ;;  %v4211_v25 = vrot.slane %v4209_v6, 1 }
 0x43e   :  { %3968 = vst [vmem:[#allocation4 + $0x68] sm:$0xff] %v3920_v44  ;;  %3876 = vst [vmem:[%s12482_s21 + $0x78] sm:$0xff] %v3856_v33  ;;  %v3927_v38 = vrot.slane %v3856_v33, 7  ;;  %v3859_v2 = vmax.f32 %v3819_v48, %v3839_v29  ;;  %v4233_v45 = vshll.u32 %v4118_v26, 16  ;;  %v11737_v61 = vpack.c.bf16 %v4111_v54, %v4111_v54 }
 0x43f   :  { %3982 = vst.msk [vmem:[#allocation4 + $0x51] ss:$8 sm:$0xf] %vm11347_vm12, %v12557_v8  ;;  %3985 = vst.msk [vmem:[#allocation4 + $0x52] ss:$8 sm:$0xf] %vm11347_vm12, %v12557_v8  ;;  %v3926_v63 = vsel %vm750_vm8, %v3917_v14, %v3925_v15  ;;  %v11758_v44 = vpack.c.bf16 %v4110_v1, %v4110_v1 }
 0x440   :  { %v3840_v52 = vmul.f32 0.2, %v3820_v34  ;;  %v3928_v49 = vsel %vm750_vm8, %v3919_v37, %v3927_v38  ;;  %3879 = vst [vmem:[%s12482_s21 + $0x90] sm:$0x3] %v3859_v2  ;;  %v3933_v22 = vrot.slane %v3859_v2, 7  ;;  %v4221_v40 = vshll.u32 %v4117_v59, 16 }
 0x441   :  { %v4207_v7 = vshrl.u32 %v4116_v12, 16  ;;  %v4199_v9 = vrot.slane %v4197_v21, 1  ;;  %v4195_v60 = vshrl.u32 %v4115_v24, 16  ;;  %v4235_v55 = vrot.slane %v4233_v45, 1  ;;  %v9440_v12 = vld [vmem:[#allocation7 + $0x430] ss:$8 sps:$4 sm:$0xff]  }
 0x442   :  { %v3860_v19 = vmax.f32 %v3820_v34, %v3840_v52  ;;  %v3934_v28 = vsel %vm750_vm8, %v3925_v15, %v3933_v22  ;;  %v4266_v14 = vshll.u32 %v11737_v61, 16  ;;  %v4231_v36 = vshrl.u32 %v4118_v26, 16  ;;  %v9454_v26 = vld [vmem:[#allocation7 + $0x424] ss:$8 sps:$4 sm:$0xff]   ;;  %v9452_v22 = vld [vmem:[#allocation7 + $0x420] ss:$8 sps:$4 sm:$0xff]  }
 0x443   :  { %3975 = vst [vmem:[#allocation4 + $0xb0] sm:$0x7] %v3934_v28  ;;  %v4212_v16 = vor.u32 %v4211_v25, %v4207_v7  ;;  %v4223_v50 = vrot.slane %v4221_v40, 1  ;;  %v4200_v57 = vor.u32 %v4199_v9, %v4195_v60  ;;  %v4219_v31 = vshrl.u32 %v4117_v59, 16  ;;  %v9448_v52 = vld [vmem:[#allocation7 + $0x64] ss:$8 sps:$4 sm:$0xff]  }
 0x444   :  { %3880 = vst [vmem:[%s12482_s21 + $0x98] sm:$0x3] %v3860_v19  ;;  %v3935_v4 = vrot.slane %v3860_v19, 7  ;;  %v4236_v35 = vor.u32 %v4235_v55, %v4231_v36  ;;  %v4268_v42 = vrot.slane %v4266_v14, 1  ;;  %v11766_v59 = vld [vmem:[#allocation4 + $0x48] sm:$0xff]  ;;  %v4258_v28 = vshll.u32 %v11758_v44, 16 }
 0x445   :  { %v4224_v33 = vor.u32 %v4223_v50, %v4219_v31  ;;  %v4109_v45 = vld [vmem:[#allocation4 + $0x20] sm:$0xfe]  ;;  %v4297_v60 = vshrl.u32 %v11737_v61, 16  ;;  %v9457_v1 = vld [vmem:[#allocation7 + $0x44] ss:$8 sps:$4 sm:$0xff]  }
 0x446   :  { %v3936_v41 = vsel %vm750_vm8, %v3927_v38, %v3935_v4  ;;  %v4008_v17 = vld [vmem:[#allocation4 + $0x58] sm:$0xff]  ;;  %v4007_v23 = vld [vmem:[#allocation4 + $0x50] sm:$0xff]  ;;  %v4010_v18 = vld [vmem:[#allocation4 + $0x68] sm:$0xff] }
 0x447   :  { %3976 = vst [vmem:[#allocation4 + $0xb8] sm:$0x7] %v3936_v41  ;;  %v11741_v3 = vpack.c.bf16 %v11636_v11, %v4008_v17  ;;  %v11744_v32 = vpack.c.bf16 %v11630_v43, %v4007_v23  ;;  %v11746_v0 = vpack.c.bf16 %v3928_v49, %v4010_v18  ;;  %v4009_v27 = vld [vmem:[#allocation4 + $0x60] sm:$0xff]  ;;  %v9446_v4 = vld [vmem:[#allocation7 + $0x60] ss:$8 sps:$4 sm:$0xff]   ;;  %v4119_v18 = vpack.c.bf16 %v11766_v59, %v4109_v45 }
 0x448   :  { %v11749_v5 = vpack.c.bf16 %v3926_v63, %v4009_v27  ;;  %v9443_v38 = vld [vmem:[#allocation7 + $0x70] ss:$8 sps:$4 sm:$0xff]   ;;  %v9451_v9 = vld [vmem:[#allocation7 + $0x54] ss:$8 sps:$4 sm:$0xff]   ;;  %v4299_v36 = vor.u32 %v4297_v60, %v4268_v42  ;;  %v9455_v31 = vld [vmem:[#allocation7 + $0x40] ss:$8 sps:$4 sm:$0xff]  }
 0x449   :  { %v4214_v56 = vshll.u32 %v11741_v3, 16  ;;  %v4202_v10 = vshll.u32 %v11744_v32, 16  ;;  %v4238_v11 = vshll.u32 %v11746_v0, 16  ;;  %v4262_v43 = vshrl.u32 %v11741_v3, 16  ;;  %v9466_v23 = vld [vmem:[#allocation7 + $0x174] ss:$8 sps:$4 sm:$0xff]  }
 0x44a   :  { %v4226_v58 = vshll.u32 %v11749_v5, 16  ;;  %v4112_v48 = vld [vmem:[#allocation4 + $0xb0] sm:$0x7]  ;;  %v4278_v19 = vshrl.u32 %v11746_v0, 16  ;;  %v4254_v54 = vshrl.u32 %v11744_v32, 16  ;;  %v4270_v25 = vshrl.u32 %v11749_v5, 16 }
 0x44b   :  { %v4216_v20 = vrot.slane %v4214_v56, 1  ;;  %v4204_v37 = vrot.slane %v4202_v10, 1  ;;  %v4240_v62 = vrot.slane %v4238_v11, 1  ;;  %v11756_v47 = vpack.c.bf16 %v4112_v48, %v4112_v48  ;;  %v9449_v50 = vld [vmem:[#allocation7 + $0x50] ss:$8 sps:$4 sm:$0xff]   ;;  %v4011_v56 = vld [vmem:[#allocation4 + $0x70] sm:$0xff] }
 0x44c   :  { %v4228_v29 = vrot.slane %v4226_v58, 1  ;;  %v9460_v58 = vld [vmem:[#allocation7 + $0x34] ss:$8 sps:$4 sm:$0xff]   ;;  %v4294_v48 = vshrl.u32 %v11758_v44, 16  ;;  %v12559_v44 = vmov 0  }
 0x44d   :  { %v4217_v15 = vsel %vm160_vm2, %v4212_v16, %v4216_v20  ;;  %v4205_v34 = vsel %vm160_vm2, %v4200_v57, %v4204_v37  ;;  %v4264_v24 = vor.u32 %v4262_v43, %v4216_v20  ;;  %v4241_v46 = vsel %vm160_vm2, %v4236_v35, %v4240_v62  ;;  %v4016_v57 = vld [vmem:[#allocation4 + $0x98] sm:$0xff] }
 0x44e   :  { %v4113_v2 = vld [vmem:[#allocation4 + $0xb8] sm:$0x7]  ;;  %4702 = vmatprep.mubr.bf16.mxu1 %v4217_v15  ;;  %4763 = vmatprep.mubr.bf16.mxu0 %v4241_v46  ;;  %v4229_v30 = vsel %vm160_vm2, %v4224_v33, %v4228_v29  ;;  %v4274_v6 = vshll.u32 %v11756_v47, 16  ;;  %v4280_v40 = vor.u32 %v4278_v19, %v4240_v62  ;;  %v4256_v7 = vor.u32 %v4254_v54, %v4204_v37  ;;  %v3998_v37 = vld [vmem:[#allocation4 + $0x8] sm:$0xff]  ;;  %v9463_v46 = vld [vmem:[#allocation7 + $0x24] ss:$8 sps:$4 sm:$0xff]  }
 0x44f   :  { %v4123_v63 = vpack.c.bf16 %v4113_v2, %v4113_v2  ;;  %4703 = vmatmul.mubr.bf16.vlgmr.msra.gmra.mxu1 %v4205_v34  ;;  %v4269_v49 = vsel %vm160_vm2, %v4264_v24, %v4268_v42  ;;  %4764 = vmatmul.mubr.bf16.vlgmr.msra.gmra.mxu0 %v4229_v30  ;;  %v4260_v16 = vrot.slane %v4258_v28, 1  ;;  %v4272_v27 = vor.u32 %v4270_v25, %v4228_v29  ;;  %v9458_v29 = vld [vmem:[#allocation7 + $0x30] ss:$8 sps:$4 sm:$0xff]   ;;  %v9469_v30 = vld [vmem:[#allocation7 + $0x14] ss:$8 sps:$4 sm:$0xff]  }
 0x450   :  { %4712 = vmatprep.mubr.bf16.mxu1 %v4269_v49  ;;  %4805 = vmatpush1.bf16.msra.mxu1 %v9440_v12  ;;  %v4276_v17 = vrot.slane %v4274_v6, 1  ;;  %v11777_v43 = vpack.c.bf16 %v4016_v57, %v4011_v56  ;;  %v4245_v35 = vshll.u32 %v4119_v18, 16  ;;  %v4300_v20 = vshrl.u32 %v11756_v47, 16  ;;  %v4114_v34 = vld [vmem:[#allocation4 + $0xc0] sm:$0x7] }
 0x451   :  { %v4282_v21 = vshll.u32 %v4123_v63, 16  ;;  %5202 = vmatpush1.bf16.msra.mxu0 %v9443_v38  ;;  %4806 = vmatprep.subr.bf16.mxu1 %v9454_v26  ;;  %v4303_v14 = vshrl.u32 %v4123_v63, 16  ;;  %v4261_v10 = vsel %vm160_vm2, %v4256_v7, %v4260_v16  ;;  %v4243_v62 = vshrl.u32 %v4119_v18, 16  ;;  %v9461_v26 = vld [vmem:[#allocation7 + $0x20] ss:$8 sps:$4 sm:$0xff]  }
 0x452   :  { %5203 = vmatprep.subr.bf16.mxu0 %v9448_v52  ;;  %v4277_v11 = vsel %vm160_vm2, %v4272_v27, %v4276_v17  ;;  %v4247_v12 = vrot.slane %v4245_v35, 1  ;;  %v4250_v42 = vshll.u32 %v11777_v43, 16  ;;  %v4296_v33 = vor.u32 %v4294_v48, %v4260_v16  ;;  %v9464_v63 = vld [vmem:[#allocation7 + $0x170] ss:$8 sps:$4 sm:$0xff]   ;;  %v9472_v19 = vld [vmem:[#allocation7 + $0x164] ss:$8 sps:$4 sm:$0xff]  }
 0x453   :  { %v4284_v41 = vrot.slane %v4282_v21, 1  ;;  %v4302_v15 = vor.u32 %v4300_v20, %v4276_v17  ;;  %v4023_v24 = vpack.c.bf16 %v11588_v51, %v3998_v37  ;;  %v4124_v2 = vpack.c.bf16 %v4114_v34, %v4114_v34  ;;  %v9475_v21 = vld [vmem:[#allocation7 + $0x4] ss:$8 sps:$4 sm:$0xff]   ;;  %v9470_v54 = vld [vmem:[#allocation7 + $0x160] ss:$8 sps:$4 sm:$0xff]  }
 0x454   :  { %4807 = vmatpush1.bf16.msra.mxu1 %v9452_v22  ;;  %v4248_v47 = vor.u32 %v4247_v12, %v4243_v62  ;;  %v4252_v38 = vrot.slane %v4250_v42, 1  ;;  %v4286_v6 = vshrl.u32 %v11777_v43, 16  ;;  %v9467_v22 = vld [vmem:[#allocation7 + $0x10] ss:$8 sps:$4 sm:$0xff]   ;;  %v9478_v25 = vld [vmem:[#allocation7 + $0x154] ss:$8 sps:$4 sm:$0xff]  }
 0x455   :  { %v4285_v55 = vsel %vm160_vm2, %v4280_v40, %v4284_v41  ;;  %5204 = vmatpush1.bf16.msra.mxu0 %v9446_v4  ;;  %v4305_v61 = vor.u32 %v4303_v14, %v4284_v41  ;;  %5262 = vmatprep.subr.bf16.mxu1 %v9466_v23  ;;  %v4290_v49 = vshll.u32 %v4124_v2, 16  ;;  %v9473_v4 = vld [vmem:[#allocation7] ss:$8 sps:$4 sm:$0xff]   ;;  %v9481_v40 = vld [vmem:[#allocation7 + $0xf4] ss:$8 sps:$4 sm:$0xff]   ;;  %v4306_v60 = vshrl.u32 %v4124_v2, 16 }
 0x456   :  { %4773 = vmatprep.mubr.bf16.mxu0 %v4285_v55  ;;  %5205 = vmatprep.subr.bf16.mxu0 %v9451_v9  ;;  %v4253_v52 = vsel %vm160_vm2, %v4248_v47, %v4252_v38  ;;  %v4288_v28 = vor.u32 %v4286_v6, %v4252_v38  ;;  %v9476_v41 = vld [vmem:[#allocation7 + $0x150] ss:$8 sps:$4 sm:$0xff]   ;;  %v9484_v17 = vld [vmem:[#allocation7 + $0x144] ss:$8 sps:$4 sm:$0xff]   ;;  %v9482_v18 = vld [vmem:[#allocation7 + $0x140] ss:$8 sps:$4 sm:$0xff]  }
 0x457   :  { %4713 = vmatmul.mubr.bf16.gmra.mxu1 %v4261_v10  ;;  %4774 = vmatmul.mubr.bf16.gmra.mxu0 %v4277_v11  ;;  %v4292_v45 = vrot.slane %v4290_v49, 1  ;;  %v9479_v9 = vld [vmem:[#allocation7 + $0xf0] ss:$8 sps:$4 sm:$0xff]   ;;  %v9487_v23 = vld [vmem:[#allocation7 + $0xe4] ss:$8 sps:$4 sm:$0xff]  }
 0x458   :  { %4722 = vmatprep.mubr.bf16.mxu1 %v4299_v36  ;;  %4783 = vmatprep.mubr.bf16.mxu0 %v4305_v61  ;;  %v9485_v55 = vld [vmem:[#allocation7 + $0xe0] ss:$8 sps:$4 sm:$0xff]   ;;  %v9490_v16 = vld [vmem:[#allocation7 + $0x134] ss:$8 sps:$4 sm:$0xff]   ;;  %v9491_v56 = vld [vmem:[#allocation7 + $0xd0] ss:$8 sps:$4 sm:$0xff]  }
 0x459   :  { %5206 = vmatpush1.bf16.msra.mxu0 %v9449_v50  ;;  %v4293_v7 = vsel %vm160_vm2, %v4288_v28, %v4292_v45  ;;  %v9493_v27 = vld [vmem:[#allocation7 + $0xd4] ss:$8 sps:$4 sm:$0xff]   ;;  %v4308_v14 = vor.u32 %v4306_v60, %v4292_v45  ;;  %v4000_v36 = vld [vmem:[#allocation4 + $0x18] sm:$0xff]  ;;  %v9488_v50 = vld [vmem:[#allocation7 + $0x130] ss:$8 sps:$4 sm:$0xff]  }
 0x45a   :  { %5207 = vmatprep.subr.bf16.mxu0 %v9457_v1  ;;  %v9496_v57 = vld [vmem:[#allocation7 + $0x124] ss:$8 sps:$4 sm:$0xff]   ;;  %v4025_v10 = vpack.c.bf16 %v11696_v53, %v4000_v36  ;;  %v9494_v61 = vld [vmem:[#allocation7 + $0x120] ss:$8 sps:$4 sm:$0xff]   ;;  %v9502_v35 = vld [vmem:[#allocation7 + $0x114] ss:$8 sps:$4 sm:$0xff]  }
 0x45b   :  { %v9499_v11 = vld [vmem:[#allocation7 + $0xc4] ss:$8 sps:$4 sm:$0xff]   ;;  %v9497_v1 = vld [vmem:[#allocation7 + $0xc0] ss:$8 sps:$4 sm:$0xff]   ;;  %v9503_v48 = vld [vmem:[#allocation7 + $0xb0] ss:$8 sps:$4 sm:$0xff]  }
 0x45c   :  { %v9508_v20 = vld [vmem:[#allocation7 + $0x104] ss:$8 sps:$4 sm:$0xff]   ;;  %v9506_v62 = vld [vmem:[#allocation7 + $0x100] ss:$8 sps:$4 sm:$0xff]   ;;  %v9514_v42 = vld [vmem:[#allocation7 + $0x1f4] ss:$8 sps:$4 sm:$0xff]  }
 0x45d   :  { %5208 = vmatpush1.bf16.msra.mxu0 %v9455_v31  ;;  %v9505_v31 = vld [vmem:[#allocation7 + $0xb4] ss:$8 sps:$4 sm:$0xff]   ;;  %v9511_v37 = vld [vmem:[#allocation7 + $0xa4] ss:$8 sps:$4 sm:$0xff]   ;;  %v9509_v12 = vld [vmem:[#allocation7 + $0xa0] ss:$8 sps:$4 sm:$0xff]  }
 0x45e   :  { %5209 = vmatprep.subr.bf16.mxu0 %v9460_v58  ;;  %v9500_v58 = vld [vmem:[#allocation7 + $0x110] ss:$8 sps:$4 sm:$0xff]   ;;  %v9520_v34 = vld [vmem:[#allocation7 + $0x1e4] ss:$8 sps:$4 sm:$0xff]   ;;  %v9521_v47 = vld [vmem:[#allocation7 + $0x80] ss:$8 sps:$4 sm:$0xff]  }
 0x45f   :  { %4723 = vmatmul.mubr.bf16.gmra.mxu1 %v4296_v33  ;;  %4784 = vmatmul.mubr.bf16.gmra.mxu0 %v4302_v15  ;;  %v9517_v33 = vld [vmem:[#allocation7 + $0x94] ss:$8 sps:$4 sm:$0xff]   ;;  %v9515_v15 = vld [vmem:[#allocation7 + $0x90] ss:$8 sps:$4 sm:$0xff]   ;;  %v9547_v49 = vld [vmem:[#allocation7 + $0x204] ss:$8 sps:$4 sm:$0xff]  }
 0x460   :  { %5233 = vmatprep.mubr.bf16.mxu0 %v4023_v24  ;;  %4824 = vmatprep.mubr.bf16.mxu1 %v12559_v44  ;;  %v9523_v24 = vld [vmem:[#allocation7 + $0x84] ss:$8 sps:$4 sm:$0xff]   ;;  %v9526_v38 = vld [vmem:[#allocation7 + $0x1d4] ss:$8 sps:$4 sm:$0xff]   ;;  %v9539_v6 = vld [vmem:[#allocation7 + $0x210] ss:$8 sps:$4 sm:$0xff]  }
 0x461   :  { %5210 = vmatpush1.bf16.msra.mxu0 %v9458_v29  ;;  %v9512_v29 = vld [vmem:[#allocation7 + $0x1f0] ss:$8 sps:$4 sm:$0xff]   ;;  %v9541_v2 = vld [vmem:[#allocation7 + $0x214] ss:$8 sps:$4 sm:$0xff]   ;;  %v9556_v36 = vld [vmem:[#allocation7 + $0x4a4] ss:$8 sps:$4 sm:$0xff]  }
 0x462   :  { %5211 = vmatprep.subr.bf16.mxu0 %v9463_v46  ;;  %v9518_v46 = vld [vmem:[#allocation7 + $0x1e0] ss:$8 sps:$4 sm:$0xff]   ;;  %v9530_v28 = vld [vmem:[#allocation7 + $0x1b0] ss:$8 sps:$4 sm:$0xff]   ;;  %v9550_v60 = vld [vmem:[#allocation7 + $0x4b4] ss:$8 sps:$4 sm:$0xff]  }
 0x463   :  { %v4018_v45 = vld [vmem:[#allocation4 + $0xa8] sm:$0x3] }
 0x465   :  { %5212 = vmatpush1.bf16.msra.mxu0 %v9461_v26  ;;  %v3997_v26 = vld [vmem:[#allocation4] sm:$0xff] }
 0x466   :  { %5213 = vmatprep.subr.bf16.mxu0 %v9469_v30  ;;  %v9524_v30 = vld [vmem:[#allocation7 + $0x1d0] ss:$8 sps:$4 sm:$0xff]  }
 0x467   :  { %8412 = vmatmul.mubr.msk.bf16.vlgmr.msra.gmra.mxu1 %vm3990_vm13, %v4253_v52  ;;  %v4022_v52 = vpack.c.bf16 %v11578_v39, %v3997_v26  ;;  %v4033_v39 = vpack.c.bf16 %v4018_v45, %v4018_v45  ;;  %v9584_v45 = vld [vmem:[#allocation7 + $0x450] ss:$8 sps:$4 sm:$0xff]  }
 0x468   :  { %5263 = vmatpush1.bf16.msra.mxu1 %v9464_v63  ;;  %4834 = vmatprep.mubr.bf16.mxu1 %v12559_v44  ;;  %v9529_v63 = vld [vmem:[#allocation7 + $0x1c4] ss:$8 sps:$4 sm:$0xff]  }
 0x469   :  { %5214 = vmatpush1.bf16.msra.mxu0 %v9467_v22  ;;  %5264 = vmatprep.subr.bf16.mxu1 %v9472_v19  ;;  %v9527_v22 = vld [vmem:[#allocation7 + $0x1c0] ss:$8 sps:$4 sm:$0xff]   ;;  %v9532_v19 = vld [vmem:[#allocation7 + $0x1b4] ss:$8 sps:$4 sm:$0xff]  }
 0x46a   :  { %5215 = vmatprep.subr.bf16.mxu0 %v9475_v21  ;;  %v9545_v21 = vld [vmem:[#allocation7 + $0x200] ss:$8 sps:$4 sm:$0xff]  }
 0x46c   :  { %5265 = vmatpush1.bf16.msra.mxu1 %v9470_v54  ;;  %v9553_v54 = vld [vmem:[#allocation7 + $0x5b4] ss:$8 sps:$4 sm:$0xff]  }
 0x46d   :  { %5216 = vmatpush1.bf16.msra.mxu0 %v9473_v4  ;;  %5266 = vmatprep.subr.bf16.mxu1 %v9478_v25  ;;  %v9535_v4 = vld [vmem:[#allocation7 + $0x1a4] ss:$8 sps:$4 sm:$0xff]   ;;  %v9533_v25 = vld [vmem:[#allocation7 + $0x1a0] ss:$8 sps:$4 sm:$0xff]  }
 0x46e   :  { %5217 = vmatprep.subr.bf16.mxu0 %v9481_v40  ;;  %v9538_v40 = vld [vmem:[#allocation7 + $0x194] ss:$8 sps:$4 sm:$0xff]  }
 0x46f   :  { %8413 = vmatmul.mubr.msk.bf16.gmra.mxu1 %vm3990_vm13, %v4293_v7  ;;  %v9536_v7 = vld [vmem:[#allocation7 + $0x190] ss:$8 sps:$4 sm:$0xff]  }
 0x470   :  { %5267 = vmatpush1.bf16.msra.mxu1 %v9476_v41  ;;  %4844 = vmatprep.mubr.bf16.mxu1 %v12559_v44  ;;  %v4017_v41 = vld [vmem:[#allocation4 + $0xa0] sm:$0x3] }
 0x471   :  { %5218 = vmatpush2.bf16.msra.mxu0 %v9479_v9  ;;  %5268 = vmatprep.subr.bf16.mxu1 %v9484_v17  ;;  %v9544_v9 = vld [vmem:[#allocation7 + $0x184] ss:$8 sps:$4 sm:$0xff]   ;;  %v4032_v17 = vpack.c.bf16 %v4017_v41, %v4017_v41  ;;  %v9598_v41 = vld [vmem:[#allocation7 + $0x534] ss:$8 sps:$4 sm:$0xff]  }
 0x472   :  { %5219 = vmatprep.subr.bf16.mxu0 %v9487_v23  ;;  %v9542_v23 = vld [vmem:[#allocation7 + $0x180] ss:$8 sps:$4 sm:$0xff]  }
 0x474   :  { %5269 = vmatpush1.bf16.msra.mxu1 %v9482_v18  ;;  %v3999_v18 = vld [vmem:[#allocation4 + $0x10] sm:$0xff] }
 0x475   :  { %5220 = vmatpush2.bf16.msra.mxu0 %v9485_v55  ;;  %5270 = vmatprep.subr.bf16.mxu1 %v9490_v16  ;;  %v4001_v55 = vld [vmem:[#allocation4 + $0x20] sm:$0xff] }
 0x476   :  { %5221 = vmatprep.subr.bf16.mxu0 %v9493_v27  ;;  %v9548_v16 = vld [vmem:[#allocation7 + $0x4b0] ss:$8 sps:$4 sm:$0xff]   ;;  %v4024_v27 = vpack.c.bf16 %v11691_v13, %v3999_v18  ;;  %v9607_v18 = vld [vmem:[#allocation7 + $0x624] ss:$8 sps:$4 sm:$0xff]  }
 0x477   :  { %8414 = vmatmul.mubr.msk.bf16.gmra.mxu1 %vm3990_vm13, %v4308_v14  ;;  %v4026_v14 = vpack.c.bf16 %v11766_v59, %v4001_v55  ;;  %v9602_v55 = vld [vmem:[#allocation7 + $0x520] ss:$8 sps:$4 sm:$0xff]  }
 0x478   :  { %5271 = vmatpush1.bf16.msra.mxu1 %v9488_v50  ;;  %5294 = vmatprep.mubr.bf16.mxu1 %v4025_v10  ;;  %v9551_v50 = vld [vmem:[#allocation7 + $0x5b0] ss:$8 sps:$4 sm:$0xff]   ;;  %v9562_v10 = vld [vmem:[#allocation7 + $0x494] ss:$8 sps:$4 sm:$0xff]  }
 0x479   :  { %5222 = vmatpush2.bf16.msra.mxu0 %v9491_v56  ;;  %5272 = vmatprep.subr.bf16.mxu1 %v9496_v57  ;;  %v9559_v56 = vld [vmem:[#allocation7 + $0x5a4] ss:$8 sps:$4 sm:$0xff]   ;;  %v9554_v57 = vld [vmem:[#allocation7 + $0x4a0] ss:$8 sps:$4 sm:$0xff]  }
 0x47a   :  { %5223 = vmatprep.subr.bf16.mxu0 %v9499_v11  ;;  %v9557_v11 = vld [vmem:[#allocation7 + $0x5a0] ss:$8 sps:$4 sm:$0xff]  }
 0x47c   :  { %5273 = vmatpush1.bf16.msra.mxu1 %v9494_v61  ;;  %v4020_v61 = vld [vmem:[#allocation4 + $0xb8] sm:$0x3] }
 0x47d   :  { %5224 = vmatpush2.bf16.msra.mxu0 %v9497_v1  ;;  %5274 = vmatprep.subr.bf16.mxu1 %v9502_v35  ;;  %v9565_v1 = vld [vmem:[#allocation7 + $0x594] ss:$8 sps:$4 sm:$0xff]   ;;  %v9560_v35 = vld [vmem:[#allocation7 + $0x490] ss:$8 sps:$4 sm:$0xff]  }
 0x47e   :  { %5225 = vmatprep.subr.bf16.mxu0 %v9505_v31  ;;  %v9568_v31 = vld [vmem:[#allocation7 + $0x484] ss:$8 sps:$4 sm:$0xff]  }
 0x480   :  { %5275 = vmatpush1.bf16.msra.mxu1 %v9500_v58  ;;  %v4035_v58 = vpack.c.bf16 %v4020_v61, %v4020_v61  ;;  %v9617_v61 = vld [vmem:[#allocation7 + $0x600] ss:$8 sps:$4 sm:$0xff]  }
 0x481   :  { %5226 = vmatpush2.bf16.msra.mxu0 %v9503_v48  ;;  %5276 = vmatprep.subr.bf16.mxu1 %v9508_v20  ;;  %v9563_v48 = vld [vmem:[#allocation7 + $0x590] ss:$8 sps:$4 sm:$0xff]  }
 0x482   :  { %5227 = vmatprep.subr.bf16.mxu0 %v9511_v37  ;;  %v5385_v20 = vld [vmem:[#allocation4 + $0x8] sm:$0xfc]  ;;  %v9571_v37 = vld [vmem:[#allocation7 + $0x584] ss:$8 sps:$4 sm:$0xff]  }
 0x484   :  { %5277 = vmatpush1.bf16.msra.mxu1 %v9506_v62  ;;  %v9566_v62 = vld [vmem:[#allocation7 + $0x480] ss:$8 sps:$4 sm:$0xff]  }
 0x485   :  { %5228 = vmatpush2.bf16.msra.mxu0 %v9509_v12  ;;  %5278 = vmatprep.subr.bf16.mxu1 %v9514_v42  ;;  %v5387_v12 = vld [vmem:[#allocation4 + $0x18] sm:$0xfc]  ;;  %v9574_v42 = vld [vmem:[#allocation7 + $0x474] ss:$8 sps:$4 sm:$0xff]  }
 0x486   :  { %5229 = vmatprep.subr.bf16.mxu0 %v9517_v33  ;;  %v5395_v33 = vpack.c.bf16 %v11588_v51, %v5385_v20  ;;  %v5498_v51 = vrot.slane %v11746_v0, 1  ;;  %v9626_v20 = vld [vmem:[#allocation7 + $0x4e0] ss:$8 sps:$4 sm:$0xff]  }
 0x488   :  { %5279 = vmatpush2.bf16.msra.mxu1 %v9512_v29  ;;  %v9569_v29 = vld [vmem:[#allocation7 + $0x580] ss:$8 sps:$4 sm:$0xff]   ;;  %v5491_v26 = vrot.slane %v5395_v33, 1  ;;  %v9640_v33 = vld [vmem:[#allocation7 + $0x4c4] ss:$8 sps:$4 sm:$0xff]  }
 0x489   :  { %5230 = vmatpush2.bf16.msra.mxu0 %v9515_v15  ;;  %5280 = vmatprep.subr.bf16.mxu1 %v9520_v34  ;;  %v4019_v15 = vld [vmem:[#allocation4 + $0xb0] sm:$0x3]  ;;  %v4021_v34 = vld [vmem:[#allocation4 + $0xc0] sm:$0x3] }
 0x48a   :  { %5231 = vmatprep.subr.bf16.mxu0 %v9523_v24  ;;  %v5492_v24 = vrot.slane %v11741_v3, 1 }
 0x48c   :  { %5281 = vmatpush2.bf16.msra.mxu1 %v9518_v46  ;;  %v9577_v46 = vld [vmem:[#allocation7 + $0x574] ss:$8 sps:$4 sm:$0xff]  }
 0x48d   :  { %5232 = vmatpush2.bf16.msra.mxu0 %v9521_v47  ;;  %5282 = vmatprep.subr.bf16.mxu1 %v9526_v38  ;;  %v5397_v47 = vpack.c.bf16 %v11696_v53, %v5387_v12  ;;  %v9572_v38 = vld [vmem:[#allocation7 + $0x470] ss:$8 sps:$4 sm:$0xff]   ;;  %v9578_v53 = vld [vmem:[#allocation7 + $0x460] ss:$8 sps:$4 sm:$0xff]   ;;  %v9637_v12 = vld [vmem:[#allocation7 + $0x5d4] ss:$8 sps:$4 sm:$0xff]  }
 0x48e   :  { %5335 = vmatprep.subr.bf16.mxu0 %v9541_v2  ;;  %v4034_v2 = vpack.c.bf16 %v4019_v15, %v4019_v15  ;;  %v9635_v15 = vld [vmem:[#allocation7 + $0x5d0] ss:$8 sps:$4 sm:$0xff]  }
 0x490   :  { %5283 = vmatpush2.bf16.msra.mxu1 %v9524_v30  ;;  %5234 = vmatmul.mubr.bf16.vlgmr.msra.gmra.mxu0 %v4022_v52  ;;  %v4036_v30 = vpack.c.bf16 %v4021_v34, %v4021_v34  ;;  %v9575_v52 = vld [vmem:[#allocation7 + $0x570] ss:$8 sps:$4 sm:$0xff]  }
 0x491   :  { %5243 = vmatprep.mubr.bf16.mxu0 %v11741_v3  ;;  %5284 = vmatprep.subr.bf16.mxu1 %v9529_v63  ;;  %v9580_v63 = vld [vmem:[#allocation7 + $0x464] ss:$8 sps:$4 sm:$0xff]   ;;  %v5390_v34 = vld [vmem:[#allocation4 + $0xa8] sm:$0xf] }
 0x492   :  { %5336 = vmatpush1.bf16.msra.mxu0 %v9539_v6  ;;  %v5493_v6 = vsel %vm542_vm3, %v5491_v26, %v5492_v24  ;;  %v9728_v26 = vld [vmem:[#allocation4 + $0x28] sm:$0xff] }
 0x493   :  { %5337 = vmatprep.subr.bf16.mxu0 %v9547_v49  ;;  %v5497_v49 = vrot.slane %v5397_v47, 1  ;;  %v9643_v47 = vld [vmem:[#allocation7 + $0x5c4] ss:$8 sps:$4 sm:$0xff]  }
 0x494   :  { %5285 = vmatpush2.bf16.msra.mxu1 %v9527_v22  ;;  %v9583_v22 = vld [vmem:[#allocation7 + $0x564] ss:$8 sps:$4 sm:$0xff]  }
 0x495   :  { %5286 = vmatprep.subr.bf16.mxu1 %v9532_v19  ;;  %v5499_v19 = vsel %vm542_vm3, %v5497_v49, %v5498_v51  ;;  %v9641_v49 = vld [vmem:[#allocation7 + $0x5c0] ss:$8 sps:$4 sm:$0xff]  }
 0x496   :  { %5338 = vmatpush1.bf16.msra.mxu0 %v9545_v21  ;;  %v9586_v21 = vld [vmem:[#allocation7 + $0x454] ss:$8 sps:$4 sm:$0xff]  }
 0x497   :  { %5935 = vmatprep.subr.bf16.mxu0 %v9553_v54  ;;  %v9581_v54 = vld [vmem:[#allocation7 + $0x560] ss:$8 sps:$4 sm:$0xff]  }
 0x498   :  { %5287 = vmatpush2.bf16.msra.mxu1 %v9530_v28  ;;  %5244 = vmatmul.mubr.bf16.gmra.mxu0 %v11744_v32  ;;  %v9589_v28 = vld [vmem:[#allocation7 + $0x554] ss:$8 sps:$4 sm:$0xff]  }
 0x499   :  { %5253 = vmatprep.mubr.bf16.mxu0 %v4033_v39  ;;  %5288 = vmatprep.subr.bf16.mxu1 %v9535_v4  ;;  %v9592_v4 = vld [vmem:[#allocation7 + $0x444] ss:$8 sps:$4 sm:$0xff]   ;;  %v9587_v39 = vld [vmem:[#allocation7 + $0x550] ss:$8 sps:$4 sm:$0xff]  }
 0x49c   :  { %5289 = vmatpush2.bf16.msra.mxu1 %v9533_v25  ;;  %v9595_v25 = vld [vmem:[#allocation7 + $0x544] ss:$8 sps:$4 sm:$0xff]  }
 0x49d   :  { %5290 = vmatprep.subr.bf16.mxu1 %v9538_v40  ;;  %v9590_v40 = vld [vmem:[#allocation7 + $0x440] ss:$8 sps:$4 sm:$0xff]  }
 0x4a0   :  { %5291 = vmatpush2.bf16.msra.mxu1 %v9536_v7  ;;  %5254 = vmatmul.mubr.bf16.gmra.mxu0 %v4032_v17  ;;  %v9593_v7 = vld [vmem:[#allocation7 + $0x540] ss:$8 sps:$4 sm:$0xff]   ;;  %v9596_v17 = vld [vmem:[#allocation7 + $0x530] ss:$8 sps:$4 sm:$0xff]  }
 0x4a1   :  { %5292 = vmatprep.subr.bf16.mxu1 %v9544_v9  ;;  %5355 = vmatprep.mubr.bf16.mxu0 %v12559_v44  ;;  %v9601_v9 = vld [vmem:[#allocation7 + $0x634] ss:$8 sps:$4 sm:$0xff]  }
 0x4a4   :  { %5293 = vmatpush2.bf16.msra.mxu1 %v9542_v23  ;;  %v9604_v23 = vld [vmem:[#allocation7 + $0x524] ss:$8 sps:$4 sm:$0xff]  }
 0x4a5   :  { %5874 = vmatprep.subr.bf16.mxu1 %v9550_v60  ;;  %v9599_v60 = vld [vmem:[#allocation7 + $0x630] ss:$8 sps:$4 sm:$0xff]  }
 0x4a7   :  { %5295 = vmatmul.mubr.bf16.vlgmr.msra.gmra.mxu1 %v4024_v27  ;;  %v9605_v27 = vld [vmem:[#allocation7 + $0x620] ss:$8 sps:$4 sm:$0xff]  }
 0x4a8   :  { %5304 = vmatprep.mubr.bf16.mxu1 %v11746_v0  ;;  %5875 = vmatpush1.bf16.msra.mxu1 %v9548_v16  ;;  %v9610_v16 = vld [vmem:[#allocation7 + $0x514] ss:$8 sps:$4 sm:$0xff]  }
 0x4a9   :  { %8483 = vmatmul.mubr.msk.bf16.vlgmr.msra.gmra.mxu0 %vm3990_vm13, %v4026_v14  ;;  %5876 = vmatprep.subr.bf16.mxu1 %v9556_v36  ;;  %v9613_v14 = vld [vmem:[#allocation7 + $0x614] ss:$8 sps:$4 sm:$0xff]   ;;  %v9608_v36 = vld [vmem:[#allocation7 + $0x510] ss:$8 sps:$4 sm:$0xff]  }
 0x4aa   :  { %5936 = vmatpush1.bf16.msra.mxu0 %v9551_v50  ;;  %5365 = vmatprep.mubr.bf16.mxu0 %v12559_v44  ;;  %v9616_v50 = vld [vmem:[#allocation7 + $0x504] ss:$8 sps:$4 sm:$0xff]  }
 0x4ab   :  { %5937 = vmatprep.subr.bf16.mxu0 %v9559_v56  ;;  %v9611_v56 = vld [vmem:[#allocation7 + $0x610] ss:$8 sps:$4 sm:$0xff]  }
 0x4ac   :  { %5877 = vmatpush1.bf16.msra.mxu1 %v9554_v57  ;;  %v9619_v57 = vld [vmem:[#allocation7 + $0x604] ss:$8 sps:$4 sm:$0xff]  }
 0x4ad   :  { %5878 = vmatprep.subr.bf16.mxu1 %v9562_v10  ;;  %v9614_v10 = vld [vmem:[#allocation7 + $0x500] ss:$8 sps:$4 sm:$0xff]  }
 0x4ae   :  { %5938 = vmatpush1.bf16.msra.mxu0 %v9557_v11  ;;  %v9622_v11 = vld [vmem:[#allocation7 + $0x4f4] ss:$8 sps:$4 sm:$0xff]  }
 0x4af   :  { %5305 = vmatmul.mubr.bf16.gmra.mxu1 %v11749_v5  ;;  %5939 = vmatprep.subr.bf16.mxu0 %v9565_v1  ;;  %v9625_v1 = vld [vmem:[#allocation7 + $0x5f4] ss:$8 sps:$4 sm:$0xff]  }
 0x4b0   :  { %5314 = vmatprep.mubr.bf16.mxu1 %v4035_v58  ;;  %5879 = vmatpush1.bf16.msra.mxu1 %v9560_v35  ;;  %v9620_v35 = vld [vmem:[#allocation7 + $0x4f0] ss:$8 sps:$4 sm:$0xff]  }
 0x4b1   :  { %8484 = vmatmul.mubr.msk.bf16.gmra.mxu0 %vm3990_vm13, %v11777_v43  ;;  %5880 = vmatprep.subr.bf16.mxu1 %v9568_v31  ;;  %v9628_v31 = vld [vmem:[#allocation7 + $0x4e4] ss:$8 sps:$4 sm:$0xff]   ;;  %v9623_v58 = vld [vmem:[#allocation7 + $0x5f0] ss:$8 sps:$4 sm:$0xff]  }
 0x4b2   :  { %5940 = vmatpush1.bf16.msra.mxu0 %v9563_v48  ;;  %5375 = vmatprep.mubr.bf16.mxu0 %v12559_v44  ;;  %v9631_v48 = vld [vmem:[#allocation7 + $0x5e4] ss:$8 sps:$4 sm:$0xff]  }
 0x4b3   :  { %5941 = vmatprep.subr.bf16.mxu0 %v9571_v37  ;;  %v9634_v37 = vld [vmem:[#allocation7 + $0x4d4] ss:$8 sps:$4 sm:$0xff]  }
 0x4b4   :  { %5881 = vmatpush1.bf16.msra.mxu1 %v9566_v62  ;;  %v9629_v62 = vld [vmem:[#allocation7 + $0x5e0] ss:$8 sps:$4 sm:$0xff]  }
 0x4b5   :  { %5882 = vmatprep.subr.bf16.mxu1 %v9574_v42  ;;  %v9632_v42 = vld [vmem:[#allocation7 + $0x4d0] ss:$8 sps:$4 sm:$0xff]  }
 0x4b6   :  { %5942 = vmatpush1.bf16.msra.mxu0 %v9569_v29  ;;  %v5384_v29 = vld [vmem:[#allocation4] sm:$0xfc] }
 0x4b7   :  { %5315 = vmatmul.mubr.bf16.gmra.mxu1 %v4034_v2  ;;  %5943 = vmatprep.subr.bf16.mxu0 %v9577_v46  ;;  %v5392_v46 = vld [vmem:[#allocation4 + $0xb8] sm:$0xf] }
 0x4b8   :  { %5883 = vmatpush1.bf16.msra.mxu1 %v9572_v38  ;;  %5906 = vmatprep.mubr.bf16.mxu1 %v5493_v6  ;;  %v5386_v38 = vld [vmem:[#allocation4 + $0x10] sm:$0xfc]  ;;  %v5402_v6 = vpack.c.bf16 %v5392_v46, %v5392_v46 }
 0x4b9   :  { %8485 = vmatmul.mubr.msk.bf16.gmra.mxu0 %vm3990_vm13, %v4036_v30  ;;  %5884 = vmatprep.subr.bf16.mxu1 %v9580_v63  ;;  %v9638_v2 = vld [vmem:[#allocation7 + $0x4c0] ss:$8 sps:$4 sm:$0xff]   ;;  %v5394_v30 = vpack.c.bf16 %v9728_v26, %v5384_v29  ;;  %v9646_v63 = vld [vmem:[#allocation7 + $0x654] ss:$8 sps:$4 sm:$0xff]  }
 0x4ba   :  { %5944 = vmatpush1.bf16.msra.mxu0 %v9575_v52  ;;  %5967 = vmatprep.mubr.bf16.mxu0 %v5499_v19  ;;  %v5400_v52 = vpack.c.bf16 %v5390_v34, %v5390_v34 }
 0x4bb   :  { %5945 = vmatprep.subr.bf16.mxu0 %v9583_v22  ;;  %v5489_v22 = vrot.slane %v11744_v32, 1  ;;  %v5488_v19 = vrot.slane %v5394_v30, 1 }
 0x4bc   :  { %5885 = vmatpush1.bf16.msra.mxu1 %v9578_v53  ;;  %v5396_v53 = vpack.c.bf16 %v11691_v13, %v5386_v38 }
 0x4bd   :  { %5886 = vmatprep.subr.bf16.mxu1 %v9586_v21  ;;  %v9644_v21 = vld [vmem:[#allocation7 + $0x650] ss:$8 sps:$4 sm:$0xff]  }
 0x4be   :  { %5946 = vmatpush1.bf16.msra.mxu0 %v9581_v54  ;;  %v5495_v54 = vrot.slane %v11749_v5, 1 }
 0x4bf   :  { %5947 = vmatprep.subr.bf16.mxu0 %v9589_v28  ;;  %v5389_v28 = vld [vmem:[#allocation4 + $0xa0] sm:$0xf] }
 0x4c0   :  { %5887 = vmatpush1.bf16.msra.mxu1 %v9584_v45  ;;  %v5505_v45 = vrot.slane %v5400_v52, 1  ;;  %v5399_v5 = vpack.c.bf16 %v5389_v28, %v5389_v28 }
 0x4c1   :  { %5888 = vmatprep.subr.bf16.mxu1 %v9592_v4  ;;  %v5509_v4 = vrot.slane %v5402_v6, 1 }
 0x4c2   :  { %5948 = vmatpush1.bf16.msra.mxu0 %v9587_v39  ;;  %v5391_v39 = vld [vmem:[#allocation4 + $0xb0] sm:$0xf]  ;;  %v5506_v13 = vsel %vm542_vm3, %v5492_v24, %v5505_v45 }
 0x4c3   :  { %5949 = vmatprep.subr.bf16.mxu0 %v9595_v25  ;;  %v9649_v25 = vld [vmem:[#allocation7 + $0x644] ss:$8 sps:$4 sm:$0xff]  }
 0x4c4   :  { %5889 = vmatpush1.bf16.msra.mxu1 %v9590_v40  ;;  %v5490_v40 = vsel %vm542_vm3, %v5488_v19, %v5489_v22 }
 0x4c5   :  { %5890 = vmatprep.subr.bf16.mxu1 %v9598_v41  ;;  %v5494_v41 = vrot.slane %v5396_v53, 1 }
 0x4c6   :  { %5950 = vmatpush1.bf16.msra.mxu0 %v9593_v7  ;;  %v5401_v7 = vpack.c.bf16 %v5391_v39, %v5391_v39 }
 0x4c7   :  { %5951 = vmatprep.subr.bf16.mxu0 %v9601_v9  ;;  %v5496_v32 = vsel %vm542_vm3, %v5494_v41, %v5495_v54  ;;  %v9647_v9 = vld [vmem:[#allocation7 + $0x640] ss:$8 sps:$4 sm:$0xff]  }
 0x4c8   :  { %5891 = vmatpush2.bf16.msra.mxu1 %v9596_v17  ;;  %v5510_v17 = vsel %vm542_vm3, %v5498_v51, %v5509_v4 }
 0x4c9   :  { %5892 = vmatprep.subr.bf16.mxu1 %v9604_v23  ;;  %v5503_v23 = vrot.slane %v5399_v5, 1 }
 0x4ca   :  { %5952 = vmatpush2.bf16.msra.mxu0 %v9599_v60  ;;  %v5507_v60 = vrot.slane %v5401_v7, 1 }
 0x4cb   :  { %5953 = vmatprep.subr.bf16.mxu0 %v9607_v18  ;;  %v5504_v3 = vsel %vm542_vm3, %v5489_v22, %v5503_v23  ;;  %v5388_v18 = vld [vmem:[#allocation4 + $0x20] sm:$0xfc] }
 0x4cc   :  { %5893 = vmatpush2.bf16.msra.mxu1 %v9602_v55  ;;  %v5508_v24 = vsel %vm542_vm3, %v5495_v54, %v5507_v60  ;;  %v5398_v0 = vpack.c.bf16 %v11766_v59, %v5388_v18  ;;  %v5501_v55 = vrot.slane %v11777_v43, 1 }
 0x4cd   :  { %5894 = vmatprep.subr.bf16.mxu1 %v9610_v16  ;;  %v5393_v16 = vld [vmem:[#allocation4 + $0xc0] sm:$0xf] }
 0x4ce   :  { %5954 = vmatpush2.bf16.msra.mxu0 %v9605_v27  ;;  %v5500_v51 = vrot.slane %v5398_v0, 1 }
 0x4cf   :  { %5955 = vmatprep.subr.bf16.mxu0 %v9613_v14  ;;  %v5403_v14 = vpack.c.bf16 %v5393_v16, %v5393_v16 }
 0x4d0   :  { %5895 = vmatpush2.bf16.msra.mxu1 %v9608_v36  ;;  %v5502_v27 = vsel %vm542_vm3, %v5500_v51, %v5501_v55 }
 0x4d1   :  { %5896 = vmatprep.subr.bf16.mxu1 %v9616_v50  ;;  %v5511_v36 = vrot.slane %v5403_v14, 1 }
 0x4d2   :  { %5956 = vmatpush2.bf16.msra.mxu0 %v9611_v56 }
 0x4d3   :  { %5957 = vmatprep.subr.bf16.mxu0 %v9619_v57  ;;  %v5512_v50 = vsel %vm542_vm3, %v5501_v55, %v5511_v36 }
 0x4d4   :  { %5897 = vmatpush2.bf16.msra.mxu1 %v9614_v10 }
 0x4d5   :  { %5898 = vmatprep.subr.bf16.mxu1 %v9622_v11 }
 0x4d6   :  { %5958 = vmatpush2.bf16.msra.mxu0 %v9617_v61 }
 0x4d7   :  { %5959 = vmatprep.subr.bf16.mxu0 %v9625_v1 }
 0x4d8   :  { %5899 = vmatpush2.bf16.msra.mxu1 %v9620_v35 }
 0x4d9   :  { %5900 = vmatprep.subr.bf16.mxu1 %v9628_v31 }
 0x4da   :  { %5960 = vmatpush2.bf16.msra.mxu0 %v9623_v58 }
 0x4db   :  { %5961 = vmatprep.subr.bf16.mxu0 %v9631_v48 }
 0x4dc   :  { %5901 = vmatpush2.bf16.msra.mxu1 %v9626_v20 }
 0x4dd   :  { %5902 = vmatprep.subr.bf16.mxu1 %v9634_v37 }
 0x4de   :  { %5962 = vmatpush2.bf16.msra.mxu0 %v9629_v62 }
 0x4df   :  { %5963 = vmatprep.subr.bf16.mxu0 %v9637_v12 }
 0x4e0   :  { %5903 = vmatpush2.bf16.msra.mxu1 %v9632_v42 }
 0x4e1   :  { %5904 = vmatprep.subr.bf16.mxu1 %v9640_v33 }
 0x4e2   :  { %5964 = vmatpush2.bf16.msra.mxu0 %v9635_v15 }
 0x4e3   :  { %5965 = vmatprep.subr.bf16.mxu0 %v9643_v47 }
 0x4e4   :  { %5905 = vmatpush2.bf16.msra.mxu1 %v9638_v2 }
 0x4e5   :  { %6008 = vmatprep.subr.bf16.mxu1 %v9646_v63 }
 0x4e6   :  { %5966 = vmatpush2.bf16.msra.mxu0 %v9641_v49 }
 0x4e7   :  { %5907 = vmatmul.mubr.bf16.vlgmr.msra.gmra.mxu1 %v5490_v40 }
 0x4e8   :  { %5916 = vmatprep.mubr.bf16.mxu1 %v5506_v13  ;;  %6009 = vmatpush1.bf16.msra.mxu1 %v9644_v21 }
 0x4e9   :  { %5968 = vmatmul.mubr.bf16.vlgmr.msra.gmra.mxu0 %v5496_v32  ;;  %6010 = vmatprep.subr.bf16.mxu1 %v9649_v25 }
 0x4ea   :  { %5977 = vmatprep.mubr.bf16.mxu0 %v5510_v17 }
 0x4ec   :  { %6011 = vmatpush1.bf16.msra.mxu1 %v9647_v9 }
 0x4ed   :  { %8873 = vmatprep.subr.bf16.mxu1 %v12557_v8 }
 0x4ef   :  { %5917 = vmatmul.mubr.bf16.gmra.mxu1 %v5504_v3 }
 0x4f0   :  { %5926 = vmatprep.mubr.bf16.mxu1 %v5505_v45 }
 0x4f1   :  { %5978 = vmatmul.mubr.bf16.gmra.mxu0 %v5508_v24 }
 0x4f2   :  { %5987 = vmatprep.mubr.bf16.mxu0 %v5509_v4 }
 0x4f7   :  { %5927 = vmatmul.mubr.bf16.gmra.mxu1 %v5503_v23 }
 0x4f8   :  { %6028 = vmatprep.mubr.bf16.mxu1 %v12559_v44 }
 0x4f9   :  { %5988 = vmatmul.mubr.bf16.gmra.mxu0 %v5507_v60 }
 0x4ff   :  { %8554 = vmatmul.mubr.msk.bf16.vlgmr.msra.gmra.mxu1 %vm3990_vm13, %v5502_v27 }
 0x500   :  { %6038 = vmatprep.mubr.bf16.mxu1 %v12559_v44 }
 0x507   :  { %8555 = vmatmul.mubr.msk.bf16.gmra.mxu1 %vm3990_vm13, %v5512_v50 }
 0x508   :  { %6048 = vmatprep.mubr.bf16.mxu1 %v12559_v44 }
 0x50f   :  { %8556 = vmatmul.mubr.msk.bf16.gmra.mxu1 %vm3990_vm13, %v5511_v36  ;;  %v4704_v59 = vpop.f32.mrf.mxu1  ;;  %v4765_v43 = vpop.f32.mrf.mxu0 }
 0x510   :  { %v4766_v56 = vadd.f32 %v4765_v43, %v4704_v59  ;;  %8875 = vmatprep.mubr.msk.bf16.mxu1 %vm9756_vm15, %v12557_v8 }
 0x511   :  { %v4706_v57 = vpop.f32.mrf.mxu1  ;;  %v4767_v10 = vpop.f32.mrf.mxu0 }
 0x512   :  { %v4768_v11 = vadd.f32 %v4767_v10, %v4706_v57 }
 0x513   :  { %v4708_v61 = vpop.f32.mrf.mxu1  ;;  %v4769_v1 = vpop.f32.mrf.mxu0 }
 0x514   :  { %v4770_v35 = vadd.f32 %v4769_v1, %v4708_v61  ;;  %v9650_v1 = vld [vmem:[%s12560_s27 + $0x100] sm:$0xff]  }
 0x515   :  { %v4710_v31 = vpop.f32.mrf.mxu1  ;;  %v4771_v58 = vpop.f32.mrf.mxu0  ;;  %8759 = vmatprep.subr.bf16.mxu0 %v9650_v1  ;;  %v9668_v1 = vld [vmem:[%s12560_s27 + $0x78] sm:$0xff]  }
 0x516   :  { %v4772_v48 = vadd.f32 %v4771_v58, %v4710_v31  ;;  %v9651_v31 = vld [vmem:[%s12560_s27 + $0xc0] sm:$0xff]  }
 0x517   :  { %v4714_v20 = vpop.f32.mrf.mxu1  ;;  %v4775_v37 = vpop.f32.mrf.mxu0  ;;  %8760 = vmatpush3.bf16.msra.mxu0 %v9651_v31 }
 0x518   :  { %v4776_v62 = vadd.f32 %v4775_v37, %v4714_v20  ;;  %v9652_v20 = vld [vmem:[%s12560_s27 + $0xf8] sm:$0xff]  }
 0x519   :  { %v4716_v12 = vpop.f32.mrf.mxu1  ;;  %v4777_v42 = vpop.f32.mrf.mxu0  ;;  %8761 = vmatprep.subr.bf16.mxu0 %v9652_v20 }
 0x51a   :  { %v4778_v33 = vadd.f32 %v4777_v42, %v4716_v12  ;;  %v9653_v42 = vld [vmem:[%s12560_s27 + $0xb8] sm:$0xff]  }
 0x51b   :  { %v4718_v29 = vpop.f32.mrf.mxu1  ;;  %v4779_v15 = vpop.f32.mrf.mxu0  ;;  %8762 = vmatpush3.bf16.msra.mxu0 %v9653_v42 }
 0x51c   :  { %v4780_v34 = vadd.f32 %v4779_v15, %v4718_v29  ;;  %v9655_v29 = vld [vmem:[%s12560_s27 + $0xf0] sm:$0xff]  }
 0x51d   :  { %v4720_v46 = vpop.f32.mrf.mxu1  ;;  %v4781_v47 = vpop.f32.mrf.mxu0  ;;  %8763 = vmatprep.subr.bf16.mxu0 %v9655_v29 }
 0x51e   :  { %v4782_v38 = vadd.f32 %v4781_v47, %v4720_v46  ;;  %v9656_v46 = vld [vmem:[%s12560_s27 + $0xb0] sm:$0xff]   ;;  %v9657_v47 = vld [vmem:[%s12560_s27 + $0xe8] sm:$0xff]  }
 0x51f   :  { %v4724_v2 = vpop.f32.mrf.mxu1  ;;  %v4785_v26 = vpop.f32.mrf.mxu0  ;;  %8764 = vmatpush3.bf16.msra.mxu0 %v9656_v46 }
 0x520   :  { %v4786_v30 = vadd.f32 %v4785_v26, %v4724_v2  ;;  %8765 = vmatprep.subr.bf16.mxu0 %v9657_v47 }
 0x521   :  { %v4726_v63 = vpop.f32.mrf.mxu1  ;;  %v4787_v52 = vpop.f32.mrf.mxu0 }
 0x522   :  { %v4788_v6 = vadd.f32 %v4787_v52, %v4726_v63 }
 0x523   :  { %v4728_v49 = vpop.f32.mrf.mxu1  ;;  %v4789_v22 = vpop.f32.mrf.mxu0 }
 0x525   :  { %v4729_v53 = vpop.f32.mrf.mxu1  ;;  %v4790_v19 = vpop.f32.mrf.mxu0 }
 0x527   :  { %v4826_v21 = vpop.f32.mrf.mxu1 }
 0x528   :  { %v4827_v54 = vadd.f32 %v4826_v21, %v4766_v56 }
 0x529   :  { %v4828_v28 = vpop.f32.mrf.mxu1 }
 0x52a   :  { %v4829_v45 = vadd.f32 %v4828_v28, %v4768_v11  ;;  %v9660_v28 = vld [vmem:[%s12560_s27 + $0xa0] sm:$0xff]  }
 0x52b   :  { %v4830_v4 = vpop.f32.mrf.mxu1 }
 0x52c   :  { %v4831_v39 = vadd.f32 %v4830_v4, %v4770_v35 }
 0x52d   :  { %v4832_v25 = vpop.f32.mrf.mxu1 }
 0x52e   :  { %v4833_v40 = vadd.f32 %v4832_v25, %v4772_v48 }
 0x52f   :  { %v4836_v41 = vpop.f32.mrf.mxu1 }
 0x530   :  { %v4837_v13 = vadd.f32 %v4836_v41, %v4776_v62 }
 0x531   :  { %v4838_v32 = vpop.f32.mrf.mxu1 }
 0x532   :  { %v4839_v5 = vadd.f32 %v4838_v32, %v4778_v33  ;;  %v9654_v33 = vld [vmem:[%s12560_s27 + $0x108] sm:$0xff]  }
 0x533   :  { %v4840_v7 = vpop.f32.mrf.mxu1  ;;  %8874 = vmatpush3.bf16.msra.mxu1 %v9654_v33 }
 0x534   :  { %v4841_v9 = vadd.f32 %v4840_v7, %v4780_v34  ;;  %8887 = vmatprep.subr.bf16.mxu1 %v12557_v8  ;;  %v9662_v7 = vld [vmem:[%s12560_s27 + $0x98] sm:$0xff]  }
 0x535   :  { %v4842_v17 = vpop.f32.mrf.mxu1 }
 0x536   :  { %v4843_v23 = vadd.f32 %v4842_v17, %v4782_v38 }
 0x537   :  { %v4846_v60 = vpop.f32.mrf.mxu1 }
 0x538   :  { %v4847_v3 = vadd.f32 %v4846_v60, %v4786_v30  ;;  %v9658_v30 = vld [vmem:[%s12560_s27 + $0xa8] sm:$0xff]  }
 0x539   :  { %v4848_v24 = vpop.f32.mrf.mxu1  ;;  %8766 = vmatpush3.bf16.msra.mxu0 %v9658_v30 }
 0x53a   :  { %v4849_v18 = vadd.f32 %v4848_v24, %v4788_v6  ;;  %v9659_v6 = vld [vmem:[%s12560_s27 + $0xe0] sm:$0xff]  }
 0x53b   :  { %v4850_v0 = vpop.f32.mrf.mxu1  ;;  %8767 = vmatprep.subr.bf16.mxu0 %v9659_v6 }
 0x53d   :  { %v4851_v51 = vpop.f32.mrf.mxu1  ;;  %8768 = vmatpush3.bf16.msra.mxu0 %v9660_v28 }
 0x550   :  { %v5235_v55 = vpop.f32.mrf.mxu0 }
 0x551   :  { %v5236_v16 = vadd.f32 %v5235_v55, %v4827_v54  ;;  %v9664_v55 = vld [vmem:[%s12560_s27 + $0x90] sm:$0xff]  }
 0x552   :  { %v5237_v27 = vpop.f32.mrf.mxu0 }
 0x553   :  { %v5238_v14 = vadd.f32 %v5237_v27, %v4829_v45 }
 0x554   :  { %v5239_v36 = vpop.f32.mrf.mxu0 }
 0x555   :  { %v5240_v50 = vadd.f32 %v5239_v36, %v4831_v39  ;;  %v9661_v39 = vld [vmem:[%s12560_s27 + $0xd8] sm:$0xff]  }
 0x556   :  { %v5241_v59 = vpop.f32.mrf.mxu0  ;;  %8769 = vmatprep.subr.bf16.mxu0 %v9661_v39 }
 0x557   :  { %v5242_v43 = vadd.f32 %v5241_v59, %v4833_v40  ;;  %8770 = vmatpush3.bf16.msra.mxu0 %v9662_v7 }
 0x558   :  { %v5245_v56 = vpop.f32.mrf.mxu0 }
 0x559   :  { %v5246_v57 = vadd.f32 %v5245_v56, %v4837_v13 }
 0x55a   :  { %v5247_v10 = vpop.f32.mrf.mxu0 }
 0x55b   :  { %v5248_v11 = vadd.f32 %v5247_v10, %v4839_v5  ;;  %v9666_v10 = vld [vmem:[%s12560_s27 + $0x88] sm:$0xff]  }
 0x55c   :  { %v5249_v61 = vpop.f32.mrf.mxu0 }
 0x55d   :  { %v5250_v35 = vadd.f32 %v5249_v61, %v4841_v9 }
 0x55e   :  { %v5251_v58 = vpop.f32.mrf.mxu0 }
 0x55f   :  { %v11847_v48 = vadd.f32 %v5251_v58, %v4843_v23  ;;  %v9663_v23 = vld [vmem:[%s12560_s27 + $0xd0] sm:$0xff]  }
 0x560   :  { %v5255_v37 = vpop.f32.mrf.mxu0  ;;  %8771 = vmatprep.subr.bf16.mxu0 %v9663_v23 }
 0x561   :  { %v11852_v62 = vadd.f32 %v5255_v37, %v4847_v3  ;;  %8772 = vmatpush3.bf16.msra.mxu0 %v9664_v55 }
 0x562   :  { %v5257_v12 = vpop.f32.mrf.mxu0 }
 0x563   :  { %v11863_v15 = vadd.f32 %v5257_v12, %v4849_v18 }
 0x564   :  { %v5259_v34 = vpop.f32.mrf.mxu0 }
 0x566   :  { %v5260_v38 = vpop.f32.mrf.mxu0 }
 0x567   :  { %v5296_v2 = vpop.f32.mrf.mxu1 }
 0x568   :  { %v5297_v26 = vadd.f32 %v5296_v2, %v5236_v16 }
 0x569   :  { %v5298_v63 = vpop.f32.mrf.mxu1  ;;  %v5357_v52 = vpop.f32.mrf.mxu0 }
 0x56a   :  { %v5299_v49 = vadd.f32 %v5298_v63, %v5238_v14  ;;  %v11880_v22 = vadd.f32 %v5357_v52, %v5297_v26  ;;  %v9665_v14 = vld [vmem:[%s12560_s27 + $0xc8] sm:$0xff]  }
 0x56b   :  { %v5300_v53 = vpop.f32.mrf.mxu1  ;;  %v5359_v19 = vpop.f32.mrf.mxu0  ;;  %8773 = vmatprep.subr.bf16.mxu0 %v9665_v14  ;;  %v12562_v14 = vld [vmem:[#allocation13_spill] sm:$0xff] }
 0x56c   :  { %v5301_v21 = vadd.f32 %v5300_v53, %v5240_v50  ;;  %v11882_v54 = vadd.f32 %v5359_v19, %v5299_v49  ;;  %8774 = vmatpush3.bf16.msra.mxu0 %v9666_v10 }
 0x56d   :  { %v5302_v45 = vpop.f32.mrf.mxu1  ;;  %v5361_v4 = vpop.f32.mrf.mxu0  ;;  %8797 = vmatprep.subr.bf16.mxu0 %v9668_v1 }
 0x56e   :  { %v5303_v25 = vadd.f32 %v5302_v45, %v5242_v43  ;;  %v11890_v40 = vadd.f32 %v5361_v4, %v5301_v21 }
 0x56f   :  { %v5306_v41 = vpop.f32.mrf.mxu1  ;;  %v5363_v13 = vpop.f32.mrf.mxu0 }
 0x570   :  { %v5307_v32 = vadd.f32 %v5306_v41, %v5246_v57  ;;  %v11892_v5 = vadd.f32 %v5363_v13, %v5303_v25  ;;  %v6067_v41 = vld [vmem:[%s12471_s10] sm:$0x3] }
 0x571   :  { %v5308_v9 = vpop.f32.mrf.mxu1  ;;  %v5367_v17 = vpop.f32.mrf.mxu0 }
 0x572   :  { %v5309_v60 = vadd.f32 %v5308_v9, %v5248_v11  ;;  %v11900_v3 = vadd.f32 %v5367_v17, %v5307_v32  ;;  %v6089_v32 = vld [vmem:[%s12477_s16] sm:$0x3] }
 0x573   :  { %v5310_v24 = vpop.f32.mrf.mxu1  ;;  %v5369_v18 = vpop.f32.mrf.mxu0 }
 0x574   :  { %v5311_v0 = vadd.f32 %v5310_v24, %v5250_v35  ;;  %v11902_v51 = vadd.f32 %v5369_v18, %v5309_v60  ;;  %v12561_v60 = vld [vmem:[#allocation12_spill] sm:$0xff] }
 0x575   :  { %v5312_v16 = vpop.f32.mrf.mxu1  ;;  %v5371_v27 = vpop.f32.mrf.mxu0  ;;  %v11938_v24 = vrot.slane %v6067_v41, %v12561_v60  ;;  %v11941_v18 = vrot.slane %v6089_v32, %v12561_v60 }
 0x576   :  { %v5313_v36 = vadd.f32 %v5312_v16, %v11847_v48  ;;  %v11911_v50 = vadd.f32 %v5371_v27, %v5311_v0 }
 0x577   :  { %v5316_v59 = vpop.f32.mrf.mxu1  ;;  %v5373_v43 = vpop.f32.mrf.mxu0 }
 0x578   :  { %v5317_v56 = vadd.f32 %v5316_v59, %v11852_v62  ;;  %v11914_v57 = vadd.f32 %v5373_v43, %v5313_v36  ;;  %v11945_v36 = vrot.slane %v6067_v41, %v12562_v14  ;;  %v11948_v59 = vrot.slane %v6089_v32, %v12562_v14 }
 0x579   :  { %v5318_v11 = vpop.f32.mrf.mxu1  ;;  %v5377_v61 = vpop.f32.mrf.mxu0 }
 0x57a   :  { %v5319_v35 = vadd.f32 %v5318_v11, %v11863_v15  ;;  %v11923_v31 = vadd.f32 %v5377_v61, %v5317_v56 }
 0x57b   :  { %v5320_v58 = vpop.f32.mrf.mxu1  ;;  %v5379_v48 = vpop.f32.mrf.mxu0 }
 0x57c   :  { %v11925_v20 = vadd.f32 %v5379_v48, %v5319_v35 }
 0x57d   :  { %v5321_v37 = vpop.f32.mrf.mxu1  ;;  %v5381_v62 = vpop.f32.mrf.mxu0 }
 0x57f   :  { %v5382_v12 = vpop.f32.mrf.mxu0 }
 0x5a7   :  { %v5908_v42 = vpop.f32.mrf.mxu1 }
 0x5a9   :  { %v5910_v33 = vpop.f32.mrf.mxu1  ;;  %v5969_v29 = vpop.f32.mrf.mxu0 }
 0x5aa   :  { %v5970_v13 = vadd.f32 %v5969_v29, %v5908_v42 }
 0x5ab   :  { %v5912_v34 = vpop.f32.mrf.mxu1  ;;  %v5971_v46 = vpop.f32.mrf.mxu0 }
 0x5ac   :  { %v5972_v17 = vadd.f32 %v5971_v46, %v5910_v33 }
 0x5ad   :  { %v5914_v47 = vpop.f32.mrf.mxu1  ;;  %v5973_v38 = vpop.f32.mrf.mxu0 }
 0x5ae   :  { %v5974_v55 = vadd.f32 %v5973_v38, %v5912_v34 }
 0x5af   :  { %v5918_v2 = vpop.f32.mrf.mxu1  ;;  %v5975_v15 = vpop.f32.mrf.mxu0 }
 0x5b0   :  { %v5976_v56 = vadd.f32 %v5975_v15, %v5914_v47 }
 0x5b1   :  { %v5920_v26 = vpop.f32.mrf.mxu1  ;;  %v5979_v30 = vpop.f32.mrf.mxu0 }
 0x5b2   :  { %v5980_v37 = vadd.f32 %v5979_v30, %v5918_v2 }
 0x5b3   :  { %v5922_v63 = vpop.f32.mrf.mxu1  ;;  %v5981_v52 = vpop.f32.mrf.mxu0 }
 0x5b4   :  { %v5982_v34 = vadd.f32 %v5981_v52, %v5920_v26 }
 0x5b5   :  { %v5924_v6 = vpop.f32.mrf.mxu1  ;;  %v5983_v49 = vpop.f32.mrf.mxu0 }
 0x5b7   :  { %v5928_v53 = vpop.f32.mrf.mxu1  ;;  %v5985_v19 = vpop.f32.mrf.mxu0 }
 0x5b9   :  { %v11927_v21 = vpop.f32.mrf.mxu1  ;;  %v5989_v28 = vpop.f32.mrf.mxu0 }
 0x5bb   :  { %v5932_v45 = vpop.f32.mrf.mxu1  ;;  %v11929_v4 = vpop.f32.mrf.mxu0 }
 0x5bd   :  { %v5933_v39 = vpop.f32.mrf.mxu1  ;;  %v5993_v25 = vpop.f32.mrf.mxu0 }
 0x5be   :  { %v5986_v39 = vadd.f32 %v5985_v19, %v5924_v6 }
 0x5bf   :  { %v5994_v7 = vpop.f32.mrf.mxu0  ;;  %v6030_v9 = vpop.f32.mrf.mxu1 }
 0x5c0   :  { %v6031_v23 = vadd.f32 %v6030_v9, %v5970_v13  ;;  %v5990_v13 = vadd.f32 %v5989_v28, %v5928_v53 }
 0x5c1   :  { %v6032_v0 = vpop.f32.mrf.mxu1 }
 0x5c2   :  { %v6057_v16 = vadd.f32 %v6031_v23, %v11880_v22  ;;  %v6033_v27 = vadd.f32 %v6032_v0, %v5972_v17 }
 0x5c3   :  { %v6034_v43 = vpop.f32.mrf.mxu1 }
 0x5c4   :  { %v6079_v10 = vmul.f32 %v11938_v24, %v6057_v16  ;;  %v6058_v11 = vadd.f32 %v6033_v27, %v11882_v54  ;;  %v6035_v61 = vadd.f32 %v6034_v43, %v5974_v55  ;;  %v5992_v16 = vadd.f32 %v11929_v4, %v11927_v21 }
 0x5c5   :  { %v6036_v1 = vpop.f32.mrf.mxu1 }
 0x5c6   :  { %v6101_v35 = vadd.f32 %v11941_v18, %v6079_v10  ;;  %v6080_v58 = vmul.f32 %v11945_v36, %v6058_v11  ;;  %v6059_v22 = vadd.f32 %v6035_v61, %v11890_v40  ;;  %v6037_v48 = vadd.f32 %v6036_v1, %v5976_v56 }
 0x5c7   :  { %v6040_v62 = vpop.f32.mrf.mxu1  ;;  %v5984_v40 = vadd.f32 %v5983_v49, %v5922_v63 }
 0x5c8   :  { %v6111_v12 = vmul.f32 0.2, %v6101_v35  ;;  %v6102_v42 = vadd.f32 %v11948_v59, %v6080_v58  ;;  %v6081_v33 = vmul.f32 %v11938_v24, %v6059_v22  ;;  %v6060_v29 = vadd.f32 %v6037_v48, %v11892_v5 }
 0x5c9   :  { %v6041_v54 = vadd.f32 %v6040_v62, %v5980_v37  ;;  %v6042_v46 = vpop.f32.mrf.mxu1 }
 0x5ca   :  { %v6121_v47 = vmax.f32 %v6101_v35, %v6111_v12  ;;  %v6112_v38 = vmul.f32 0.2, %v6102_v42  ;;  %v6103_v15 = vadd.f32 %v11941_v18, %v6081_v33  ;;  %v6082_v45 = vmul.f32 %v11945_v36, %v6060_v29  ;;  %v11999_v33 = vld [vmem:[#allocation5 + $0x28] sm:$0xff]  ;;  %v6265_v29 = vld [vmem:[#allocation5 + $0x10] sm:$0xfe] }
 0x5cb   :  { %v6061_v2 = vadd.f32 %v6041_v54, %v11900_v3  ;;  %v6043_v30 = vadd.f32 %v6042_v46, %v5982_v34  ;;  %v6044_v25 = vpop.f32.mrf.mxu1 }
 0x5cc   :  { %6131 = vst [vmem:[%s12483_s22] sm:$0xff] %v6121_v47  ;;  %v6151_v5 = vrot.slane %v6121_v47, 7  ;;  %v6122_v26 = vmax.f32 %v6102_v42, %v6112_v38  ;;  %v6113_v52 = vmul.f32 0.2, %v6103_v15  ;;  %v6104_v41 = vadd.f32 %v11948_v59, %v6082_v45 }
 0x5cd   :  { %v6083_v32 = vmul.f32 %v11938_v24, %v6061_v2  ;;  %v6062_v7 = vadd.f32 %v6043_v30, %v11902_v51  ;;  %v6045_v63 = vadd.f32 %v6044_v25, %v5984_v40  ;;  %v6046_v6 = vpop.f32.mrf.mxu1  ;;  %v6271_v40 = vpack.c.bf16 %v11999_v33, %v6265_v29 }
 0x5ce   :  { %6179 = vst [vmem:[#allocation5] sm:$0xfe] %v6151_v5  ;;  %6132 = vst [vmem:[%s12483_s22 + $0x8] sm:$0xff] %v6122_v26  ;;  %v6152_v3 = vrot.slane %v6122_v26, 7  ;;  %v6123_v49 = vmax.f32 %v6103_v15, %v6113_v52  ;;  %v6114_v19 = vmul.f32 0.2, %v6104_v41  ;;  %v6047_v9 = vadd.f32 %v6046_v6, %v5986_v39 }
 0x5cf   :  { %v6105_v17 = vadd.f32 %v11941_v18, %v6083_v32  ;;  %v6084_v23 = vmul.f32 %v11945_v36, %v6062_v7  ;;  %v6063_v53 = vadd.f32 %v6045_v63, %v11911_v50  ;;  %v6050_v28 = vpop.f32.mrf.mxu1  ;;  %v6337_v7 = vshll.u32 %v6271_v40, 16 }
 0x5d0   :  { %6180 = vst [vmem:[#allocation5 + $0x8] sm:$0xfe] %v6152_v3  ;;  %6133 = vst [vmem:[%s12483_s22 + $0x10] sm:$0xff] %v6123_v49  ;;  %v6153_v51 = vrot.slane %v6123_v49, 7  ;;  %v6124_v60 = vmax.f32 %v6104_v41, %v6114_v19  ;;  %v6064_v0 = vadd.f32 %v6047_v9, %v11914_v57  ;;  %v6051_v55 = vadd.f32 %v6050_v28, %v5990_v13 }
 0x5d1   :  { %v6115_v27 = vmul.f32 0.2, %v6105_v17  ;;  %v6106_v14 = vadd.f32 %v11948_v59, %v6084_v23  ;;  %v6085_v43 = vmul.f32 %v11938_v24, %v6063_v53  ;;  %v6052_v50 = vpop.f32.mrf.mxu1  ;;  %v6335_v53 = vshrl.u32 %v6271_v40, 16 }
 0x5d2   :  { %v11982_v56 = vsel %vm750_vm8, %v6151_v5, %v6153_v51  ;;  %6134 = vst [vmem:[%s12483_s22 + $0x18] sm:$0xff] %v6124_v60  ;;  %v6155_v10 = vrot.slane %v6124_v60, 7  ;;  %v6086_v57 = vmul.f32 %v11945_v36, %v6064_v0  ;;  %v6065_v11 = vadd.f32 %v6051_v55, %v11923_v31  ;;  %v6216_v0 = vld [vmem:[#allocation5 + $0x58] sm:$0xff] }
 0x5d3   :  { %v6125_v61 = vmax.f32 %v6105_v17, %v6115_v27  ;;  %v6116_v21 = vmul.f32 0.2, %v6106_v14  ;;  %v6107_v4 = vadd.f32 %v11941_v18, %v6085_v43  ;;  %v6053_v1 = vadd.f32 %v6052_v50, %v5992_v16  ;;  %v6054_v35 = vpop.f32.mrf.mxu1 }
 0x5d4   :  { %v11991_v58 = vsel %vm750_vm8, %v6152_v3, %v6155_v10  ;;  %v6108_v22 = vadd.f32 %v11948_v59, %v6086_v57  ;;  %v6087_v48 = vmul.f32 %v11938_v24, %v6065_v11  ;;  %v6268_v3 = vld [vmem:[#allocation5 + $0x70] sm:$0x7]  ;;  %v6339_v28 = vrot.slane %v6337_v7, 1 }
 0x5d5   :  { %6135 = vst [vmem:[%s12483_s22 + $0x20] sm:$0xff] %v6125_v61  ;;  %v6157_v37 = vrot.slane %v6125_v61, 7  ;;  %v6126_v62 = vmax.f32 %v6106_v14, %v6116_v21  ;;  %v6117_v31 = vmul.f32 0.2, %v6107_v4  ;;  %v6066_v12 = vadd.f32 %v6053_v1, %v11925_v20  ;;  %v6055_v42 = vpop.f32.mrf.mxu1  ;;  %v6263_v46 = vld [vmem:[#allocation5] sm:$0xfe] }
 0x5d6   :  { %v6118_v34 = vmul.f32 0.2, %v6108_v22  ;;  %v6109_v54 = vadd.f32 %v11941_v18, %v6087_v48  ;;  %v6269_v25 = vpack.c.bf16 %v11982_v56, %v6263_v46  ;;  %v6830_v23 = vld [vmem:[#allocation5] sm:$0xfc] }
 0x5d7   :  { %v6158_v47 = vsel %vm750_vm8, %v6153_v51, %v6157_v37  ;;  %6136 = vst [vmem:[%s12483_s22 + $0x28] sm:$0xff] %v6126_v62  ;;  %v6159_v24 = vrot.slane %v6126_v62, 7  ;;  %v6127_v38 = vmax.f32 %v6107_v4, %v6117_v31  ;;  %v6088_v15 = vmul.f32 %v11945_v36, %v6066_v12  ;;  %v6264_v39 = vld [vmem:[#allocation5 + $0x8] sm:$0xfe] }
 0x5d8   :  { %6183 = vst [vmem:[#allocation5 + $0x30] sm:$0xff] %v6158_v47  ;;  %v6128_v20 = vmax.f32 %v6108_v22, %v6118_v34  ;;  %v6119_v45 = vmul.f32 0.2, %v6109_v54  ;;  %v6270_v41 = vpack.c.bf16 %v11991_v58, %v6264_v39  ;;  %v6313_v6 = vshll.u32 %v6269_v25, 16  ;;  %v6831_v19 = vld [vmem:[#allocation5 + $0x8] sm:$0xfc] }
 0x5d9   :  { %v6160_v2 = vsel %vm750_vm8, %v6155_v10, %v6159_v24  ;;  %6137 = vst [vmem:[%s12483_s22 + $0x30] sm:$0xff] %v6127_v38  ;;  %v6161_v18 = vrot.slane %v6127_v38, 7  ;;  %v6110_v30 = vadd.f32 %v11948_v59, %v6088_v15  ;;  %v12035_v51 = vpack.c.bf16 %v6268_v3, %v6268_v3  ;;  %v9667_v15 = vld [vmem:[%s12560_s27 + $0x80] sm:$0xff]  }
 0x5da   :  { %6184 = vst [vmem:[#allocation5 + $0x38] sm:$0xff] %v6160_v2  ;;  %6138 = vst [vmem:[%s12483_s22 + $0x38] sm:$0xff] %v6128_v20  ;;  %v6163_v36 = vrot.slane %v6128_v20, 7  ;;  %v6129_v5 = vmax.f32 %v6109_v54, %v6119_v45  ;;  %v6325_v17 = vshll.u32 %v6270_v41, 16  ;;  %v6315_v55 = vrot.slane %v6313_v6, 1  ;;  %v9669_v20 = vld [vmem:[%s12560_s27 + $0x38] sm:$0xff]  }
 0x5db   :  { %6192 = vst.msk [vmem:[#allocation5 + $0x31] ss:$8 sm:$0x7] %vm10514_vm9, %v12557_v8  ;;  %6195 = vst.msk [vmem:[#allocation5 + $0x32] ss:$8 sm:$0x7] %vm10514_vm9, %v12557_v8  ;;  %v6162_v52 = vsel %vm750_vm8, %v6157_v37, %v6161_v18  ;;  %v6837_v16 = vpack.c.bf16 %v11991_v58, %v6831_v19  ;;  %v6836_v43 = vpack.c.bf16 %v11982_v56, %v6830_v23 }
 0x5dc   :  { %v6120_v59 = vmul.f32 0.2, %v6110_v30  ;;  %6202 = vst.msk [vmem:[#allocation5 + $0x40] sm:$0xff] %vm1573_vm10, %v12557_v8  ;;  %v6164_v13 = vsel %vm750_vm8, %v6159_v24, %v6163_v36  ;;  %6139 = vst [vmem:[%s12483_s22 + $0x40] sm:$0x3] %v6129_v5  ;;  %v6165_v32 = vrot.slane %v6129_v5, 7  ;;  %v6340_v4 = vor.u32 %v6339_v28, %v6335_v53 }
 0x5dd   :  { %v6327_v57 = vrot.slane %v6325_v17, 1  ;;  %v6311_v61 = vshrl.u32 %v6269_v25, 16  ;;  %v6323_v1 = vshrl.u32 %v6270_v41, 16  ;;  %v6366_v35 = vshll.u32 %v12035_v51, 16  ;;  %v9670_v25 = vld [vmem:[%s12560_s27 + $0x70] sm:$0xff]   ;;  %v9673_v53 = vld [vmem:[%s12560_s27 + $0x28] sm:$0xff]  }
 0x5de   :  { %v6130_v63 = vmax.f32 %v6110_v30, %v6120_v59  ;;  %v6166_v49 = vsel %vm750_vm8, %v6161_v18, %v6165_v32  ;;  %v6889_v62 = vrot.slane %v6837_v16, 1  ;;  %v6886_v29 = vrot.slane %v6836_v43, 1 }
 0x5df   :  { %6187 = vst [vmem:[#allocation5 + $0x60] sm:$0x7] %v6166_v49  ;;  %v6316_v48 = vor.u32 %v6315_v55, %v6311_v61  ;;  %v6328_v54 = vor.u32 %v6327_v57, %v6323_v1  ;;  %v6368_v7 = vrot.slane %v6366_v35, 1  ;;  %v6376_v16 = vshrl.u32 %v12035_v51, 16  ;;  %v6206_v57 = vld [vmem:[#allocation5 + $0x8] sm:$0xff]  ;;  %v9679_v35 = vld [vmem:[%s12560_s27 + $0x10] sm:$0xff]  }
 0x5e0   :  { %6140 = vst [vmem:[%s12483_s22 + $0x48] sm:$0x3] %v6130_v63  ;;  %v6167_v9 = vrot.slane %v6130_v63, 7  ;;  %v9672_v63 = vld [vmem:[%s12560_s27 + $0x68] sm:$0xff]   ;;  %v9677_v51 = vld [vmem:[%s12560_s27 + $0x18] sm:$0xff]   ;;  %v6221_v1 = vpack.c.bf16 %v11991_v58, %v6206_v57  ;;  %v7215_v57 = vld [vmem:[#allocation6 + $0x8] sm:$0xff] }
 0x5e1   :  { %v6378_v43 = vor.u32 %v6376_v16, %v6368_v7 }
 0x5e2   :  { %v6168_v60 = vsel %vm750_vm8, %v6163_v36, %v6167_v9  ;;  %v6212_v27 = vld [vmem:[#allocation5 + $0x38] sm:$0xff]  ;;  %v6211_v14 = vld [vmem:[#allocation5 + $0x30] sm:$0xff] }
 0x5e3   :  { %6188 = vst [vmem:[#allocation5 + $0x68] sm:$0x7] %v6168_v60  ;;  %v6213_v50 = vld [vmem:[#allocation5 + $0x40] sm:$0xff]  ;;  %v12040_v10 = vpack.c.bf16 %v6164_v13, %v6212_v27  ;;  %v12042_v11 = vpack.c.bf16 %v6162_v52, %v6211_v14  ;;  %v9680_v52 = vld [vmem:[%s12560_s27 + $0x188] sm:$0xff]   ;;  %v9674_v60 = vld [vmem:[%s12560_s27 + $0x60] sm:$0xff]  }
 0x5e4   :  { %v12044_v21 = vpack.c.bf16 %v6216_v0, %v6213_v50  ;;  %v9671_v13 = vld [vmem:[%s12560_s27 + $0x30] sm:$0xff]   ;;  %v9675_v27 = vld [vmem:[%s12560_s27 + $0x20] sm:$0xff]   ;;  %v9676_v14 = vld [vmem:[%s12560_s27 + $0x58] sm:$0xff]  }
 0x5e5   :  { %v6330_v22 = vshll.u32 %v12040_v10, 16  ;;  %v6318_v37 = vshll.u32 %v12042_v11, 16  ;;  %v6890_v42 = vrot.slane %v12040_v10, 1  ;;  %v6887_v34 = vrot.slane %v12042_v11, 1 }
 0x5e6   :  { %v6342_v31 = vshll.u32 %v12044_v21, 16  ;;  %v6266_v12 = vld [vmem:[#allocation5 + $0x60] sm:$0x7]  ;;  %v6362_v45 = vshrl.u32 %v12044_v21, 16  ;;  %v6354_v59 = vshrl.u32 %v12040_v10, 16  ;;  %v6346_v49 = vshrl.u32 %v12042_v11, 16 }
 0x5e7   :  { %v6332_v46 = vrot.slane %v6330_v22, 1  ;;  %v6320_v47 = vrot.slane %v6318_v37, 1  ;;  %v6272_v24 = vpack.c.bf16 %v6266_v12, %v6266_v12  ;;  %v12062_v40 = vsel %vm542_vm3, %v6889_v62, %v6890_v42  ;;  %v6207_v22 = vld [vmem:[#allocation5 + $0x10] sm:$0xff]  ;;  %v9681_v37 = vld [vmem:[%s12560_s27 + $0x148] sm:$0xff]  }
 0x5e8   :  { %v6344_v38 = vrot.slane %v6342_v31, 1  ;;  %v12067_v39 = vsel %vm542_vm3, %v6886_v29, %v6887_v34  ;;  %v6222_v58 = vpack.c.bf16 %v11999_v33, %v6207_v22  ;;  %v9683_v62 = vld [vmem:[%s12560_s27 + $0x8] sm:$0xff]   ;;  %v9684_v31 = vld [vmem:[%s12560_s27 + $0x180] sm:$0xff]  }
 0x5e9   :  { %v6333_v2 = vsel %vm160_vm2, %v6328_v54, %v6332_v46  ;;  %v6321_v18 = vsel %vm160_vm2, %v6316_v48, %v6320_v47  ;;  %v6350_v26 = vshll.u32 %v6272_v24, 16  ;;  %v6356_v6 = vor.u32 %v6354_v59, %v6332_v46  ;;  %v9682_v48 = vld [vmem:[%s12560_s27 + $0x48] sm:$0xff]   ;;  %v9686_v12 = vld [vmem:[%s12560_s27 + $0x40] sm:$0xff]   ;;  %v9688_v46 = vld [vmem:[%s12560_s27 + $0x178] sm:$0xff]  }
 0x5ea   :  { %v6267_v30 = vld [vmem:[#allocation5 + $0x68] sm:$0x7]  ;;  %v6345_v36 = vsel %vm160_vm2, %v6340_v4, %v6344_v38  ;;  %6528 = vmatprep.mubr.bf16.mxu0 %v6333_v2  ;;  %v6364_v32 = vor.u32 %v6362_v45, %v6344_v38  ;;  %v6348_v23 = vor.u32 %v6346_v49, %v6320_v47  ;;  %v6370_v50 = vshrl.u32 %v6272_v24, 16  ;;  %v9678_v4 = vld [vmem:[%s12560_s27 + $0x50] sm:$0xff]   ;;  %v9685_v29 = vld [vmem:[%s12560_s27 + $0x140] sm:$0xff]  }
 0x5eb   :  { %v6273_v5 = vpack.c.bf16 %v6267_v30, %v6267_v30  ;;  %8876 = vmatmul.mubr.msk.bf16.vlgmr.msra.gmra.mxu1 %vm1573_vm10, %v6345_v36  ;;  %6529 = vmatmul.mubr.bf16.vlgmr.msra.gmra.mxu0 %v6321_v18  ;;  %v6352_v19 = vrot.slane %v6350_v26, 1  ;;  %v9687_v54 = vld [vmem:[%s12560_s27] sm:$0xff]   ;;  %v6205_v47 = vld [vmem:[#allocation5] sm:$0xff]  ;;  %v9689_v24 = vld [vmem:[%s12560_s27 + $0x138] sm:$0xff]  }
 0x5ec   :  { %8888 = vmatpush3.bf16.msra.mxu1 %v9667_v15  ;;  %8798 = vmatpush3.bf16.msra.mxu0 %v9669_v20  ;;  %v6369_v17 = vsel %vm160_vm2, %v6364_v32, %v6368_v7  ;;  %v6220_v38 = vpack.c.bf16 %v11982_v56, %v6205_v47  ;;  %v9690_v15 = vld [vmem:[%s12560_s27 + $0x170] sm:$0xff]   ;;  %v6219_v45 = vld [vmem:[#allocation5 + $0x70] sm:$0x3]  ;;  %v9693_v2 = vld [vmem:[%s12560_s27 + $0x168] sm:$0xff]  }
 0x5ed   :  { %v6358_v41 = vshll.u32 %v6273_v5, 16  ;;  %8799 = vmatprep.subr.bf16.mxu0 %v9670_v25  ;;  %8879 = vmatprep.mubr.msk.bf16.mxu1 %vm9756_vm15, %v12557_v8  ;;  %v6373_v28 = vshrl.u32 %v6273_v5, 16  ;;  %v6353_v0 = vsel %vm160_vm2, %v6348_v23, %v6352_v19  ;;  %v6372_v61 = vor.u32 %v6370_v50, %v6352_v19  ;;  %v9692_v20 = vld [vmem:[%s12560_s27 + $0x190] sm:$0xff]   ;;  %v9694_v30 = vld [vmem:[%s12560_s27 + $0x128] sm:$0xff]   ;;  %v6218_v25 = vld [vmem:[#allocation5 + $0x68] sm:$0x3] }
 0x5ee   :  { %8835 = vmatprep.subr.bf16.mxu1 %v9680_v52  ;;  %v9691_v56 = vld [vmem:[%s12560_s27 + $0x130] sm:$0xff]   ;;  %v6228_v18 = vpack.c.bf16 %v6219_v45, %v6219_v45  ;;  %v9695_v36 = vld [vmem:[%s12560_s27 + $0x160] sm:$0xff]   ;;  %v6227_v5 = vpack.c.bf16 %v6218_v25, %v6218_v25  ;;  %v9697_v52 = vld [vmem:[%s12560_s27 + $0x158] sm:$0xff]   ;;  %v6893_v19 = vrot.slane %v12044_v21, 1 }
 0x5ef   :  { %v6360_v3 = vrot.slane %v6358_v41, 1  ;;  %v9696_v26 = vld [vmem:[%s12560_s27 + $0x120] sm:$0xff]   ;;  %v6217_v41 = vld [vmem:[#allocation5 + $0x60] sm:$0x3]  ;;  %v6834_v32 = vld [vmem:[#allocation5 + $0x68] sm:$0xf] }
 0x5f0   :  { %8800 = vmatpush3.bf16.msra.mxu0 %v9671_v13  ;;  %v6832_v59 = vld [vmem:[#allocation5 + $0x10] sm:$0xfc]  ;;  %v9698_v13 = vld [vmem:[%s12560_s27 + $0x118] sm:$0xff]   ;;  %v6226_v7 = vpack.c.bf16 %v6217_v41, %v6217_v41  ;;  %v9709_v50 = vld [vmem:[%s12564_s30 + $0x10] sm:$0xff]  }
 0x5f1   :  { %v6361_v9 = vsel %vm160_vm2, %v6356_v6, %v6360_v3  ;;  %8801 = vmatprep.subr.bf16.mxu0 %v9672_v63  ;;  %v6375_v55 = vor.u32 %v6373_v28, %v6360_v3  ;;  %v9699_v63 = vld [vmem:[%s12560_s27 + $0x150] sm:$0xff]   ;;  %v6840_v6 = vpack.c.bf16 %v6834_v32, %v6834_v32  ;;  %v9713_v22 = vld [vmem:[%s12564_s30] sm:$0xff]  }
 0x5f2   :  { %6536 = vmatprep.mubr.bf16.mxu0 %v6361_v9  ;;  %v9700_v3 = vld [vmem:[%s12560_s27 + $0x110] sm:$0xff]  }
 0x5f3   :  { %8880 = vmatmul.mubr.msk.bf16.gmra.mxu1 %vm1573_vm10, %v6369_v17  ;;  %6537 = vmatmul.mubr.bf16.gmra.mxu0 %v6353_v0  ;;  %v6897_v9 = vrot.slane %v6840_v6, 1  ;;  %v6833_v17 = vld [vmem:[#allocation5 + $0x60] sm:$0xf] }
 0x5f4   :  { %8802 = vmatpush3.bf16.msra.mxu0 %v9673_v53  ;;  %6544 = vmatprep.mubr.bf16.mxu0 %v6375_v55  ;;  %v6839_v28 = vpack.c.bf16 %v6833_v17, %v6833_v17 }
 0x5f5   :  { %8803 = vmatprep.subr.bf16.mxu0 %v9674_v60  ;;  %8883 = vmatprep.mubr.msk.bf16.mxu1 %vm9756_vm15, %v12557_v8  ;;  %v6898_v60 = vsel %vm542_vm3, %v6890_v42, %v6897_v9  ;;  %v9703_v42 = vld [vmem:[%s12564_s30 + $0x28] sm:$0xff]  }
 0x5f6   :  { %v6895_v0 = vrot.slane %v6839_v28, 1 }
 0x5f8   :  { %8804 = vmatpush3.bf16.msra.mxu0 %v9675_v27  ;;  %v6896_v16 = vsel %vm542_vm3, %v6887_v34, %v6895_v0  ;;  %v9704_v34 = vld [vmem:[%s12564_s30 + $0x7c] sm:$0xff]   ;;  %v9706_v27 = vld [vmem:[%s12564_s30 + $0x74] sm:$0xff]  }
 0x5f9   :  { %8805 = vmatprep.subr.bf16.mxu0 %v9676_v14  ;;  %v9707_v14 = vld [vmem:[%s12564_s30 + $0x18] sm:$0xff]  }
 0x5fb   :  { %8884 = vmatmul.mubr.msk.bf16.gmra.mxu1 %vm1573_vm10, %v6378_v43  ;;  %6545 = vmatmul.mubr.bf16.gmra.mxu0 %v6372_v61  ;;  %v9708_v43 = vld [vmem:[%s12564_s30 + $0x6c] sm:$0xff]  }
 0x5fc   :  { %8806 = vmatpush3.bf16.msra.mxu0 %v9677_v51  ;;  %6750 = vmatprep.mubr.bf16.mxu0 %v6221_v1  ;;  %v12251_v51 = vld [vmem:[#allocation6 + $0x18] sm:$0xff]  ;;  %v9711_v1 = vld [vmem:[%s12564_s30 + $0x8] sm:$0xff]  }
 0x5fd   :  { %8807 = vmatprep.subr.bf16.mxu0 %v9678_v4  ;;  %8889 = vmatprep.mubr.msk.bf16.mxu1 %vm9756_vm15, %v12557_v8  ;;  %v7225_v61 = vpack.c.bf16 %v12251_v51, %v7215_v57  ;;  %v9710_v4 = vld [vmem:[%s12564_s30 + $0x64] sm:$0xff]  }
 0x600   :  { %8808 = vmatpush3.bf16.msra.mxu0 %v9679_v35  ;;  %v9712_v35 = vld [vmem:[%s12564_s30 + $0x5c] sm:$0xff]  }
 0x601   :  { %8809 = vmatprep.subr.bf16.mxu0 %v9682_v48  ;;  %v9715_v48 = vld [vmem:[%s12564_s30 + $0x40] ss:$0 sps:$4 sm:$0xff]  }
 0x603   :  { %8890 = vmatmul.mubr.msk.bf16.vlgmr.msra.gmra.mxu1 %vm1573_vm10, %v6222_v58  ;;  %v9714_v58 = vld [vmem:[%s12564_s30 + $0x54] sm:$0xff]  }
 0x604   :  { %8836 = vmatpush3.bf16.msra.mxu1 %v9681_v37  ;;  %8810 = vmatpush3.bf16.msra.mxu0 %v9683_v62  ;;  %v7501_v37 = vsel %vm994_vm6, %v9715_v48, 0  ;;  %v9716_v62 = vld [vmem:[%s12564_s30 + $0x4c] sm:$0xff]  }
 0x605   :  { %8837 = vmatprep.subr.bf16.mxu1 %v9684_v31  ;;  %8811 = vmatprep.subr.bf16.mxu0 %v9686_v12  ;;  %v9717_v31 = vld [vmem:[%s12564_s30 + $0x44] sm:$0xff]  }
 0x606   :  { %8893 = vmatprep.mubr.msk.bf16.mxu1 %vm9756_vm15, %v12557_v8  ;;  %v9718_v12 = vld [vmem:[%s12564_s30 + $0x84] ss:$0 sps:$4 sm:$0xff]  }
 0x608   :  { %8838 = vmatpush3.bf16.msra.mxu1 %v9685_v29  ;;  %8812 = vmatpush3.bf16.msra.mxu0 %v9687_v54  ;;  %v7383_v29 = vsel %vm994_vm6, %v9718_v12, 0 }
 0x609   :  { %8839 = vmatprep.subr.bf16.mxu1 %v9688_v46  ;;  %8901 = vmatprep.subr.bf16.mxu0 %v12557_v8 }
 0x60b   :  { %8894 = vmatmul.mubr.msk.bf16.gmra.mxu1 %vm1573_vm10, %v12044_v21  ;;  %6751 = vmatmul.mubr.bf16.vlgmr.msra.gmra.mxu0 %v6220_v38 }
 0x60c   :  { %8840 = vmatpush3.bf16.msra.mxu1 %v9689_v24  ;;  %6758 = vmatprep.mubr.bf16.mxu0 %v12040_v10  ;;  %v9701_v10 = vld [vmem:[%s12564_s30 + $0x38] sm:$0xff]  }
 0x60d   :  { %8841 = vmatprep.subr.bf16.mxu1 %v9690_v15  ;;  %8902 = vmatpush3.bf16.msra.mxu0 %v9692_v20 }
 0x60e   :  { %8897 = vmatprep.mubr.msk.bf16.mxu1 %vm9756_vm15, %v12557_v8  ;;  %7385 = vmatprep.subr.bf16.mxu0 %v12559_v44 }
 0x610   :  { %8842 = vmatpush3.bf16.msra.mxu1 %v9691_v56 }
 0x611   :  { %8843 = vmatprep.subr.bf16.mxu1 %v9693_v2 }
 0x613   :  { %8898 = vmatmul.mubr.msk.bf16.gmra.mxu1 %vm1573_vm10, %v6228_v18  ;;  %6759 = vmatmul.mubr.bf16.gmra.mxu0 %v12042_v11  ;;  %v9702_v11 = vld [vmem:[%s12564_s30 + $0x30] sm:$0xff]  }
 0x614   :  { %8844 = vmatpush3.bf16.msra.mxu1 %v9694_v30  ;;  %7050 = vmatprep.mubr.bf16.mxu1 %v12062_v40  ;;  %v6838_v40 = vpack.c.bf16 %v11999_v33, %v6832_v59  ;;  %v6835_v33 = vld [vmem:[#allocation5 + $0x70] sm:$0xf] }
 0x615   :  { %6766 = vmatprep.mubr.bf16.mxu0 %v6227_v5  ;;  %8845 = vmatprep.subr.bf16.mxu1 %v9695_v36  ;;  %v6841_v53 = vpack.c.bf16 %v6835_v33, %v6835_v33 }
 0x616   :  { %v6892_v49 = vrot.slane %v6838_v40, 1 }
 0x617   :  { %v6899_v21 = vrot.slane %v6841_v53, 1 }
 0x618   :  { %8846 = vmatpush3.bf16.msra.mxu1 %v9696_v26  ;;  %v6894_v23 = vsel %vm542_vm3, %v6892_v49, %v6893_v19 }
 0x619   :  { %8847 = vmatprep.subr.bf16.mxu1 %v9697_v52  ;;  %v6900_v55 = vsel %vm542_vm3, %v6893_v19, %v6899_v21 }
 0x61b   :  { %6767 = vmatmul.mubr.bf16.gmra.mxu0 %v6226_v7 }
 0x61c   :  { %8848 = vmatpush3.bf16.msra.mxu1 %v9698_v13  ;;  %8903 = vmatprep.mubr.msk.bf16.mxu0 %vm9756_vm15, %v12557_v8 }
 0x61d   :  { %8849 = vmatprep.subr.bf16.mxu1 %v9699_v63 }
 0x620   :  { %8850 = vmatpush3.bf16.msra.mxu1 %v9700_v3 }
 0x621   :  { %7503 = vmatprep.subr.bf16.mxu1 %v12559_v44 }
 0x623   :  { %7051 = vmatmul.mubr.bf16.vlgmr.msra.gmra.mxu1 %v12067_v39  ;;  %8904 = vmatmul.mubr.msk.bf16.vlgmr.msra.gmra.mxu0 %vm1573_vm10, %v6894_v23  ;;  %v9705_v39 = vld [vmem:[%s12564_s30 + $0x20] sm:$0xff]  }
 0x624   :  { %7058 = vmatprep.mubr.bf16.mxu1 %v6898_v60  ;;  %8907 = vmatprep.mubr.msk.bf16.mxu0 %vm9756_vm15, %v12557_v8 }
 0x625   :  { %7504 = vmatpush1.bf16.msra.mxu1 %v9701_v10  ;;  %7386 = vmatpush1.bf16.msra.mxu0 %v9704_v34 }
 0x626   :  { %7505 = vmatprep.subr.bf16.mxu1 %v12559_v44  ;;  %7387 = vmatprep.subr.bf16.mxu0 %v12559_v44 }
 0x629   :  { %7506 = vmatpush1.bf16.msra.mxu1 %v9702_v11  ;;  %7388 = vmatpush1.bf16.msra.mxu0 %v9706_v27 }
 0x62a   :  { %7507 = vmatprep.subr.bf16.mxu1 %v12559_v44  ;;  %7389 = vmatprep.subr.bf16.mxu0 %v12559_v44 }
 0x62b   :  { %7059 = vmatmul.mubr.bf16.gmra.mxu1 %v6896_v16  ;;  %8908 = vmatmul.mubr.msk.bf16.gmra.mxu0 %vm1573_vm10, %v6900_v55 }
 0x62c   :  { %7066 = vmatprep.mubr.bf16.mxu1 %v6897_v9  ;;  %8911 = vmatprep.mubr.msk.bf16.mxu0 %vm9756_vm15, %v12557_v8 }
 0x62d   :  { %7508 = vmatpush1.bf16.msra.mxu1 %v9703_v42  ;;  %7390 = vmatpush1.bf16.msra.mxu0 %v9708_v43 }
 0x62e   :  { %7509 = vmatprep.subr.bf16.mxu1 %v12559_v44  ;;  %7391 = vmatprep.subr.bf16.mxu0 %v12559_v44 }
 0x631   :  { %7510 = vmatpush1.bf16.msra.mxu1 %v9705_v39  ;;  %7392 = vmatpush1.bf16.msra.mxu0 %v9710_v4 }
 0x632   :  { %7511 = vmatprep.subr.bf16.mxu1 %v12559_v44  ;;  %7393 = vmatprep.subr.bf16.mxu0 %v12559_v44 }
 0x633   :  { %7067 = vmatmul.mubr.bf16.gmra.mxu1 %v6895_v0  ;;  %8912 = vmatmul.mubr.msk.bf16.gmra.mxu0 %vm1573_vm10, %v6899_v21 }
 0x634   :  { %8725 = vmatprep.mubr.msk.bf16.mxu1 %vm785_vm5, %v7225_v61 }
 0x635   :  { %7512 = vmatpush1.bf16.msra.mxu1 %v9707_v14  ;;  %7394 = vmatpush1.bf16.msra.mxu0 %v9712_v35 }
 0x636   :  { %7513 = vmatprep.subr.bf16.mxu1 %v12559_v44  ;;  %7395 = vmatprep.subr.bf16.mxu0 %v12559_v44 }
 0x639   :  { %7514 = vmatpush1.bf16.msra.mxu1 %v9709_v50  ;;  %7396 = vmatpush1.bf16.msra.mxu0 %v9714_v58 }
 0x63a   :  { %7515 = vmatprep.subr.bf16.mxu1 %v12559_v44  ;;  %7397 = vmatprep.subr.bf16.mxu0 %v12559_v44 }
 0x63d   :  { %7516 = vmatpush1.bf16.msra.mxu1 %v9711_v1  ;;  %7398 = vmatpush1.bf16.msra.mxu0 %v9716_v62 }
 0x63e   :  { %7517 = vmatprep.subr.bf16.mxu1 %v12559_v44  ;;  %7399 = vmatprep.subr.bf16.mxu0 %v12559_v44 }
 0x641   :  { %7518 = vmatpush1.bf16.msra.mxu1 %v9713_v22  ;;  %7400 = vmatpush1.bf16.msra.mxu0 %v9717_v31 }
 0x642   :  { %7533 = vmatprep.subr.bf16.mxu1 %v12559_v44  ;;  %7415 = vmatprep.subr.bf16.mxu0 %v12559_v44 }
 0x645   :  { %7534 = vmatpush2.bf16.msra.mxu1 %v7501_v37  ;;  %7416 = vmatpush2.bf16.msra.mxu0 %v7383_v29 }
 0x646   :  { %7667 = vmatprep.subr.bf16.mxu0 %v12559_v44 }
 0x6ab   :  { %v6586_v54 = vpop.f32.mrf.mxu1  ;;  %v8775_v46 = vpop.f32.mrf.mxu0 }
 0x6ad   :  { %v8877_v47 = vpop.f32.mrf.mxu1  ;;  %v8776_v24 = vpop.f32.mrf.mxu0 }
 0x6ae   :  { %v8777_v43 = vadd.f32 %v8776_v24, %v8775_v46 }
 0x6af   :  { %v6589_v38 = vpop.f32.mrf.mxu1  ;;  %v8778_v15 = vpop.f32.mrf.mxu0 }
 0x6b0   :  { %v6587_v4 = vadd.f32 %v8777_v43, %v6586_v54  ;;  %v12313_v54 = vld [vmem:[%s12472_s11] ss:$0 sm:$0xff] }
 0x6b1   :  { %v8878_v20 = vpop.f32.mrf.mxu1  ;;  %v8779_v56 = vpop.f32.mrf.mxu0 }
 0x6b2   :  { %v8780_v1 = vadd.f32 %v8779_v56, %v8778_v15 }
 0x6b3   :  { %v12294_v45 = vpop.f32.mrf.mxu1  ;;  %v8781_v2 = vpop.f32.mrf.mxu0 }
 0x6b4   :  { %v6590_v31 = vadd.f32 %v8780_v1, %v6589_v38 }
 0x6b5   :  { %v8881_v18 = vpop.f32.mrf.mxu1  ;;  %v8782_v30 = vpop.f32.mrf.mxu0 }
 0x6b6   :  { %v8783_v12 = vadd.f32 %v8782_v30, %v8781_v2  ;;  %v12319_v30 = vld [vmem:[%s12478_s17] ss:$0 sm:$0xff] }
 0x6b7   :  { %v12296_v25 = vpop.f32.mrf.mxu1  ;;  %v8784_v36 = vpop.f32.mrf.mxu0 }
 0x6b9   :  { %v8882_v5 = vpop.f32.mrf.mxu1  ;;  %v8785_v26 = vpop.f32.mrf.mxu0 }
 0x6ba   :  { %v8786_v24 = vadd.f32 %v8785_v26, %v8784_v36 }
 0x6bb   :  { %v12298_v52 = vpop.f32.mrf.mxu1  ;;  %v12300_v59 = vpop.f32.mrf.mxu0 }
 0x6bd   :  { %v8885_v41 = vpop.f32.mrf.mxu1  ;;  %v12302_v13 = vpop.f32.mrf.mxu0 }
 0x6bf   :  { %v6605_v32 = vpop.f32.mrf.mxu1  ;;  %v8790_v40 = vpop.f32.mrf.mxu0 }
 0x6c0   :  { %v6595_v32 = vadd.f32 %v8783_v12, %v12294_v45  ;;  %v8789_v45 = vadd.f32 %v12302_v13, %v12300_v59 }
 0x6c1   :  { %v8886_v7 = vpop.f32.mrf.mxu1  ;;  %v8791_v63 = vpop.f32.mrf.mxu0 }
 0x6c3   :  { %v6808_v6 = vpop.f32.mrf.mxu1 }
 0x6c5   :  { %v8891_v3 = vpop.f32.mrf.mxu1 }
 0x6c7   :  { %v6811_v49 = vpop.f32.mrf.mxu1 }
 0x6c9   :  { %v8892_v19 = vpop.f32.mrf.mxu1 }
 0x6ca   :  { %v6598_v19 = vadd.f32 %v8786_v24, %v12296_v25  ;;  %v6603_v25 = vadd.f32 %v8789_v45, %v12298_v52  ;;  %v9726_v45 = vld [vmem:[%s12564_s30 + $0x88] sm:$0xff]  }
 0x6cb   :  { %v8813_v33 = vpop.f32.mrf.mxu0  ;;  %v12304_v9 = vpop.f32.mrf.mxu1 }
 0x6cd   :  { %v8814_v17 = vpop.f32.mrf.mxu0  ;;  %v8895_v23 = vpop.f32.mrf.mxu1 }
 0x6ce   :  { %v8815_v57 = vadd.f32 %v8814_v17, %v8813_v33 }
 0x6cf   :  { %v8816_v53 = vpop.f32.mrf.mxu0  ;;  %v12306_v28 = vpop.f32.mrf.mxu1 }
 0x6d0   :  { %v6753_v48 = vadd.f32 %v8815_v57, %v6587_v4 }
 0x6d1   :  { %v8817_v60 = vpop.f32.mrf.mxu0  ;;  %v8896_v21 = vpop.f32.mrf.mxu1 }
 0x6d2   :  { %v8818_v58 = vadd.f32 %v8817_v60, %v8816_v53  ;;  %v6809_v41 = vadd.f32 %v6808_v6, %v6753_v48 }
 0x6d3   :  { %v8819_v0 = vpop.f32.mrf.mxu0  ;;  %v12308_v55 = vpop.f32.mrf.mxu1 }
 0x6d4   :  { %v6756_v18 = vadd.f32 %v8818_v58, %v6590_v31 }
 0x6d5   :  { %v8820_v16 = vpop.f32.mrf.mxu0  ;;  %v8899_v10 = vpop.f32.mrf.mxu1 }
 0x6d6   :  { %v8821_v5 = vadd.f32 %v8820_v16, %v8819_v0  ;;  %v6812_v6 = vadd.f32 %v6811_v49, %v6756_v18 }
 0x6d7   :  { %v8822_v11 = vpop.f32.mrf.mxu0  ;;  %v6827_v42 = vpop.f32.mrf.mxu1 }
 0x6d8   :  { %v6761_v36 = vadd.f32 %v8821_v5, %v6595_v32 }
 0x6d9   :  { %v8823_v34 = vpop.f32.mrf.mxu0  ;;  %v8900_v39 = vpop.f32.mrf.mxu1 }
 0x6da   :  { %v8824_v2 = vadd.f32 %v8823_v34, %v8822_v11  ;;  %v6817_v49 = vadd.f32 %v12304_v9, %v6761_v36 }
 0x6db   :  { %v8825_v27 = vpop.f32.mrf.mxu0 }
 0x6dc   :  { %v6764_v21 = vadd.f32 %v8824_v2, %v6598_v19  ;;  %v7248_v2 = vld [vmem:[#allocation6 + $0x8] sm:$0xfe] }
 0x6dd   :  { %v8826_v14 = vpop.f32.mrf.mxu0 }
 0x6de   :  { %v8827_v0 = vadd.f32 %v8826_v14, %v8825_v27  ;;  %v6820_v27 = vadd.f32 %v12306_v28, %v6764_v21 }
 0x6df   :  { %v8828_v50 = vpop.f32.mrf.mxu0 }
 0x6e1   :  { %v8829_v61 = vpop.f32.mrf.mxu0 }
 0x6e2   :  { %v6769_v61 = vadd.f32 %v8827_v0, %v6603_v25 }
 0x6e3   :  { %v8851_v35 = vpop.f32.mrf.mxu1  ;;  %v7108_v22 = vpop.f32.mrf.mxu0 }
 0x6e4   :  { %v6825_v12 = vadd.f32 %v12308_v55, %v6769_v61 }
 0x6e5   :  { %v8852_v37 = vpop.f32.mrf.mxu1  ;;  %v8905_v62 = vpop.f32.mrf.mxu0 }
 0x6e6   :  { %v8853_v29 = vadd.f32 %v8852_v37, %v8851_v35 }
 0x6e7   :  { %v8854_v47 = vpop.f32.mrf.mxu1  ;;  %v7111_v20 = vpop.f32.mrf.mxu0 }
 0x6e8   :  { %v7109_v46 = vadd.f32 %v8853_v29, %v7108_v22 }
 0x6e9   :  { %v8855_v15 = vpop.f32.mrf.mxu1  ;;  %v8906_v56 = vpop.f32.mrf.mxu0 }
 0x6ea   :  { %v7130_v40 = vadd.f32 %v7109_v46, %v6809_v41  ;;  %v8856_v38 = vadd.f32 %v8855_v15, %v8854_v47 }
 0x6eb   :  { %v8857_v7 = vpop.f32.mrf.mxu1  ;;  %v7116_v63 = vpop.f32.mrf.mxu0 }
 0x6ec   :  { %v7142_v26 = vmul.f32 %v12313_v54, %v7130_v40  ;;  %v7112_v3 = vadd.f32 %v8856_v38, %v7111_v20 }
 0x6ed   :  { %v8858_v33 = vpop.f32.mrf.mxu1  ;;  %v8909_v17 = vpop.f32.mrf.mxu0 }
 0x6ee   :  { %v7154_v23 = vadd.f32 %v12319_v30, %v7142_v26  ;;  %v7131_v53 = vadd.f32 %v7112_v3, %v6812_v6  ;;  %v8859_v60 = vadd.f32 %v8858_v33, %v8857_v7  ;;  %v7252_v3 = vpack.c.bf16 %v12251_v51, %v7248_v2 }
 0x6ef   :  { %v8860_v16 = vpop.f32.mrf.mxu1  ;;  %v7119_v10 = vpop.f32.mrf.mxu0 }
 0x6f0   :  { %v7159_v11 = vmul.f32 0.2, %v7154_v23  ;;  %v7143_v42 = vmul.f32 %v12313_v54, %v7131_v53  ;;  %v7117_v34 = vadd.f32 %v8859_v60, %v7116_v63  ;;  %v7250_v53 = vld [vmem:[#allocation6 + $0x48] sm:$0x7]  ;;  %v7288_v60 = vshll.u32 %v7252_v3, 16 }
 0x6f1   :  { %v8861_v39 = vpop.f32.mrf.mxu1  ;;  %v8910_v59 = vpop.f32.mrf.mxu0  ;;  %v7254_v0 = vpack.c.bf16 %v7250_v53, %v7250_v53 }
 0x6f2   :  { %v7164_v13 = vmax.f32 %v7154_v23, %v7159_v11  ;;  %v7155_v43 = vadd.f32 %v12319_v30, %v7143_v42  ;;  %v7132_v50 = vadd.f32 %v7117_v34, %v6817_v49  ;;  %v8862_v57 = vadd.f32 %v8861_v39, %v8860_v16  ;;  %v7223_v42 = vld [vmem:[#allocation6 + $0x48] sm:$0x3] }
 0x6f3   :  { %v8863_v14 = vpop.f32.mrf.mxu1  ;;  %v7124_v4 = vpop.f32.mrf.mxu0  ;;  %v7286_v49 = vshrl.u32 %v7252_v3, 16  ;;  %v7290_v34 = vrot.slane %v7288_v60, 1  ;;  %v9725_v3 = vld [vmem:[%s12564_s30 + $0x90] sm:$0xff]  }
 0x6f4   :  { %7169 = vst [vmem:[%s12484_s23] sm:$0xff] %v7164_v13  ;;  %v7179_v9 = vrot.slane %v7164_v13, 7  ;;  %v7160_v1 = vmul.f32 0.2, %v7155_v43  ;;  %v7144_v52 = vmul.f32 %v12313_v54, %v7132_v50  ;;  %v7120_v35 = vadd.f32 %v8862_v57, %v7119_v10  ;;  %v7221_v10 = vld [vmem:[#allocation6 + $0x38] sm:$0xff] }
 0x6f5   :  { %v8864_v22 = vpop.f32.mrf.mxu1  ;;  %v8913_v48 = vpop.f32.mrf.mxu0  ;;  %v7229_v13 = vpack.c.bf16 %v7223_v42, %v7223_v42  ;;  %v7291_v61 = vor.u32 %v7290_v34, %v7286_v49 }
 0x6f6   :  { %7193 = vst [vmem:[#allocation6] sm:$0xfe] %v7179_v9  ;;  %v7165_v58 = vmax.f32 %v7155_v43, %v7160_v1  ;;  %v7156_v37 = vadd.f32 %v12319_v30, %v7144_v52  ;;  %v7133_v62 = vadd.f32 %v7120_v35, %v6820_v27  ;;  %v8865_v31 = vadd.f32 %v8864_v22, %v8863_v14  ;;  %v9719_v22 = vld [vmem:[%s12564_s30 + $0xc0] sm:$0xff]  }
 0x6f7   :  { %v8866_v28 = vpop.f32.mrf.mxu1  ;;  %v7127_v29 = vpop.f32.mrf.mxu0  ;;  %v7309_v43 = vshll.u32 %v7254_v0, 16 }
 0x6f8   :  { %7170 = vst [vmem:[%s12484_s23 + $0x8] sm:$0xff] %v7165_v58  ;;  %v7180_v47 = vrot.slane %v7165_v58, 7  ;;  %v7161_v20 = vmul.f32 0.2, %v7156_v37  ;;  %v7145_v18 = vmul.f32 %v12313_v54, %v7133_v62  ;;  %v7125_v5 = vadd.f32 %v8865_v31, %v7124_v4 }
 0x6f9   :  { %v8867_v41 = vpop.f32.mrf.mxu1  ;;  %v8914_v46 = vpop.f32.mrf.mxu0  ;;  %v7311_v52 = vrot.slane %v7309_v43, 1 }
 0x6fa   :  { %v12342_v24 = vsel %vm750_vm8, %v7179_v9, %v7180_v47  ;;  %v7166_v15 = vmax.f32 %v7156_v37, %v7161_v20  ;;  %v7157_v56 = vadd.f32 %v12319_v30, %v7145_v18  ;;  %v7134_v32 = vadd.f32 %v7125_v5, %v6825_v12  ;;  %v9720_v20 = vld [vmem:[%s12564_s30 + $0xb8] sm:$0xff]   ;;  %v7560_v46 = vld [vmem:[#allocation6 + $0x8] sm:$0xfc] }
 0x6fb   :  { %v7316_v18 = vshrl.u32 %v7254_v0, 16 }
 0x6fc   :  { %7171 = vst [vmem:[%s12484_s23 + $0x10] sm:$0xff] %v7166_v15  ;;  %v7182_v55 = vrot.slane %v7166_v15, 7  ;;  %v7162_v40 = vmul.f32 0.2, %v7157_v56  ;;  %v7146_v38 = vmul.f32 %v12313_v54, %v7134_v32 }
 0x6fd   :  { %v7214_v7 = vld [vmem:[#allocation6] sm:$0xff]  ;;  %v7318_v32 = vor.u32 %v7316_v18, %v7311_v52 }
 0x6fe   :  { %v7183_v63 = vsel %vm750_vm8, %v7180_v47, %v7182_v55  ;;  %v7167_v36 = vmax.f32 %v7157_v56, %v7162_v40  ;;  %v7158_v26 = vadd.f32 %v12319_v30, %v7146_v38  ;;  %v7224_v6 = vpack.c.bf16 %v12342_v24, %v7214_v7  ;;  %v7247_v19 = vld [vmem:[#allocation6] sm:$0xfe]  ;;  %v9721_v56 = vld [vmem:[%s12564_s30 + $0xb0] sm:$0xff]  }
 0x6ff   :  { %7195 = vst [vmem:[#allocation6 + $0x20] sm:$0xff] %v7183_v63  ;;  %v7251_v23 = vpack.c.bf16 %v12342_v24, %v7247_v19  ;;  %v9722_v38 = vld [vmem:[%s12564_s30 + $0xa8] sm:$0xff]   ;;  %v7562_v19 = vld [vmem:[#allocation6 + $0x48] sm:$0xf] }
 0x700   :  { %7201 = vst.msk [vmem:[#allocation6 + $0x21] ss:$8 sm:$0x3] %vm10174_vm4, %v12557_v8  ;;  %7204 = vst.msk [vmem:[#allocation6 + $0x22] ss:$8 sm:$0x3] %vm10174_vm4, %v12557_v8  ;;  %7536 = vmatmul.mubr.bf16.vlgmr.msra.gmra.mxu1 %v7224_v6 }
 0x701   :  { %7172 = vst [vmem:[%s12484_s23 + $0x18] sm:$0xff] %v7167_v36  ;;  %v7184_v54 = vrot.slane %v7167_v36, 7  ;;  %v7163_v30 = vmul.f32 0.2, %v7158_v26  ;;  %7211 = vst.msk [vmem:[#allocation6 + $0x28] sm:$0xff] %vm785_vm5, %v12557_v8  ;;  %v7276_v11 = vshll.u32 %v7251_v23, 16 }
 0x702   :  { %v7274_v4 = vshrl.u32 %v7251_v23, 16  ;;  %v9724_v6 = vld [vmem:[%s12564_s30 + $0x98] sm:$0xff]  }
 0x703   :  { %v7185_v33 = vsel %vm750_vm8, %v7182_v55, %v7184_v54  ;;  %v7168_v17 = vmax.f32 %v7158_v26, %v7163_v30  ;;  %v7278_v50 = vrot.slane %v7276_v11, 1  ;;  %v7564_v55 = vpack.c.bf16 %v12251_v51, %v7560_v46  ;;  %v9723_v51 = vld [vmem:[%s12564_s30 + $0xa0] sm:$0xff]   ;;  %v7559_v30 = vld [vmem:[#allocation6] sm:$0xfc] }
 0x705   :  { %7173 = vst [vmem:[%s12484_s23 + $0x20] sm:$0x3] %v7168_v17  ;;  %v7186_v21 = vrot.slane %v7168_v17, 7  ;;  %v7279_v35 = vor.u32 %v7278_v50, %v7274_v4  ;;  %v7594_v2 = vrot.slane %v7564_v55, 1  ;;  %v7563_v17 = vpack.c.bf16 %v12342_v24, %v7559_v30 }
 0x707   :  { %v7187_v16 = vsel %vm750_vm8, %v7184_v54, %v7186_v21  ;;  %v7218_v8 = vld [vmem:[#allocation6 + $0x20] sm:$0xff]  ;;  %v7591_v0 = vrot.slane %v7563_v17, 1 }
 0x708   :  { %7197 = vst [vmem:[#allocation6 + $0x40] sm:$0x7] %v7187_v16  ;;  %v7219_v25 = vld [vmem:[#allocation6 + $0x28] sm:$0xff]  ;;  %v12370_v39 = vpack.c.bf16 %v7185_v33, %v7218_v8  ;;  %v9727_v54 = vld [vmem:[%s12564_s30 + $0xc8] ss:$0 sps:$4 sm:$0xff]   ;;  %v7566_v33 = vpack.c.bf16 %v7562_v19, %v7562_v19 }
 0x709   :  { %v12372_v59 = vpack.c.bf16 %v7221_v10, %v7219_v25  ;;  %v7665_v23 = vsel %vm994_vm6, %v9727_v54, 0 }
 0x70a   :  { %v7281_v57 = vshll.u32 %v12370_v39, 16  ;;  %v7297_v5 = vshrl.u32 %v12370_v39, 16  ;;  %v7599_v53 = vrot.slane %v7566_v33, 1  ;;  %v7592_v60 = vrot.slane %v12370_v39, 1 }
 0x70b   :  { %8726 = vmatprep.mubr.msk.bf16.mxu1 %vm785_vm5, %v12372_v59  ;;  %v7293_v27 = vshll.u32 %v12372_v59, 16  ;;  %v7305_v14 = vshrl.u32 %v12372_v59, 16  ;;  %v7595_v7 = vrot.slane %v12372_v59, 1 }
 0x70c   :  { %7544 = vmatmul.mubr.bf16.gmra.mxu1 %v12370_v39  ;;  %v7283_v9 = vrot.slane %v7281_v57, 1  ;;  %v7593_v10 = vsel %vm542_vm3, %v7591_v0, %v7592_v60 }
 0x70d   :  { %v7295_v1 = vrot.slane %v7293_v27, 1  ;;  %8727 = vmatprep.mubr.msk.bf16.mxu1 %vm785_vm5, %v7229_v13  ;;  %v7596_v26 = vsel %vm542_vm3, %v7594_v2, %v7595_v7  ;;  %v7600_v16 = vsel %vm542_vm3, %v7595_v7, %v7599_v53 }
 0x70e   :  { %v7284_v28 = vsel %vm160_vm2, %v7279_v35, %v7283_v9  ;;  %v7299_v15 = vor.u32 %v7297_v5, %v7283_v9 }
 0x70f   :  { %v7249_v48 = vld [vmem:[#allocation6 + $0x40] sm:$0x7]  ;;  %v7296_v58 = vsel %vm160_vm2, %v7291_v61, %v7295_v1  ;;  %v7307_v62 = vor.u32 %v7305_v14, %v7295_v1 }
 0x710   :  { %v7222_v37 = vld [vmem:[#allocation6 + $0x40] sm:$0x3]  ;;  %v7253_v31 = vpack.c.bf16 %v7249_v48, %v7249_v48  ;;  %8713 = vmatprep.mubr.msk.bf16.mxu0 %vm785_vm5, %v7296_v58 }
 0x711   :  { %7418 = vmatmul.mubr.bf16.vlgmr.msra.gmra.mxu0 %v7284_v28  ;;  %v7312_v12 = vsel %vm160_vm2, %v7307_v62, %v7311_v52  ;;  %v7228_v47 = vpack.c.bf16 %v7222_v37, %v7222_v37  ;;  %v7561_v21 = vld [vmem:[#allocation6 + $0x40] sm:$0xf] }
 0x712   :  { %v7301_v29 = vshll.u32 %v7253_v31, 16  ;;  %7668 = vmatpush1.bf16.msra.mxu0 %v9719_v22  ;;  %8714 = vmatprep.mubr.msk.bf16.mxu0 %vm785_vm5, %v7312_v12  ;;  %v7313_v63 = vshrl.u32 %v7253_v31, 16  ;;  %v7565_v11 = vpack.c.bf16 %v7561_v21, %v7561_v21  ;;  %v8757_v12 = vld [vmem:[%s12473_s12] ss:$0 sm:$0xff] }
 0x713   :  { %7669 = vmatprep.subr.bf16.mxu0 %v12559_v44 }
 0x714   :  { %7552 = vmatmul.mubr.bf16.gmra.mxu1 %v7228_v47  ;;  %v7303_v41 = vrot.slane %v7301_v29, 1  ;;  %v7597_v42 = vrot.slane %v7565_v11, 1  ;;  %v8758_v47 = vld [vmem:[%s12479_s18] ss:$0 sm:$0xff] }
 0x716   :  { %7670 = vmatpush1.bf16.msra.mxu0 %v9720_v20  ;;  %v7304_v40 = vsel %vm160_vm2, %v7299_v15, %v7303_v41  ;;  %v7315_v36 = vor.u32 %v7313_v63, %v7303_v41  ;;  %v7598_v24 = vsel %vm542_vm3, %v7592_v60, %v7597_v42 }
 0x717   :  { %7671 = vmatprep.subr.bf16.mxu0 %v12559_v44 }
 0x719   :  { %7426 = vmatmul.mubr.bf16.gmra.mxu0 %v7304_v40 }
 0x71a   :  { %7672 = vmatpush1.bf16.msra.mxu0 %v9721_v56  ;;  %8715 = vmatprep.mubr.msk.bf16.mxu0 %vm785_vm5, %v7318_v32 }
 0x71b   :  { %7673 = vmatprep.subr.bf16.mxu0 %v12559_v44 }
 0x71e   :  { %7674 = vmatpush1.bf16.msra.mxu0 %v9722_v38 }
 0x71f   :  { %7675 = vmatprep.subr.bf16.mxu0 %v12559_v44 }
 0x721   :  { %7434 = vmatmul.mubr.bf16.gmra.mxu0 %v7315_v36 }
 0x722   :  { %7676 = vmatpush1.bf16.msra.mxu0 %v9723_v51  ;;  %8754 = vmatprep.mubr.msk.bf16.mxu0 %vm785_vm5, %v7596_v26 }
 0x723   :  { %7677 = vmatprep.subr.bf16.mxu0 %v12559_v44 }
 0x726   :  { %7678 = vmatpush1.bf16.msra.mxu0 %v9724_v6 }
 0x727   :  { %7679 = vmatprep.subr.bf16.mxu0 %v12559_v44 }
 0x72a   :  { %7680 = vmatpush1.bf16.msra.mxu0 %v9725_v3 }
 0x72b   :  { %7681 = vmatprep.subr.bf16.mxu0 %v12559_v44 }
 0x72e   :  { %7682 = vmatpush1.bf16.msra.mxu0 %v9726_v45 }
 0x72f   :  { %7697 = vmatprep.subr.bf16.mxu0 %v12559_v44 }
 0x732   :  { %7698 = vmatpush2.bf16.msra.mxu0 %v7665_v23 }
 0x735   :  { %7700 = vmatmul.mubr.bf16.vlgmr.msra.gmra.mxu0 %v7593_v10 }
 0x736   :  { %8755 = vmatprep.mubr.msk.bf16.mxu0 %vm785_vm5, %v7600_v16 }
 0x73d   :  { %7708 = vmatmul.mubr.bf16.gmra.mxu0 %v7598_v24 }
 0x73e   :  { %8756 = vmatprep.mubr.msk.bf16.mxu0 %vm785_vm5, %v7599_v53 }
 0x745   :  { %7716 = vmatmul.mubr.bf16.gmra.mxu0 %v7597_v42 }
 0x7c0   :  { %v7537_v44 = vpop.f32.mrf.mxu1 }
 0x7c2   :  { %v7539_v8 = vpop.f32.mrf.mxu1 }
 0x7c4   :  { %v7540_v49 = vpop.f32.mrf.mxu1 }
 0x7c6   :  { %v7542_v34 = vpop.f32.mrf.mxu1 }
 0x7cc   :  { %v7545_v25 = vpop.f32.mrf.mxu1 }
 0x7ce   :  { %v7547_v39 = vpop.f32.mrf.mxu1 }
 0x7d0   :  { %v7548_v59 = vpop.f32.mrf.mxu1 }
 0x7d1   :  { %v7419_v13 = vpop.f32.mrf.mxu0 }
 0x7d2   :  { %v7550_v43 = vpop.f32.mrf.mxu1  ;;  %v7538_v31 = vadd.f32 %v7537_v44, %v7419_v13 }
 0x7d3   :  { %v7421_v50 = vpop.f32.mrf.mxu0 }
 0x7d4   :  { %v7553_v57 = vpop.f32.mrf.mxu1 }
 0x7d5   :  { %v7422_v61 = vpop.f32.mrf.mxu0 }
 0x7d6   :  { %v7555_v27 = vpop.f32.mrf.mxu1  ;;  %v7541_v18 = vadd.f32 %v7540_v49, %v7422_v61 }
 0x7d7   :  { %v7424_v14 = vpop.f32.mrf.mxu0 }
 0x7d8   :  { %v7556_v4 = vpop.f32.mrf.mxu1 }
 0x7d9   :  { %v7427_v9 = vpop.f32.mrf.mxu0 }
 0x7da   :  { %v7557_v1 = vpop.f32.mrf.mxu1  ;;  %v7546_v32 = vadd.f32 %v7545_v25, %v7427_v9 }
 0x7db   :  { %v7429_v52 = vpop.f32.mrf.mxu0 }
 0x7dd   :  { %v7430_v35 = vpop.f32.mrf.mxu0 }
 0x7de   :  { %v7549_v63 = vadd.f32 %v7548_v59, %v7430_v35 }
 0x7df   :  { %v7432_v22 = vpop.f32.mrf.mxu0 }
 0x7e1   :  { %v7435_v48 = vpop.f32.mrf.mxu0 }
 0x7e2   :  { %v7554_v19 = vadd.f32 %v7553_v57, %v7435_v48 }
 0x7e3   :  { %v7437_v58 = vpop.f32.mrf.mxu0 }
 0x7e5   :  { %v7438_v37 = vpop.f32.mrf.mxu0 }
 0x7e7   :  { %v7439_v62 = vpop.f32.mrf.mxu0 }
 0x7f5   :  { %v7701_v28 = vpop.f32.mrf.mxu0 }
 0x7f6   :  { %v7723_v29 = vadd.f32 %v7701_v28, %v7538_v31 }
 0x7f7   :  { %v7703_v20 = vpop.f32.mrf.mxu0 }
 0x7f8   :  { %v7735_v5 = vmul.f32 %v8757_v12, %v7723_v29 }
 0x7f9   :  { %v7704_v41 = vpop.f32.mrf.mxu0 }
 0x7fa   :  { %v7747_v46 = vadd.f32 %v8758_v47, %v7735_v5  ;;  %v7724_v15 = vadd.f32 %v7704_v41, %v7541_v18 }
 0x7fb   :  { %v7706_v56 = vpop.f32.mrf.mxu0 }
 0x7fc   :  { %7753 = vst.msk [vmem:[%s12485_s24] sm:$0xff] %vm7752_vm0, %v7747_v46  ;;  %v7736_v55 = vmul.f32 %v8757_v12, %v7724_v15 }
 0x7fd   :  { %v7709_v40 = vpop.f32.mrf.mxu0 }
 0x7fe   :  { %v7748_v38 = vadd.f32 %v8758_v47, %v7736_v55  ;;  %v7725_v2 = vadd.f32 %v7709_v40, %v7546_v32 }
 0x7ff   :  { %v7711_v7 = vpop.f32.mrf.mxu0 }
 0x800   :  { %7754 = vst.msk [vmem:[%s12485_s24 + $0x8] sm:$0xff] %vm7752_vm0, %v7748_v38  ;;  %v7737_v51 = vmul.f32 %v8757_v12, %v7725_v2 }
 0x801   :  { %v7712_v36 = vpop.f32.mrf.mxu0 }
 0x802   :  { %v7749_v26 = vadd.f32 %v8758_v47, %v7737_v51  ;;  %v7726_v6 = vadd.f32 %v7712_v36, %v7549_v63 }
 0x803   :  { %v7714_v3 = vpop.f32.mrf.mxu0 }
 0x804   :  { %7755 = vst.msk [vmem:[%s12485_s24 + $0x10] sm:$0xff] %vm7752_vm0, %v7749_v26  ;;  %v7738_v45 = vmul.f32 %v8757_v12, %v7726_v6 }
 0x805   :  { %v7717_v54 = vpop.f32.mrf.mxu0 }
 0x806   :  { %v7750_v30 = vadd.f32 %v8758_v47, %v7738_v45  ;;  %v7727_v33 = vadd.f32 %v7717_v54, %v7554_v19 }
 0x807   :  { %v7719_v17 = vpop.f32.mrf.mxu0 }
 0x808   :  { %7756 = vst.msk [vmem:[%s12485_s24 + $0x18] sm:$0xff] %vm7752_vm0, %v7750_v30  ;;  %v7739_v23 = vmul.f32 %v8757_v12, %v7727_v33 }
 0x809   :  { %v7720_v53 = vpop.f32.mrf.mxu0 }
 0x80a   :  { %v7751_v60 = vadd.f32 %v8758_v47, %v7739_v23 }
 0x80b   :  { %v7721_v21 = vpop.f32.mrf.mxu0 }
 0x80c   :  { %7758 = vst.msk [vmem:[%s12485_s24 + $0x20] sm:$0x3] %vm7757_vm1, %v7751_v60 }
 0x80d   :  { %7783 = vsyncpa [#allocation8], 1 }

</bundles_post_ra>
